<compile_context>
chip_gen: v7x
topology: tpu7x:2x2x1
jax: 0.10.0
libtpu: 0.0.40
codegen_flags: <defaults>
</compile_context>

<pallas_src>
import functools

import jax
import jax.numpy as jnp
import numpy as np
from jax.experimental import pallas as pl
from jax.experimental.pallas import tpu as pltpu


def _generator_kernel(*refs, layer_cfg, nc_im, Wp, P0, Mp, n_valid):
    """Fused forward pass of the whole generator.

    refs layout (positional, as passed by pallas_call):
      refs[0]            xin_ref   (nc_im, Mp)   padded input, channels on sublanes
      refs[1]            valid_ref (1, Mp)       1.0 at interior (non-pad) positions
      refs[2:2+2L]       (w_l, p_l) per layer:
                           w_l (Cout_pad_l, 9*Cin_pad_l)  packed conv weights
                           p_l (Cout_pad_l, 3)            [bias, bn_gamma, bn_beta]
      refs[2+2L]         o_ref     (nc_im, Mp)   tail output (padded flat layout)
      refs[2+2L+1]       abuf      (Cmax, Mbuf)  VMEM activation buffer
      refs[2+2L+2]       xcol      (9*Cmax, Mp)  VMEM im2col scratch
    """
    L = len(layer_cfg)
    xin_ref, valid_ref = refs[0], refs[1]
    wp_refs = refs[2:2 + 2 * L]
    o_ref = refs[2 + 2 * L]
    abuf = refs[2 + 2 * L + 1]
    xcol = refs[2 + 2 * L + 2]

    valid = valid_ref[...]                       # (1, Mp)
    inv_n = 1.0 / n_valid

    # Zero the activation buffer once (slack + pad ring + padded channels),
    # then drop the already spatially-padded input into its interior.
    abuf[...] = jnp.zeros_like(abuf)
    abuf[0:nc_im, P0:P0 + Mp] = xin_ref[...]

    for l, (ci, co, use_bn, act) in enumerate(layer_cfg):
        w_ref = wp_refs[2 * l]
        p_ref = wp_refs[2 * l + 1]
        is_last = l == L - 1

        # im2col: 9 lane-shifted slabs of the flat buffer, ci rows each.
        for t in range(9):
            dy, dx = t // 3 - 1, t % 3 - 1
            start = P0 + dy * Wp + dx
            xcol[t * ci:(t + 1) * ci, :] = abuf[0:ci, start:start + Mp]

        # One MXU contraction per layer: (co, 9*ci) @ (9*ci, Mp).
        acc = jnp.dot(w_ref[...], xcol[0:9 * ci, :],
                      preferred_element_type=jnp.float32)        # (co, Mp)
        p = p_ref[...]                                           # (co, 3)

        if use_bn:
            # Conv bias is a no-op before training-mode BN -> skipped.
            # BatchNorm2d training-mode (biased) stats over valid positions.
            macc = acc * valid
            s = jnp.sum(macc, axis=1, keepdims=True)             # (co, 1)
            ss = jnp.sum(macc * macc, axis=1, keepdims=True)
            mean = s * inv_n
            var = jnp.maximum(ss * inv_n - mean * mean, 0.0)
            scale = jax.lax.rsqrt(var + 1e-5) * p[:, 1:2]
            acc = (acc - mean) * scale + p[:, 2:3]
        else:
            acc = acc + p[:, 0:1]                                # conv bias

        if act == "leaky":
            acc = jnp.where(acc >= 0, acc, 0.2 * acc)

        if not is_last:
            # Re-establish zero padding and hand the result to the next layer.
            abuf[0:co, P0:P0 + Mp] = acc * valid
        else:
            out = acc[0:nc_im, :]
            if act == "tanh":
                out = jnp.tanh(out)
            o_ref[...] = out


def generator_forward_pallas(x_nchw, params):
    """Full Generator_no_res forward.  x_nchw: (N, C, H, W) like PyTorch."""
    N, C, H, W = x_nchw.shape
    Hp, Wp = H + 2, W + 2
    Mp_real = N * Hp * Wp
    Mp = ((Mp_real + 127) // 128) * 128          # lane-dense flat spatial width
    P0 = 128                                     # lane-aligned interior start
    Mbuf = ((P0 + Mp + Wp + 1 + 127) // 128) * 128

    def rup8(c):
        return max(8, ((c + 7) // 8) * 8)

    # ---- pack per-layer parameters (tiny trace-time work) -----------------
    ops, layer_cfg = [], []
    for (w, b, gamma, beta, use_bn, act) in params:
        _, _, ci, co = w.shape                   # HWIO
        ci_p, co_p = rup8(ci), rup8(co)
        wt = jnp.transpose(w, (3, 0, 1, 2))      # (co, ky, kx, ci)
        wt = jnp.pad(wt, ((0, co_p - co), (0, 0), (0, 0), (0, ci_p - ci)))
        ops.append(wt.reshape(co_p, 9 * ci_p))   # rows match xcol tap ordering
        b_p = jnp.pad(b, (0, co_p - co))
        g_p = jnp.pad(gamma, (0, co_p - co), constant_values=1.0)
        be_p = jnp.pad(beta, (0, co_p - co))
        ops.append(jnp.stack([b_p, g_p, be_p], axis=1))          # (co_p, 3)
        layer_cfg.append((ci_p, co_p, bool(use_bn), act))

    cin_max = max(cfg[0] for cfg in layer_cfg)   # also >= all Cout_pad here

    # ---- input in padded flat layout: (C, Mp) ------------------------------
    xpad = jnp.pad(x_nchw, ((0, 0), (0, 0), (1, 1), (1, 1)))
    xin = jnp.transpose(xpad, (1, 0, 2, 3)).reshape(C, Mp_real)
    xin = jnp.pad(xin, ((0, 0), (0, Mp - Mp_real)))

    vm = np.zeros((N, Hp, Wp), np.float32)
    vm[:, 1:H + 1, 1:W + 1] = 1.0
    valid = jnp.asarray(
        np.pad(vm.reshape(1, Mp_real), ((0, 0), (0, Mp - Mp_real))))

    kernel = functools.partial(
        _generator_kernel, layer_cfg=tuple(layer_cfg), nc_im=C,
        Wp=Wp, P0=P0, Mp=Mp, n_valid=float(N * H * W))

    vmem = pl.BlockSpec(memory_space=pltpu.MemorySpace.VMEM)
    out_flat = pl.pallas_call(
        kernel,
        out_shape=jax.ShapeDtypeStruct((C, Mp), jnp.float32),
        in_specs=[vmem] * (2 + len(ops)),
        out_specs=vmem,
        scratch_shapes=[pltpu.VMEM((cin_max, Mbuf), jnp.float32),
                        pltpu.VMEM((9 * cin_max, Mp), jnp.float32)],
    )(xin, valid, *ops)

    out = out_flat[:, :Mp_real].reshape(C, N, Hp, Wp)[:, :, 1:H + 1, 1:W + 1]
    return jnp.transpose(out, (1, 0, 2, 3))      # -> (N, C, H, W)


def generator_forward_ref(x_nchw, params):
    """Pure-JAX reference for correctness checking."""
    x = x_nchw
    for (w, b, gamma, beta, use_bn, act) in params:
        y = jax.lax.conv_general_dilated(
            x, w, window_strides=(1, 1), padding=((1, 1), (1, 1)),
            dimension_numbers=("NCHW", "HWIO", "NCHW"),
            precision=jax.lax.Precision.HIGHEST)
        y = y + b[None, :, None, None]
        if use_bn:
            mean = jnp.mean(y, axis=(0, 2, 3), keepdims=True)
            var = jnp.mean((y - mean) ** 2, axis=(0, 2, 3), keepdims=True)
            y = (y - mean) * jax.lax.rsqrt(var + 1e-5)
            y = y * gamma[None, :, None, None] + beta[None, :, None, None]
        if act == "leaky":
            y = jnp.where(y >= 0, y, 0.2 * y)
        else:
            y = jnp.tanh(y)
        x = y
    return x


def build_layer_config(nc_im, nfc, min_nfc, num_layer):
    """Replicates Generator_no_res.__init__ channel bookkeeping."""
    layers = []
    layers.append((nc_im, nfc, True, "leaky"))                    # head
    Ncur = nfc
    for i in range(num_layer - 2):                                # body
        Ncur = int(nfc / (2 ** (i + 1)))
        layers.append((max(2 * Ncur, min_nfc), max(Ncur, min_nfc),
                       True, "leaky"))
    layers.append((max(Ncur, min_nfc), nc_im, False, "tanh"))     # tail
    return layers


if __name__ == "__main__":
    # Small "opt" consistent with the module: nc_im=3, nfc=16, min_nfc=8, num_layer=5
    nc_im, nfc, min_nfc, num_layer = 3, 16, 8, 5
    Nb, Hs, Ws = 2, 16, 16

    layers = build_layer_config(nc_im, nfc, min_nfc, num_layer)

    # Deterministic parameter init (synthetic; PyTorch default init not required).
    key = jax.random.PRNGKey(0)
    params = []
    for (ci, co, use_bn, act) in layers:
        key, kw, kb = jax.random.split(key, 3)
        w = 0.1 * jax.random.normal(kw, (3, 3, ci, co), jnp.float32)   # HWIO
        b = 0.05 * jax.random.normal(kb, (co,), jnp.float32)
        gamma = jnp.ones((co,), jnp.float32)   # BatchNorm2d default weight
        beta = jnp.zeros((co,), jnp.float32)   # BatchNorm2d default bias
        params.append((w, b, gamma, beta, use_bn, act))

    key, kx = jax.random.split(key)
    x = jax.random.normal(kx, (Nb, nc_im, Hs, Ws), jnp.float32)  # NCHW input

    out = jax.block_until_ready(generator_forward_pallas(x, params))
    ref = generator_forward_ref(x, params)

    assert out.shape == (Nb, nc_im, Hs, Ws) and out.dtype == jnp.float32
    np.testing.assert_allclose(np.asarray(out), np.asarray(ref),
                               atol=2e-3, rtol=2e-3)
    print("KERNEL_OK")
</pallas_src>

<mosaic_0001>
module attributes {stable_mosaic.version = 11 : i64} {
  func.func @_generator_kernel(%arg0: memref<3x768xf32, #tpu.memory_space<vmem>>, %arg1: memref<1x768xf32, #tpu.memory_space<vmem>>, %arg2: memref<16x72xf32, #tpu.memory_space<vmem>>, %arg3: memref<16x3xf32, #tpu.memory_space<vmem>>, %arg4: memref<8x144xf32, #tpu.memory_space<vmem>>, %arg5: memref<8x3xf32, #tpu.memory_space<vmem>>, %arg6: memref<8x72xf32, #tpu.memory_space<vmem>>, %arg7: memref<8x3xf32, #tpu.memory_space<vmem>>, %arg8: memref<8x72xf32, #tpu.memory_space<vmem>>, %arg9: memref<8x3xf32, #tpu.memory_space<vmem>>, %arg10: memref<8x72xf32, #tpu.memory_space<vmem>>, %arg11: memref<8x3xf32, #tpu.memory_space<vmem>>, %arg12: memref<3x768xf32, #tpu.memory_space<vmem>>, %arg13: memref<16x1024xf32, #tpu.memory_space<vmem>>, %arg14: memref<144x768xf32, #tpu.memory_space<vmem>>) attributes {dimension_semantics = [], scalar_prefetch = 0 : i64, scratch_operands = 2 : i64, tpu.core_type = #tpu.core_type<tc>} {
    %c0 = arith.constant 0 : index
    %c0_0 = arith.constant 0 : index
    %0 = vector.load %arg1[%c0, %c0_0] : memref<1x768xf32, #tpu.memory_space<vmem>>, vector<1x768xf32>
    %cst = arith.constant 0.000000e+00 : f32
    %1 = vector.broadcast %cst : f32 to vector<16x1024xf32>
    %c0_1 = arith.constant 0 : index
    %c0_2 = arith.constant 0 : index
    %2 = vector.load %arg13[%c0_1, %c0_2] : memref<16x1024xf32, #tpu.memory_space<vmem>>, vector<16x1024xf32>
    tpu.vector_store %arg13[%c0_1, %c0_2], %1 {strides = array<i32>} : memref<16x1024xf32, #tpu.memory_space<vmem>>, vector<16x1024xf32>,
    %c0_3 = arith.constant 0 : index
    %c0_4 = arith.constant 0 : index
    %3 = vector.load %arg0[%c0_3, %c0_4] : memref<3x768xf32, #tpu.memory_space<vmem>>, vector<3x768xf32>
    %c0_5 = arith.constant 0 : index
    %c128 = arith.constant 128 : index
    %4 = vector.load %arg13[%c0_5, %c128] : memref<16x1024xf32, #tpu.memory_space<vmem>>, vector<3x768xf32>
    tpu.vector_store %arg13[%c0_5, %c128], %3 {strides = array<i32>} : memref<16x1024xf32, #tpu.memory_space<vmem>>, vector<3x768xf32>,
    %c0_6 = arith.constant 0 : index
    %c109 = arith.constant 109 : index
    %5 = vector.load %arg13[%c0_6, %c109] : memref<16x1024xf32, #tpu.memory_space<vmem>>, vector<8x768xf32>
    %c0_7 = arith.constant 0 : index
    %c0_8 = arith.constant 0 : index
    %6 = vector.load %arg14[%c0_7, %c0_8] : memref<144x768xf32, #tpu.memory_space<vmem>>, vector<8x768xf32>
    tpu.vector_store %arg14[%c0_7, %c0_8], %5 {strides = array<i32>} : memref<144x768xf32, #tpu.memory_space<vmem>>, vector<8x768xf32>,
    %c0_9 = arith.constant 0 : index
    %c110 = arith.constant 110 : index
    %7 = vector.load %arg13[%c0_9, %c110] : memref<16x1024xf32, #tpu.memory_space<vmem>>, vector<8x768xf32>
    %c8 = arith.constant 8 : index
    %c0_10 = arith.constant 0 : index
    %8 = vector.load %arg14[%c8, %c0_10] : memref<144x768xf32, #tpu.memory_space<vmem>>, vector<8x768xf32>
    tpu.vector_store %arg14[%c8, %c0_10], %7 {strides = array<i32>} : memref<144x768xf32, #tpu.memory_space<vmem>>, vector<8x768xf32>,
    %c0_11 = arith.constant 0 : index
    %c111 = arith.constant 111 : index
    %9 = vector.load %arg13[%c0_11, %c111] : memref<16x1024xf32, #tpu.memory_space<vmem>>, vector<8x768xf32>
    %c16 = arith.constant 16 : index
    %c0_12 = arith.constant 0 : index
    %10 = vector.load %arg14[%c16, %c0_12] : memref<144x768xf32, #tpu.memory_space<vmem>>, vector<8x768xf32>
    tpu.vector_store %arg14[%c16, %c0_12], %9 {strides = array<i32>} : memref<144x768xf32, #tpu.memory_space<vmem>>, vector<8x768xf32>,
    %c0_13 = arith.constant 0 : index
    %c127 = arith.constant 127 : index
    %11 = vector.load %arg13[%c0_13, %c127] : memref<16x1024xf32, #tpu.memory_space<vmem>>, vector<8x768xf32>
    %c24 = arith.constant 24 : index
    %c0_14 = arith.constant 0 : index
    %12 = vector.load %arg14[%c24, %c0_14] : memref<144x768xf32, #tpu.memory_space<vmem>>, vector<8x768xf32>
    tpu.vector_store %arg14[%c24, %c0_14], %11 {strides = array<i32>} : memref<144x768xf32, #tpu.memory_space<vmem>>, vector<8x768xf32>,
    %c0_15 = arith.constant 0 : index
    %c128_16 = arith.constant 128 : index
    %13 = vector.load %arg13[%c0_15, %c128_16] : memref<16x1024xf32, #tpu.memory_space<vmem>>, vector<8x768xf32>
    %c32 = arith.constant 32 : index
    %c0_17 = arith.constant 0 : index
    %14 = vector.load %arg14[%c32, %c0_17] : memref<144x768xf32, #tpu.memory_space<vmem>>, vector<8x768xf32>
    tpu.vector_store %arg14[%c32, %c0_17], %13 {strides = array<i32>} : memref<144x768xf32, #tpu.memory_space<vmem>>, vector<8x768xf32>,
    %c0_18 = arith.constant 0 : index
    %c129 = arith.constant 129 : index
    %15 = vector.load %arg13[%c0_18, %c129] : memref<16x1024xf32, #tpu.memory_space<vmem>>, vector<8x768xf32>
    %c40 = arith.constant 40 : index
    %c0_19 = arith.constant 0 : index
    %16 = vector.load %arg14[%c40, %c0_19] : memref<144x768xf32, #tpu.memory_space<vmem>>, vector<8x768xf32>
    tpu.vector_store %arg14[%c40, %c0_19], %15 {strides = array<i32>} : memref<144x768xf32, #tpu.memory_space<vmem>>, vector<8x768xf32>,
    %c0_20 = arith.constant 0 : index
    %c145 = arith.constant 145 : index
    %17 = vector.load %arg13[%c0_20, %c145] : memref<16x1024xf32, #tpu.memory_space<vmem>>, vector<8x768xf32>
    %c48 = arith.constant 48 : index
    %c0_21 = arith.constant 0 : index
    %18 = vector.load %arg14[%c48, %c0_21] : memref<144x768xf32, #tpu.memory_space<vmem>>, vector<8x768xf32>
    tpu.vector_store %arg14[%c48, %c0_21], %17 {strides = array<i32>} : memref<144x768xf32, #tpu.memory_space<vmem>>, vector<8x768xf32>,
    %c0_22 = arith.constant 0 : index
    %c146 = arith.constant 146 : index
    %19 = vector.load %arg13[%c0_22, %c146] : memref<16x1024xf32, #tpu.memory_space<vmem>>, vector<8x768xf32>
    %c56 = arith.constant 56 : index
    %c0_23 = arith.constant 0 : index
    %20 = vector.load %arg14[%c56, %c0_23] : memref<144x768xf32, #tpu.memory_space<vmem>>, vector<8x768xf32>
    tpu.vector_store %arg14[%c56, %c0_23], %19 {strides = array<i32>} : memref<144x768xf32, #tpu.memory_space<vmem>>, vector<8x768xf32>,
    %c0_24 = arith.constant 0 : index
    %c147 = arith.constant 147 : index
    %21 = vector.load %arg13[%c0_24, %c147] : memref<16x1024xf32, #tpu.memory_space<vmem>>, vector<8x768xf32>
    %c64 = arith.constant 64 : index
    %c0_25 = arith.constant 0 : index
    %22 = vector.load %arg14[%c64, %c0_25] : memref<144x768xf32, #tpu.memory_space<vmem>>, vector<8x768xf32>
    tpu.vector_store %arg14[%c64, %c0_25], %21 {strides = array<i32>} : memref<144x768xf32, #tpu.memory_space<vmem>>, vector<8x768xf32>,
    %c0_26 = arith.constant 0 : index
    %c0_27 = arith.constant 0 : index
    %23 = vector.load %arg2[%c0_26, %c0_27] : memref<16x72xf32, #tpu.memory_space<vmem>>, vector<16x72xf32>
    %c0_28 = arith.constant 0 : index
    %c0_29 = arith.constant 0 : index
    %24 = vector.load %arg14[%c0_28, %c0_29] : memref<144x768xf32, #tpu.memory_space<vmem>>, vector<72x768xf32>
    %cst_30 = arith.constant dense<0.000000e+00> : vector<16x768xf32>
    %25 = tpu.matmul %23, %24, %cst_30 {dimension_numbers = #tpu.dot_dimension_numbers<[1], [0], [0], [1], [0, 0, 1, 1], [], []>} : vector<16x72xf32>, vector<72x768xf32>, vector<16x768xf32> -> vector<16x768xf32>
    %c0_31 = arith.constant 0 : index
    %c0_32 = arith.constant 0 : index
    %26 = vector.load %arg3[%c0_31, %c0_32] : memref<16x3xf32, #tpu.memory_space<vmem>>, vector<16x3xf32>
    %27 = vector.broadcast %0 : vector<1x768xf32> to vector<16x768xf32>
    %28 = arith.mulf %25, %27 : vector<16x768xf32>
    %cst_33 = arith.constant dense<0.000000e+00> : vector<16xf32>
    %29 = vector.multi_reduction <add>, %28, %cst_33 [1] : vector<16x768xf32> to vector<16xf32>
    %30 = vector.shape_cast %29 : vector<16xf32> to vector<16x1xf32>
    %31 = arith.mulf %28, %28 : vector<16x768xf32>
    %cst_34 = arith.constant dense<0.000000e+00> : vector<16xf32>
    %32 = vector.multi_reduction <add>, %31, %cst_34 [1] : vector<16x768xf32> to vector<16xf32>
    %33 = vector.shape_cast %32 : vector<16xf32> to vector<16x1xf32>
    %cst_35 = arith.constant 0.001953125 : f32
    %34 = vector.broadcast %cst_35 : f32 to vector<16x1xf32>
    %35 = arith.mulf %30, %34 : vector<16x1xf32>
    %cst_36 = arith.constant 0.001953125 : f32
    %36 = vector.broadcast %cst_36 : f32 to vector<16x1xf32>
    %37 = arith.mulf %33, %36 : vector<16x1xf32>
    %38 = arith.mulf %35, %35 : vector<16x1xf32>
    %39 = arith.subf %37, %38 : vector<16x1xf32>
    %cst_37 = arith.constant 0.000000e+00 : f32
    %40 = vector.broadcast %cst_37 : f32 to vector<16x1xf32>
    %41 = arith.maximumf %39, %40 : vector<16x1xf32>
    %cst_38 = arith.constant 9.99999974E-6 : f32
    %42 = vector.broadcast %cst_38 : f32 to vector<16x1xf32>
    %43 = arith.addf %41, %42 : vector<16x1xf32>
    %44 = math.rsqrt %43 : vector<16x1xf32>
    %45 = vector.extract_strided_slice %26 {offsets = [0, 1], sizes = [16, 1], strides = [1, 1]} : vector<16x3xf32> to vector<16x1xf32>
    %46 = arith.mulf %44, %45 : vector<16x1xf32>
    %47 = vector.broadcast %35 : vector<16x1xf32> to vector<16x768xf32>
    %48 = arith.subf %25, %47 : vector<16x768xf32>
    %49 = vector.broadcast %46 : vector<16x1xf32> to vector<16x768xf32>
    %50 = arith.mulf %48, %49 : vector<16x768xf32>
    %51 = vector.extract_strided_slice %26 {offsets = [0, 2], sizes = [16, 1], strides = [1, 1]} : vector<16x3xf32> to vector<16x1xf32>
    %52 = vector.broadcast %51 : vector<16x1xf32> to vector<16x768xf32>
    %53 = arith.addf %50, %52 : vector<16x768xf32>
    %cst_39 = arith.constant 0.000000e+00 : f32
    %54 = vector.broadcast %cst_39 : f32 to vector<16x768xf32>
    %55 = arith.cmpf oge, %53, %54 : vector<16x768xf32>
    %cst_40 = arith.constant 2.000000e-01 : f32
    %56 = vector.broadcast %cst_40 : f32 to vector<16x768xf32>
    %57 = arith.mulf %56, %53 : vector<16x768xf32>
    %58 = arith.select %55, %53, %57 : vector<16x768xi1>, vector<16x768xf32>
    %59 = vector.broadcast %0 : vector<1x768xf32> to vector<16x768xf32>
    %60 = arith.mulf %58, %59 : vector<16x768xf32>
    %c0_41 = arith.constant 0 : index
    %c128_42 = arith.constant 128 : index
    %61 = vector.load %arg13[%c0_41, %c128_42] : memref<16x1024xf32, #tpu.memory_space<vmem>>, vector<16x768xf32>
    tpu.vector_store %arg13[%c0_41, %c128_42], %60 {strides = array<i32>} : memref<16x1024xf32, #tpu.memory_space<vmem>>, vector<16x768xf32>,
    %c0_43 = arith.constant 0 : index
    %c109_44 = arith.constant 109 : index
    %62 = vector.load %arg13[%c0_43, %c109_44] : memref<16x1024xf32, #tpu.memory_space<vmem>>, vector<16x768xf32>
    %c0_45 = arith.constant 0 : index
    %c0_46 = arith.constant 0 : index
    %63 = vector.load %arg14[%c0_45, %c0_46] : memref<144x768xf32, #tpu.memory_space<vmem>>, vector<16x768xf32>
    tpu.vector_store %arg14[%c0_45, %c0_46], %62 {strides = array<i32>} : memref<144x768xf32, #tpu.memory_space<vmem>>, vector<16x768xf32>,
    %c0_47 = arith.constant 0 : index
    %c110_48 = arith.constant 110 : index
    %64 = vector.load %arg13[%c0_47, %c110_48] : memref<16x1024xf32, #tpu.memory_space<vmem>>, vector<16x768xf32>
    %c16_49 = arith.constant 16 : index
    %c0_50 = arith.constant 0 : index
    %65 = vector.load %arg14[%c16_49, %c0_50] : memref<144x768xf32, #tpu.memory_space<vmem>>, vector<16x768xf32>
    tpu.vector_store %arg14[%c16_49, %c0_50], %64 {strides = array<i32>} : memref<144x768xf32, #tpu.memory_space<vmem>>, vector<16x768xf32>,
    %c0_51 = arith.constant 0 : index
    %c111_52 = arith.constant 111 : index
    %66 = vector.load %arg13[%c0_51, %c111_52] : memref<16x1024xf32, #tpu.memory_space<vmem>>, vector<16x768xf32>
    %c32_53 = arith.constant 32 : index
    %c0_54 = arith.constant 0 : index
    %67 = vector.load %arg14[%c32_53, %c0_54] : memref<144x768xf32, #tpu.memory_space<vmem>>, vector<16x768xf32>
    tpu.vector_store %arg14[%c32_53, %c0_54], %66 {strides = array<i32>} : memref<144x768xf32, #tpu.memory_space<vmem>>, vector<16x768xf32>,
    %c0_55 = arith.constant 0 : index
    %c127_56 = arith.constant 127 : index
    %68 = vector.load %arg13[%c0_55, %c127_56] : memref<16x1024xf32, #tpu.memory_space<vmem>>, vector<16x768xf32>
    %c48_57 = arith.constant 48 : index
    %c0_58 = arith.constant 0 : index
    %69 = vector.load %arg14[%c48_57, %c0_58] : memref<144x768xf32, #tpu.memory_space<vmem>>, vector<16x768xf32>
    tpu.vector_store %arg14[%c48_57, %c0_58], %68 {strides = array<i32>} : memref<144x768xf32, #tpu.memory_space<vmem>>, vector<16x768xf32>,
    %c0_59 = arith.constant 0 : index
    %c128_60 = arith.constant 128 : index
    %70 = vector.load %arg13[%c0_59, %c128_60] : memref<16x1024xf32, #tpu.memory_space<vmem>>, vector<16x768xf32>
    %c64_61 = arith.constant 64 : index
    %c0_62 = arith.constant 0 : index
    %71 = vector.load %arg14[%c64_61, %c0_62] : memref<144x768xf32, #tpu.memory_space<vmem>>, vector<16x768xf32>
    tpu.vector_store %arg14[%c64_61, %c0_62], %70 {strides = array<i32>} : memref<144x768xf32, #tpu.memory_space<vmem>>, vector<16x768xf32>,
    %c0_63 = arith.constant 0 : index
    %c129_64 = arith.constant 129 : index
    %72 = vector.load %arg13[%c0_63, %c129_64] : memref<16x1024xf32, #tpu.memory_space<vmem>>, vector<16x768xf32>
    %c80 = arith.constant 80 : index
    %c0_65 = arith.constant 0 : index
    %73 = vector.load %arg14[%c80, %c0_65] : memref<144x768xf32, #tpu.memory_space<vmem>>, vector<16x768xf32>
    tpu.vector_store %arg14[%c80, %c0_65], %72 {strides = array<i32>} : memref<144x768xf32, #tpu.memory_space<vmem>>, vector<16x768xf32>,
    %c0_66 = arith.constant 0 : index
    %c145_67 = arith.constant 145 : index
    %74 = vector.load %arg13[%c0_66, %c145_67] : memref<16x1024xf32, #tpu.memory_space<vmem>>, vector<16x768xf32>
    %c96 = arith.constant 96 : index
    %c0_68 = arith.constant 0 : index
    %75 = vector.load %arg14[%c96, %c0_68] : memref<144x768xf32, #tpu.memory_space<vmem>>, vector<16x768xf32>
    tpu.vector_store %arg14[%c96, %c0_68], %74 {strides = array<i32>} : memref<144x768xf32, #tpu.memory_space<vmem>>, vector<16x768xf32>,
    %c0_69 = arith.constant 0 : index
    %c146_70 = arith.constant 146 : index
    %76 = vector.load %arg13[%c0_69, %c146_70] : memref<16x1024xf32, #tpu.memory_space<vmem>>, vector<16x768xf32>
    %c112 = arith.constant 112 : index
    %c0_71 = arith.constant 0 : index
    %77 = vector.load %arg14[%c112, %c0_71] : memref<144x768xf32, #tpu.memory_space<vmem>>, vector<16x768xf32>
    tpu.vector_store %arg14[%c112, %c0_71], %76 {strides = array<i32>} : memref<144x768xf32, #tpu.memory_space<vmem>>, vector<16x768xf32>,
    %c0_72 = arith.constant 0 : index
    %c147_73 = arith.constant 147 : index
    %78 = vector.load %arg13[%c0_72, %c147_73] : memref<16x1024xf32, #tpu.memory_space<vmem>>, vector<16x768xf32>
    %c128_74 = arith.constant 128 : index
    %c0_75 = arith.constant 0 : index
    %79 = vector.load %arg14[%c128_74, %c0_75] : memref<144x768xf32, #tpu.memory_space<vmem>>, vector<16x768xf32>
    tpu.vector_store %arg14[%c128_74, %c0_75], %78 {strides = array<i32>} : memref<144x768xf32, #tpu.memory_space<vmem>>, vector<16x768xf32>,
    %c0_76 = arith.constant 0 : index
    %c0_77 = arith.constant 0 : index
    %80 = vector.load %arg4[%c0_76, %c0_77] : memref<8x144xf32, #tpu.memory_space<vmem>>, vector<8x144xf32>
    %c0_78 = arith.constant 0 : index
    %c0_79 = arith.constant 0 : index
    %81 = vector.load %arg14[%c0_78, %c0_79] : memref<144x768xf32, #tpu.memory_space<vmem>>, vector<144x768xf32>
    %cst_80 = arith.constant dense<0.000000e+00> : vector<8x768xf32>
    %82 = tpu.matmul %80, %81, %cst_80 {dimension_numbers = #tpu.dot_dimension_numbers<[1], [0], [0], [1], [0, 0, 1, 1], [], []>} : vector<8x144xf32>, vector<144x768xf32>, vector<8x768xf32> -> vector<8x768xf32>
    %c0_81 = arith.constant 0 : index
    %c0_82 = arith.constant 0 : index
    %83 = vector.load %arg5[%c0_81, %c0_82] : memref<8x3xf32, #tpu.memory_space<vmem>>, vector<8x3xf32>
    %84 = vector.broadcast %0 : vector<1x768xf32> to vector<8x768xf32>
    %85 = arith.mulf %82, %84 : vector<8x768xf32>
    %cst_83 = arith.constant dense<0.000000e+00> : vector<8xf32>
    %86 = vector.multi_reduction <add>, %85, %cst_83 [1] : vector<8x768xf32> to vector<8xf32>
    %87 = vector.shape_cast %86 : vector<8xf32> to vector<8x1xf32>
    %88 = arith.mulf %85, %85 : vector<8x768xf32>
    %cst_84 = arith.constant dense<0.000000e+00> : vector<8xf32>
    %89 = vector.multi_reduction <add>, %88, %cst_84 [1] : vector<8x768xf32> to vector<8xf32>
    %90 = vector.shape_cast %89 : vector<8xf32> to vector<8x1xf32>
    %cst_85 = arith.constant 0.001953125 : f32
    %91 = vector.broadcast %cst_85 : f32 to vector<8x1xf32>
    %92 = arith.mulf %87, %91 : vector<8x1xf32>
    %cst_86 = arith.constant 0.001953125 : f32
    %93 = vector.broadcast %cst_86 : f32 to vector<8x1xf32>
    %94 = arith.mulf %90, %93 : vector<8x1xf32>
    %95 = arith.mulf %92, %92 : vector<8x1xf32>
    %96 = arith.subf %94, %95 : vector<8x1xf32>
    %cst_87 = arith.constant 0.000000e+00 : f32
    %97 = vector.broadcast %cst_87 : f32 to vector<8x1xf32>
    %98 = arith.maximumf %96, %97 : vector<8x1xf32>
    %cst_88 = arith.constant 9.99999974E-6 : f32
    %99 = vector.broadcast %cst_88 : f32 to vector<8x1xf32>
    %100 = arith.addf %98, %99 : vector<8x1xf32>
    %101 = math.rsqrt %100 : vector<8x1xf32>
    %102 = vector.extract_strided_slice %83 {offsets = [0, 1], sizes = [8, 1], strides = [1, 1]} : vector<8x3xf32> to vector<8x1xf32>
    %103 = arith.mulf %101, %102 : vector<8x1xf32>
    %104 = vector.broadcast %92 : vector<8x1xf32> to vector<8x768xf32>
    %105 = arith.subf %82, %104 : vector<8x768xf32>
    %106 = vector.broadcast %103 : vector<8x1xf32> to vector<8x768xf32>
    %107 = arith.mulf %105, %106 : vector<8x768xf32>
    %108 = vector.extract_strided_slice %83 {offsets = [0, 2], sizes = [8, 1], strides = [1, 1]} : vector<8x3xf32> to vector<8x1xf32>
    %109 = vector.broadcast %108 : vector<8x1xf32> to vector<8x768xf32>
    %110 = arith.addf %107, %109 : vector<8x768xf32>
    %cst_89 = arith.constant 0.000000e+00 : f32
    %111 = vector.broadcast %cst_89 : f32 to vector<8x768xf32>
    %112 = arith.cmpf oge, %110, %111 : vector<8x768xf32>
    %cst_90 = arith.constant 2.000000e-01 : f32
    %113 = vector.broadcast %cst_90 : f32 to vector<8x768xf32>
    %114 = arith.mulf %113, %110 : vector<8x768xf32>
    %115 = arith.select %112, %110, %114 : vector<8x768xi1>, vector<8x768xf32>
    %116 = vector.broadcast %0 : vector<1x768xf32> to vector<8x768xf32>
    %117 = arith.mulf %115, %116 : vector<8x768xf32>
    %c0_91 = arith.constant 0 : index
    %c128_92 = arith.constant 128 : index
    %118 = vector.load %arg13[%c0_91, %c128_92] : memref<16x1024xf32, #tpu.memory_space<vmem>>, vector<8x768xf32>
    tpu.vector_store %arg13[%c0_91, %c128_92], %117 {strides = array<i32>} : memref<16x1024xf32, #tpu.memory_space<vmem>>, vector<8x768xf32>,
    %c0_93 = arith.constant 0 : index
    %c109_94 = arith.constant 109 : index
    %119 = vector.load %arg13[%c0_93, %c109_94] : memref<16x1024xf32, #tpu.memory_space<vmem>>, vector<8x768xf32>
    %c0_95 = arith.constant 0 : index
    %c0_96 = arith.constant 0 : index
    %120 = vector.load %arg14[%c0_95, %c0_96] : memref<144x768xf32, #tpu.memory_space<vmem>>, vector<8x768xf32>
    tpu.vector_store %arg14[%c0_95, %c0_96], %119 {strides = array<i32>} : memref<144x768xf32, #tpu.memory_space<vmem>>, vector<8x768xf32>,
    %c0_97 = arith.constant 0 : index
    %c110_98 = arith.constant 110 : index
    %121 = vector.load %arg13[%c0_97, %c110_98] : memref<16x1024xf32, #tpu.memory_space<vmem>>, vector<8x768xf32>
    %c8_99 = arith.constant 8 : index
    %c0_100 = arith.constant 0 : index
    %122 = vector.load %arg14[%c8_99, %c0_100] : memref<144x768xf32, #tpu.memory_space<vmem>>, vector<8x768xf32>
    tpu.vector_store %arg14[%c8_99, %c0_100], %121 {strides = array<i32>} : memref<144x768xf32, #tpu.memory_space<vmem>>, vector<8x768xf32>,
    %c0_101 = arith.constant 0 : index
    %c111_102 = arith.constant 111 : index
    %123 = vector.load %arg13[%c0_101, %c111_102] : memref<16x1024xf32, #tpu.memory_space<vmem>>, vector<8x768xf32>
    %c16_103 = arith.constant 16 : index
    %c0_104 = arith.constant 0 : index
    %124 = vector.load %arg14[%c16_103, %c0_104] : memref<144x768xf32, #tpu.memory_space<vmem>>, vector<8x768xf32>
    tpu.vector_store %arg14[%c16_103, %c0_104], %123 {strides = array<i32>} : memref<144x768xf32, #tpu.memory_space<vmem>>, vector<8x768xf32>,
    %c0_105 = arith.constant 0 : index
    %c127_106 = arith.constant 127 : index
    %125 = vector.load %arg13[%c0_105, %c127_106] : memref<16x1024xf32, #tpu.memory_space<vmem>>, vector<8x768xf32>
    %c24_107 = arith.constant 24 : index
    %c0_108 = arith.constant 0 : index
    %126 = vector.load %arg14[%c24_107, %c0_108] : memref<144x768xf32, #tpu.memory_space<vmem>>, vector<8x768xf32>
    tpu.vector_store %arg14[%c24_107, %c0_108], %125 {strides = array<i32>} : memref<144x768xf32, #tpu.memory_space<vmem>>, vector<8x768xf32>,
    %c0_109 = arith.constant 0 : index
    %c128_110 = arith.constant 128 : index
    %127 = vector.load %arg13[%c0_109, %c128_110] : memref<16x1024xf32, #tpu.memory_space<vmem>>, vector<8x768xf32>
    %c32_111 = arith.constant 32 : index
    %c0_112 = arith.constant 0 : index
    %128 = vector.load %arg14[%c32_111, %c0_112] : memref<144x768xf32, #tpu.memory_space<vmem>>, vector<8x768xf32>
    tpu.vector_store %arg14[%c32_111, %c0_112], %127 {strides = array<i32>} : memref<144x768xf32, #tpu.memory_space<vmem>>, vector<8x768xf32>,
    %c0_113 = arith.constant 0 : index
    %c129_114 = arith.constant 129 : index
    %129 = vector.load %arg13[%c0_113, %c129_114] : memref<16x1024xf32, #tpu.memory_space<vmem>>, vector<8x768xf32>
    %c40_115 = arith.constant 40 : index
    %c0_116 = arith.constant 0 : index
    %130 = vector.load %arg14[%c40_115, %c0_116] : memref<144x768xf32, #tpu.memory_space<vmem>>, vector<8x768xf32>
    tpu.vector_store %arg14[%c40_115, %c0_116], %129 {strides = array<i32>} : memref<144x768xf32, #tpu.memory_space<vmem>>, vector<8x768xf32>,
    %c0_117 = arith.constant 0 : index
    %c145_118 = arith.constant 145 : index
    %131 = vector.load %arg13[%c0_117, %c145_118] : memref<16x1024xf32, #tpu.memory_space<vmem>>, vector<8x768xf32>
    %c48_119 = arith.constant 48 : index
    %c0_120 = arith.constant 0 : index
    %132 = vector.load %arg14[%c48_119, %c0_120] : memref<144x768xf32, #tpu.memory_space<vmem>>, vector<8x768xf32>
    tpu.vector_store %arg14[%c48_119, %c0_120], %131 {strides = array<i32>} : memref<144x768xf32, #tpu.memory_space<vmem>>, vector<8x768xf32>,
    %c0_121 = arith.constant 0 : index
    %c146_122 = arith.constant 146 : index
    %133 = vector.load %arg13[%c0_121, %c146_122] : memref<16x1024xf32, #tpu.memory_space<vmem>>, vector<8x768xf32>
    %c56_123 = arith.constant 56 : index
    %c0_124 = arith.constant 0 : index
    %134 = vector.load %arg14[%c56_123, %c0_124] : memref<144x768xf32, #tpu.memory_space<vmem>>, vector<8x768xf32>
    tpu.vector_store %arg14[%c56_123, %c0_124], %133 {strides = array<i32>} : memref<144x768xf32, #tpu.memory_space<vmem>>, vector<8x768xf32>,
    %c0_125 = arith.constant 0 : index
    %c147_126 = arith.constant 147 : index
    %135 = vector.load %arg13[%c0_125, %c147_126] : memref<16x1024xf32, #tpu.memory_space<vmem>>, vector<8x768xf32>
    %c64_127 = arith.constant 64 : index
    %c0_128 = arith.constant 0 : index
    %136 = vector.load %arg14[%c64_127, %c0_128] : memref<144x768xf32, #tpu.memory_space<vmem>>, vector<8x768xf32>
    tpu.vector_store %arg14[%c64_127, %c0_128], %135 {strides = array<i32>} : memref<144x768xf32, #tpu.memory_space<vmem>>, vector<8x768xf32>,
    %c0_129 = arith.constant 0 : index
    %c0_130 = arith.constant 0 : index
    %137 = vector.load %arg6[%c0_129, %c0_130] : memref<8x72xf32, #tpu.memory_space<vmem>>, vector<8x72xf32>
    %c0_131 = arith.constant 0 : index
    %c0_132 = arith.constant 0 : index
    %138 = vector.load %arg14[%c0_131, %c0_132] : memref<144x768xf32, #tpu.memory_space<vmem>>, vector<72x768xf32>
    %cst_133 = arith.constant dense<0.000000e+00> : vector<8x768xf32>
    %139 = tpu.matmul %137, %138, %cst_133 {dimension_numbers = #tpu.dot_dimension_numbers<[1], [0], [0], [1], [0, 0, 1, 1], [], []>} : vector<8x72xf32>, vector<72x768xf32>, vector<8x768xf32> -> vector<8x768xf32>
    %c0_134 = arith.constant 0 : index
    %c0_135 = arith.constant 0 : index
    %140 = vector.load %arg7[%c0_134, %c0_135] : memref<8x3xf32, #tpu.memory_space<vmem>>, vector<8x3xf32>
    %141 = vector.broadcast %0 : vector<1x768xf32> to vector<8x768xf32>
    %142 = arith.mulf %139, %141 : vector<8x768xf32>
    %cst_136 = arith.constant dense<0.000000e+00> : vector<8xf32>
    %143 = vector.multi_reduction <add>, %142, %cst_136 [1] : vector<8x768xf32> to vector<8xf32>
    %144 = vector.shape_cast %143 : vector<8xf32> to vector<8x1xf32>
    %145 = arith.mulf %142, %142 : vector<8x768xf32>
    %cst_137 = arith.constant dense<0.000000e+00> : vector<8xf32>
    %146 = vector.multi_reduction <add>, %145, %cst_137 [1] : vector<8x768xf32> to vector<8xf32>
    %147 = vector.shape_cast %146 : vector<8xf32> to vector<8x1xf32>
    %cst_138 = arith.constant 0.001953125 : f32
    %148 = vector.broadcast %cst_138 : f32 to vector<8x1xf32>
    %149 = arith.mulf %144, %148 : vector<8x1xf32>
    %cst_139 = arith.constant 0.001953125 : f32
    %150 = vector.broadcast %cst_139 : f32 to vector<8x1xf32>
    %151 = arith.mulf %147, %150 : vector<8x1xf32>
    %152 = arith.mulf %149, %149 : vector<8x1xf32>
    %153 = arith.subf %151, %152 : vector<8x1xf32>
    %cst_140 = arith.constant 0.000000e+00 : f32
    %154 = vector.broadcast %cst_140 : f32 to vector<8x1xf32>
    %155 = arith.maximumf %153, %154 : vector<8x1xf32>
    %cst_141 = arith.constant 9.99999974E-6 : f32
    %156 = vector.broadcast %cst_141 : f32 to vector<8x1xf32>
    %157 = arith.addf %155, %156 : vector<8x1xf32>
    %158 = math.rsqrt %157 : vector<8x1xf32>
    %159 = vector.extract_strided_slice %140 {offsets = [0, 1], sizes = [8, 1], strides = [1, 1]} : vector<8x3xf32> to vector<8x1xf32>
    %160 = arith.mulf %158, %159 : vector<8x1xf32>
    %161 = vector.broadcast %149 : vector<8x1xf32> to vector<8x768xf32>
    %162 = arith.subf %139, %161 : vector<8x768xf32>
    %163 = vector.broadcast %160 : vector<8x1xf32> to vector<8x768xf32>
    %164 = arith.mulf %162, %163 : vector<8x768xf32>
    %165 = vector.extract_strided_slice %140 {offsets = [0, 2], sizes = [8, 1], strides = [1, 1]} : vector<8x3xf32> to vector<8x1xf32>
    %166 = vector.broadcast %165 : vector<8x1xf32> to vector<8x768xf32>
    %167 = arith.addf %164, %166 : vector<8x768xf32>
    %cst_142 = arith.constant 0.000000e+00 : f32
    %168 = vector.broadcast %cst_142 : f32 to vector<8x768xf32>
    %169 = arith.cmpf oge, %167, %168 : vector<8x768xf32>
    %cst_143 = arith.constant 2.000000e-01 : f32
    %170 = vector.broadcast %cst_143 : f32 to vector<8x768xf32>
    %171 = arith.mulf %170, %167 : vector<8x768xf32>
    %172 = arith.select %169, %167, %171 : vector<8x768xi1>, vector<8x768xf32>
    %173 = vector.broadcast %0 : vector<1x768xf32> to vector<8x768xf32>
    %174 = arith.mulf %172, %173 : vector<8x768xf32>
    %c0_144 = arith.constant 0 : index
    %c128_145 = arith.constant 128 : index
    %175 = vector.load %arg13[%c0_144, %c128_145] : memref<16x1024xf32, #tpu.memory_space<vmem>>, vector<8x768xf32>
    tpu.vector_store %arg13[%c0_144, %c128_145], %174 {strides = array<i32>} : memref<16x1024xf32, #tpu.memory_space<vmem>>, vector<8x768xf32>,
    %c0_146 = arith.constant 0 : index
    %c109_147 = arith.constant 109 : index
    %176 = vector.load %arg13[%c0_146, %c109_147] : memref<16x1024xf32, #tpu.memory_space<vmem>>, vector<8x768xf32>
    %c0_148 = arith.constant 0 : index
    %c0_149 = arith.constant 0 : index
    %177 = vector.load %arg14[%c0_148, %c0_149] : memref<144x768xf32, #tpu.memory_space<vmem>>, vector<8x768xf32>
    tpu.vector_store %arg14[%c0_148, %c0_149], %176 {strides = array<i32>} : memref<144x768xf32, #tpu.memory_space<vmem>>, vector<8x768xf32>,
    %c0_150 = arith.constant 0 : index
    %c110_151 = arith.constant 110 : index
    %178 = vector.load %arg13[%c0_150, %c110_151] : memref<16x1024xf32, #tpu.memory_space<vmem>>, vector<8x768xf32>
    %c8_152 = arith.constant 8 : index
    %c0_153 = arith.constant 0 : index
    %179 = vector.load %arg14[%c8_152, %c0_153] : memref<144x768xf32, #tpu.memory_space<vmem>>, vector<8x768xf32>
    tpu.vector_store %arg14[%c8_152, %c0_153], %178 {strides = array<i32>} : memref<144x768xf32, #tpu.memory_space<vmem>>, vector<8x768xf32>,
    %c0_154 = arith.constant 0 : index
    %c111_155 = arith.constant 111 : index
    %180 = vector.load %arg13[%c0_154, %c111_155] : memref<16x1024xf32, #tpu.memory_space<vmem>>, vector<8x768xf32>
    %c16_156 = arith.constant 16 : index
    %c0_157 = arith.constant 0 : index
    %181 = vector.load %arg14[%c16_156, %c0_157] : memref<144x768xf32, #tpu.memory_space<vmem>>, vector<8x768xf32>
    tpu.vector_store %arg14[%c16_156, %c0_157], %180 {strides = array<i32>} : memref<144x768xf32, #tpu.memory_space<vmem>>, vector<8x768xf32>,
    %c0_158 = arith.constant 0 : index
    %c127_159 = arith.constant 127 : index
    %182 = vector.load %arg13[%c0_158, %c127_159] : memref<16x1024xf32, #tpu.memory_space<vmem>>, vector<8x768xf32>
    %c24_160 = arith.constant 24 : index
    %c0_161 = arith.constant 0 : index
    %183 = vector.load %arg14[%c24_160, %c0_161] : memref<144x768xf32, #tpu.memory_space<vmem>>, vector<8x768xf32>
    tpu.vector_store %arg14[%c24_160, %c0_161], %182 {strides = array<i32>} : memref<144x768xf32, #tpu.memory_space<vmem>>, vector<8x768xf32>,
    %c0_162 = arith.constant 0 : index
    %c128_163 = arith.constant 128 : index
    %184 = vector.load %arg13[%c0_162, %c128_163] : memref<16x1024xf32, #tpu.memory_space<vmem>>, vector<8x768xf32>
    %c32_164 = arith.constant 32 : index
    %c0_165 = arith.constant 0 : index
    %185 = vector.load %arg14[%c32_164, %c0_165] : memref<144x768xf32, #tpu.memory_space<vmem>>, vector<8x768xf32>
    tpu.vector_store %arg14[%c32_164, %c0_165], %184 {strides = array<i32>} : memref<144x768xf32, #tpu.memory_space<vmem>>, vector<8x768xf32>,
    %c0_166 = arith.constant 0 : index
    %c129_167 = arith.constant 129 : index
    %186 = vector.load %arg13[%c0_166, %c129_167] : memref<16x1024xf32, #tpu.memory_space<vmem>>, vector<8x768xf32>
    %c40_168 = arith.constant 40 : index
    %c0_169 = arith.constant 0 : index
    %187 = vector.load %arg14[%c40_168, %c0_169] : memref<144x768xf32, #tpu.memory_space<vmem>>, vector<8x768xf32>
    tpu.vector_store %arg14[%c40_168, %c0_169], %186 {strides = array<i32>} : memref<144x768xf32, #tpu.memory_space<vmem>>, vector<8x768xf32>,
    %c0_170 = arith.constant 0 : index
    %c145_171 = arith.constant 145 : index
    %188 = vector.load %arg13[%c0_170, %c145_171] : memref<16x1024xf32, #tpu.memory_space<vmem>>, vector<8x768xf32>
    %c48_172 = arith.constant 48 : index
    %c0_173 = arith.constant 0 : index
    %189 = vector.load %arg14[%c48_172, %c0_173] : memref<144x768xf32, #tpu.memory_space<vmem>>, vector<8x768xf32>
    tpu.vector_store %arg14[%c48_172, %c0_173], %188 {strides = array<i32>} : memref<144x768xf32, #tpu.memory_space<vmem>>, vector<8x768xf32>,
    %c0_174 = arith.constant 0 : index
    %c146_175 = arith.constant 146 : index
    %190 = vector.load %arg13[%c0_174, %c146_175] : memref<16x1024xf32, #tpu.memory_space<vmem>>, vector<8x768xf32>
    %c56_176 = arith.constant 56 : index
    %c0_177 = arith.constant 0 : index
    %191 = vector.load %arg14[%c56_176, %c0_177] : memref<144x768xf32, #tpu.memory_space<vmem>>, vector<8x768xf32>
    tpu.vector_store %arg14[%c56_176, %c0_177], %190 {strides = array<i32>} : memref<144x768xf32, #tpu.memory_space<vmem>>, vector<8x768xf32>,
    %c0_178 = arith.constant 0 : index
    %c147_179 = arith.constant 147 : index
    %192 = vector.load %arg13[%c0_178, %c147_179] : memref<16x1024xf32, #tpu.memory_space<vmem>>, vector<8x768xf32>
    %c64_180 = arith.constant 64 : index
    %c0_181 = arith.constant 0 : index
    %193 = vector.load %arg14[%c64_180, %c0_181] : memref<144x768xf32, #tpu.memory_space<vmem>>, vector<8x768xf32>
    tpu.vector_store %arg14[%c64_180, %c0_181], %192 {strides = array<i32>} : memref<144x768xf32, #tpu.memory_space<vmem>>, vector<8x768xf32>,
    %c0_182 = arith.constant 0 : index
    %c0_183 = arith.constant 0 : index
    %194 = vector.load %arg8[%c0_182, %c0_183] : memref<8x72xf32, #tpu.memory_space<vmem>>, vector<8x72xf32>
    %c0_184 = arith.constant 0 : index
    %c0_185 = arith.constant 0 : index
    %195 = vector.load %arg14[%c0_184, %c0_185] : memref<144x768xf32, #tpu.memory_space<vmem>>, vector<72x768xf32>
    %cst_186 = arith.constant dense<0.000000e+00> : vector<8x768xf32>
    %196 = tpu.matmul %194, %195, %cst_186 {dimension_numbers = #tpu.dot_dimension_numbers<[1], [0], [0], [1], [0, 0, 1, 1], [], []>} : vector<8x72xf32>, vector<72x768xf32>, vector<8x768xf32> -> vector<8x768xf32>
    %c0_187 = arith.constant 0 : index
    %c0_188 = arith.constant 0 : index
    %197 = vector.load %arg9[%c0_187, %c0_188] : memref<8x3xf32, #tpu.memory_space<vmem>>, vector<8x3xf32>
    %198 = vector.broadcast %0 : vector<1x768xf32> to vector<8x768xf32>
    %199 = arith.mulf %196, %198 : vector<8x768xf32>
    %cst_189 = arith.constant dense<0.000000e+00> : vector<8xf32>
    %200 = vector.multi_reduction <add>, %199, %cst_189 [1] : vector<8x768xf32> to vector<8xf32>
    %201 = vector.shape_cast %200 : vector<8xf32> to vector<8x1xf32>
    %202 = arith.mulf %199, %199 : vector<8x768xf32>
    %cst_190 = arith.constant dense<0.000000e+00> : vector<8xf32>
    %203 = vector.multi_reduction <add>, %202, %cst_190 [1] : vector<8x768xf32> to vector<8xf32>
    %204 = vector.shape_cast %203 : vector<8xf32> to vector<8x1xf32>
    %cst_191 = arith.constant 0.001953125 : f32
    %205 = vector.broadcast %cst_191 : f32 to vector<8x1xf32>
    %206 = arith.mulf %201, %205 : vector<8x1xf32>
    %cst_192 = arith.constant 0.001953125 : f32
    %207 = vector.broadcast %cst_192 : f32 to vector<8x1xf32>
    %208 = arith.mulf %204, %207 : vector<8x1xf32>
    %209 = arith.mulf %206, %206 : vector<8x1xf32>
    %210 = arith.subf %208, %209 : vector<8x1xf32>
    %cst_193 = arith.constant 0.000000e+00 : f32
    %211 = vector.broadcast %cst_193 : f32 to vector<8x1xf32>
    %212 = arith.maximumf %210, %211 : vector<8x1xf32>
    %cst_194 = arith.constant 9.99999974E-6 : f32
    %213 = vector.broadcast %cst_194 : f32 to vector<8x1xf32>
    %214 = arith.addf %212, %213 : vector<8x1xf32>
    %215 = math.rsqrt %214 : vector<8x1xf32>
    %216 = vector.extract_strided_slice %197 {offsets = [0, 1], sizes = [8, 1], strides = [1, 1]} : vector<8x3xf32> to vector<8x1xf32>
    %217 = arith.mulf %215, %216 : vector<8x1xf32>
    %218 = vector.broadcast %206 : vector<8x1xf32> to vector<8x768xf32>
    %219 = arith.subf %196, %218 : vector<8x768xf32>
    %220 = vector.broadcast %217 : vector<8x1xf32> to vector<8x768xf32>
    %221 = arith.mulf %219, %220 : vector<8x768xf32>
    %222 = vector.extract_strided_slice %197 {offsets = [0, 2], sizes = [8, 1], strides = [1, 1]} : vector<8x3xf32> to vector<8x1xf32>
    %223 = vector.broadcast %222 : vector<8x1xf32> to vector<8x768xf32>
    %224 = arith.addf %221, %223 : vector<8x768xf32>
    %cst_195 = arith.constant 0.000000e+00 : f32
    %225 = vector.broadcast %cst_195 : f32 to vector<8x768xf32>
    %226 = arith.cmpf oge, %224, %225 : vector<8x768xf32>
    %cst_196 = arith.constant 2.000000e-01 : f32
    %227 = vector.broadcast %cst_196 : f32 to vector<8x768xf32>
    %228 = arith.mulf %227, %224 : vector<8x768xf32>
    %229 = arith.select %226, %224, %228 : vector<8x768xi1>, vector<8x768xf32>
    %230 = vector.broadcast %0 : vector<1x768xf32> to vector<8x768xf32>
    %231 = arith.mulf %229, %230 : vector<8x768xf32>
    %c0_197 = arith.constant 0 : index
    %c128_198 = arith.constant 128 : index
    %232 = vector.load %arg13[%c0_197, %c128_198] : memref<16x1024xf32, #tpu.memory_space<vmem>>, vector<8x768xf32>
    tpu.vector_store %arg13[%c0_197, %c128_198], %231 {strides = array<i32>} : memref<16x1024xf32, #tpu.memory_space<vmem>>, vector<8x768xf32>,
    %c0_199 = arith.constant 0 : index
    %c109_200 = arith.constant 109 : index
    %233 = vector.load %arg13[%c0_199, %c109_200] : memref<16x1024xf32, #tpu.memory_space<vmem>>, vector<8x768xf32>
    %c0_201 = arith.constant 0 : index
    %c0_202 = arith.constant 0 : index
    %234 = vector.load %arg14[%c0_201, %c0_202] : memref<144x768xf32, #tpu.memory_space<vmem>>, vector<8x768xf32>
    tpu.vector_store %arg14[%c0_201, %c0_202], %233 {strides = array<i32>} : memref<144x768xf32, #tpu.memory_space<vmem>>, vector<8x768xf32>,
    %c0_203 = arith.constant 0 : index
    %c110_204 = arith.constant 110 : index
    %235 = vector.load %arg13[%c0_203, %c110_204] : memref<16x1024xf32, #tpu.memory_space<vmem>>, vector<8x768xf32>
    %c8_205 = arith.constant 8 : index
    %c0_206 = arith.constant 0 : index
    %236 = vector.load %arg14[%c8_205, %c0_206] : memref<144x768xf32, #tpu.memory_space<vmem>>, vector<8x768xf32>
    tpu.vector_store %arg14[%c8_205, %c0_206], %235 {strides = array<i32>} : memref<144x768xf32, #tpu.memory_space<vmem>>, vector<8x768xf32>,
    %c0_207 = arith.constant 0 : index
    %c111_208 = arith.constant 111 : index
    %237 = vector.load %arg13[%c0_207, %c111_208] : memref<16x1024xf32, #tpu.memory_space<vmem>>, vector<8x768xf32>
    %c16_209 = arith.constant 16 : index
    %c0_210 = arith.constant 0 : index
    %238 = vector.load %arg14[%c16_209, %c0_210] : memref<144x768xf32, #tpu.memory_space<vmem>>, vector<8x768xf32>
    tpu.vector_store %arg14[%c16_209, %c0_210], %237 {strides = array<i32>} : memref<144x768xf32, #tpu.memory_space<vmem>>, vector<8x768xf32>,
    %c0_211 = arith.constant 0 : index
    %c127_212 = arith.constant 127 : index
    %239 = vector.load %arg13[%c0_211, %c127_212] : memref<16x1024xf32, #tpu.memory_space<vmem>>, vector<8x768xf32>
    %c24_213 = arith.constant 24 : index
    %c0_214 = arith.constant 0 : index
    %240 = vector.load %arg14[%c24_213, %c0_214] : memref<144x768xf32, #tpu.memory_space<vmem>>, vector<8x768xf32>
    tpu.vector_store %arg14[%c24_213, %c0_214], %239 {strides = array<i32>} : memref<144x768xf32, #tpu.memory_space<vmem>>, vector<8x768xf32>,
    %c0_215 = arith.constant 0 : index
    %c128_216 = arith.constant 128 : index
    %241 = vector.load %arg13[%c0_215, %c128_216] : memref<16x1024xf32, #tpu.memory_space<vmem>>, vector<8x768xf32>
    %c32_217 = arith.constant 32 : index
    %c0_218 = arith.constant 0 : index
    %242 = vector.load %arg14[%c32_217, %c0_218] : memref<144x768xf32, #tpu.memory_space<vmem>>, vector<8x768xf32>
    tpu.vector_store %arg14[%c32_217, %c0_218], %241 {strides = array<i32>} : memref<144x768xf32, #tpu.memory_space<vmem>>, vector<8x768xf32>,
    %c0_219 = arith.constant 0 : index
    %c129_220 = arith.constant 129 : index
    %243 = vector.load %arg13[%c0_219, %c129_220] : memref<16x1024xf32, #tpu.memory_space<vmem>>, vector<8x768xf32>
    %c40_221 = arith.constant 40 : index
    %c0_222 = arith.constant 0 : index
    %244 = vector.load %arg14[%c40_221, %c0_222] : memref<144x768xf32, #tpu.memory_space<vmem>>, vector<8x768xf32>
    tpu.vector_store %arg14[%c40_221, %c0_222], %243 {strides = array<i32>} : memref<144x768xf32, #tpu.memory_space<vmem>>, vector<8x768xf32>,
    %c0_223 = arith.constant 0 : index
    %c145_224 = arith.constant 145 : index
    %245 = vector.load %arg13[%c0_223, %c145_224] : memref<16x1024xf32, #tpu.memory_space<vmem>>, vector<8x768xf32>
    %c48_225 = arith.constant 48 : index
    %c0_226 = arith.constant 0 : index
    %246 = vector.load %arg14[%c48_225, %c0_226] : memref<144x768xf32, #tpu.memory_space<vmem>>, vector<8x768xf32>
    tpu.vector_store %arg14[%c48_225, %c0_226], %245 {strides = array<i32>} : memref<144x768xf32, #tpu.memory_space<vmem>>, vector<8x768xf32>,
    %c0_227 = arith.constant 0 : index
    %c146_228 = arith.constant 146 : index
    %247 = vector.load %arg13[%c0_227, %c146_228] : memref<16x1024xf32, #tpu.memory_space<vmem>>, vector<8x768xf32>
    %c56_229 = arith.constant 56 : index
    %c0_230 = arith.constant 0 : index
    %248 = vector.load %arg14[%c56_229, %c0_230] : memref<144x768xf32, #tpu.memory_space<vmem>>, vector<8x768xf32>
    tpu.vector_store %arg14[%c56_229, %c0_230], %247 {strides = array<i32>} : memref<144x768xf32, #tpu.memory_space<vmem>>, vector<8x768xf32>,
    %c0_231 = arith.constant 0 : index
    %c147_232 = arith.constant 147 : index
    %249 = vector.load %arg13[%c0_231, %c147_232] : memref<16x1024xf32, #tpu.memory_space<vmem>>, vector<8x768xf32>
    %c64_233 = arith.constant 64 : index
    %c0_234 = arith.constant 0 : index
    %250 = vector.load %arg14[%c64_233, %c0_234] : memref<144x768xf32, #tpu.memory_space<vmem>>, vector<8x768xf32>
    tpu.vector_store %arg14[%c64_233, %c0_234], %249 {strides = array<i32>} : memref<144x768xf32, #tpu.memory_space<vmem>>, vector<8x768xf32>,
    %c0_235 = arith.constant 0 : index
    %c0_236 = arith.constant 0 : index
    %251 = vector.load %arg10[%c0_235, %c0_236] : memref<8x72xf32, #tpu.memory_space<vmem>>, vector<8x72xf32>
    %c0_237 = arith.constant 0 : index
    %c0_238 = arith.constant 0 : index
    %252 = vector.load %arg14[%c0_237, %c0_238] : memref<144x768xf32, #tpu.memory_space<vmem>>, vector<72x768xf32>
    %cst_239 = arith.constant dense<0.000000e+00> : vector<8x768xf32>
    %253 = tpu.matmul %251, %252, %cst_239 {dimension_numbers = #tpu.dot_dimension_numbers<[1], [0], [0], [1], [0, 0, 1, 1], [], []>} : vector<8x72xf32>, vector<72x768xf32>, vector<8x768xf32> -> vector<8x768xf32>
    %c0_240 = arith.constant 0 : index
    %c0_241 = arith.constant 0 : index
    %254 = vector.load %arg11[%c0_240, %c0_241] : memref<8x3xf32, #tpu.memory_space<vmem>>, vector<8x3xf32>
    %255 = vector.extract_strided_slice %254 {offsets = [0, 0], sizes = [8, 1], strides = [1, 1]} : vector<8x3xf32> to vector<8x1xf32>
    %256 = vector.broadcast %255 : vector<8x1xf32> to vector<8x768xf32>
    %257 = arith.addf %253, %256 : vector<8x768xf32>
    %258 = vector.extract_strided_slice %257 {offsets = [0, 0], sizes = [3, 768], strides = [1, 1]} : vector<8x768xf32> to vector<3x768xf32>
    %259 = math.tanh %258 : vector<3x768xf32>
    %c0_242 = arith.constant 0 : index
    %c0_243 = arith.constant 0 : index
    %260 = vector.load %arg12[%c0_242, %c0_243] : memref<3x768xf32, #tpu.memory_space<vmem>>, vector<3x768xf32>
    tpu.vector_store %arg12[%c0_242, %c0_243], %259 {strides = array<i32>} : memref<3x768xf32, #tpu.memory_space<vmem>>, vector<3x768xf32>,
    return
  }
}

</mosaic_0001>

<bundles_post_ra>
// kernel: tpu_custom_call.1
= control target key start
LH: loop header
LB: loop body
LE: loop exit
PB: predicated region body
PF: predicated region fallthrough
CT: control target
= control target key end

     0   :  { %17 = vsyncpa [#allocation5], 0  ;;  %s7197_s0 = inlined_call_operand.vmem [shape: f32[3,768], index: 0, kind: input, shape index: {}]   ;;  %s7198_s1 = inlined_call_operand.hbm [shape: f32[1,768], index: 1, kind: input, shape index: {}]   ;;  %s7199_s2 = inlined_call_operand.vmem [shape: f32[16,72], index: 2, kind: input, shape index: {}]   ;;  %s7200_s3 = inlined_call_operand.vmem [shape: f32[16,3], index: 3, kind: input, shape index: {}]   ;;  %s7201_s4 = inlined_call_operand.vmem [shape: f32[8,144], index: 4, kind: input, shape index: {}]   ;;  %s7202_s5 = inlined_call_operand.vmem [shape: f32[8,3], index: 5, kind: input, shape index: {}]   ;;  %s7203_s6 = inlined_call_operand.vmem [shape: f32[8,72], index: 6, kind: input, shape index: {}]   ;;  %s7204_s7 = inlined_call_operand.vmem [shape: f32[8,3], index: 7, kind: input, shape index: {}]   ;;  %s7205_s8 = inlined_call_operand.vmem [shape: f32[8,72], index: 8, kind: input, shape index: {}]   ;;  %s7206_s9 = inlined_call_operand.vmem [shape: f32[8,3], index: 9, kind: input, shape index: {}]   ;;  %s7207_s10 = inlined_call_operand.vmem [shape: f32[8,72], index: 10, kind: input, shape index: {}]   ;;  %s7208_s11 = inlined_call_operand.vmem [shape: f32[8,3], index: 11, kind: input, shape index: {}]   ;;  %s7209_s12 = inlined_call_operand.hbm [shape: f32[3,768], index: 12, kind: output, shape index: {}]  }
   0x1   :  { %18 = vsyncpa [#allocation6], 0  ;;  %s5462_s21 = smov [#allocation4]   ;;  %s5414_s25 = scalar_lea.hbm %s7198_s1, 96 }
   0x2   :  { %s27_s22 = sshll.u32 %s5462_s21, 4  ;;  %p5415_p0 = scmp.ne.s32.totalorder %s7198_s1, %s5414_s25  ;;  %s28_s22 = int_to_ptr.vmem [resolvable:$true] %s27_s22 }
   0x3   :  { %p5418_p1 = scmp.lt.u32.totalorder %s5414_s25, %s7198_s1 }
   0x5   :  { %p5420_p2 = pnand %p5418_p1, %p5415_p0 }
   0x7   :  { %5423 = shalt.err (!%p5420_p2)
}
   0x8   :  { %s5424_s30 = scalar_lea.vmem %s28_s22, 96  ;;  %p5429_p4 = scmp.lt.s32.totalorder %s28_s22, %s28_s22 }
   0x9   :  { %p5425_p3 = scmp.ne.s32.totalorder %s28_s22, %s5424_s30  ;;  %p5430_p5 = scmp.lt.s32.totalorder %s5424_s30, %s5424_s30 }
   0xb   :  { %p5431_p6 = por %p5430_p5, %p5429_p4 }
   0xd   :  { %p5432_p7 = pnand %p5431_p6, %p5425_p3 }
   0xf   :  { %5435 = shalt.err (!%p5432_p7)
}
  0x10   :  { %30 = dma.hbm_to_vmem [thread:$0]  %s7198_s1, 96, %s28_s22, [#allocation5]  }
  0x11   :  { %5458 = dma.done.wait [#allocation5], 96  }
  0x12   :  { %5459 = vsyncadd [#allocation5], 4294967200  ;;  %v5463_v0 = vmov 0.0   ;;  %v72_v1 = vld [vmem:[%s7197_s0 + $0x8] sm:$0x77]  ;;  %s5464_s20 = smov 17  }
  0x13   :  { %55 = vst [vmem:[#allocation2] sm:$0xff] %v5463_v0  ;;  %58 = vst [vmem:[#allocation2 + $0x18] sm:$0xff] %v5463_v0  ;;  %604 = vmatprep.mubr.f32.mxu0 %v5463_v0  ;;  %681 = vmatprep.mubr.f32.mxu1 %v5463_v0  ;;  %v71_v2 = vld [vmem:[%s7197_s0] sm:$0x77]  ;;  %v73_v3 = vld [vmem:[%s7197_s0 + $0x10] sm:$0x77]  ;;  %v78_v4 = vcombine.high %v72_v1, %v72_v1 }
  0x14   :  { %56 = vst [vmem:[#allocation2 + $0x8] sm:$0xff] %v5463_v0  ;;  %57 = vst [vmem:[#allocation2 + $0x10] sm:$0xff] %v5463_v0  ;;  %v77_v5 = vcombine.high %v71_v2, %v71_v2  ;;  %v79_v6 = vcombine.high %v73_v3, %v73_v3  ;;  %s5465_s0 = smov 19   ;;  %s5466_s21 = smov 18   ;;  %vm117_vm0 = vcmask 154624   ;;  %vm164_vm1 = vcmask 146432  }
  0x15   :  { %59 = vst [vmem:[#allocation2 + $0x20] sm:$0xff] %v5463_v0  ;;  %60 = vst [vmem:[#allocation2 + $0x28] sm:$0xff] %v5463_v0  ;;  %s5467_s22 = smov 1   ;;  %s5468_s23 = smov 127   ;;  %vm211_vm2 = vcmask 138240   ;;  %vm258_vm3 = vcmask 7168  }
  0x16   :  { %61 = vst [vmem:[#allocation2 + $0x30] sm:$0xff] %v5463_v0  ;;  %85 = vst [vmem:[#allocation2 + $0x18] sm:$0x7] %v72_v1  ;;  %s5469_s24 = smov 111   ;;  %s5470_s25 = smov 110   ;;  %vm317_vm4 = vcmask 1039360  }
  0x17   :  { %83 = vst [vmem:[#allocation2 + $0x8] sm:$0x7] %v71_v2  ;;  %87 = vst [vmem:[#allocation2 + $0x28] sm:$0x7] %v73_v3  ;;  %s5471_s26 = smov 109   ;;  %vm364_vm5 = vcmask 908288  }
  0x18   :  { %86 = vst [vmem:[#allocation2 + $0x20] sm:$0x7] %v78_v4  ;;  %84 = vst [vmem:[#allocation2 + $0x10] sm:$0x7] %v77_v5  ;;  %vm411_vm6 = vcmask 900096   ;;  %vm458_vm7 = vcmask 891904  }
  0x19   :  { %88 = vst [vmem:[#allocation2 + $0x30] sm:$0x7] %v79_v6  ;;  %vm533_vm8 = vcmask 588800  }
  0x1d   :  { %v5571_v7 = vld [vmem:[#allocation2 + $0x18] sm:$0xff] }
  0x1e   :  { %v5573_v8 = vld [vmem:[#allocation2 + $0x8] sm:$0xff]  ;;  %v4691_v9 = vpack.i.bf16 %v5571_v7, %v5463_v0 }
  0x1f   :  { %v5577_v10 = vld [vmem:[#allocation2 + $0x10] sm:$0xff]  ;;  %v5587_v12 = vld [vmem:[#allocation2 + $0x20] sm:$0xff]  ;;  %v5599_v15 = vld [vmem:[#allocation2 + $0x28] sm:$0xff] }
  0x20   :  { %4692 = vrot.lane.b32.xlu0 %v4691_v9, %s5464_s20  ;;  %4682 = vrot.lane.b32.xlu1 %v4691_v9, %s5465_s0  ;;  %v4701_v11 = vpack.i.bf16 %v5577_v10, %v5573_v8  ;;  %v4721_v13 = vpack.i.bf16 %v5571_v7, %v5577_v10  ;;  %v4726_v14 = vpack.i.bf16 %v5587_v12, %v5573_v8  ;;  %v5608_v17 = vld [vmem:[#allocation2 + $0x30] sm:$0xff] }
  0x21   :  { %v4746_v16 = vpack.i.bf16 %v5599_v15, %v5587_v12  ;;  %v4766_v18 = vpack.i.bf16 %v5608_v17, %v5599_v15  ;;  %v4781_v19 = vpack.i.bf16 %v5463_v0, %v5608_v17 }
  0x24   :  { %4702 = vrot.lane.b32.xlu0 %v4701_v11, %s5465_s0  ;;  %4687 = vrot.lane.b32.xlu1 %v4691_v9, %s5466_s21 }
  0x28   :  { %4707 = vrot.lane.b32.xlu0 %v4701_v11, %s5466_s21  ;;  %4697 = vrot.lane.b32.xlu1 %v4691_v9, %s5467_s22 }
  0x2c   :  { %4712 = vrot.lane.b32.xlu0 %v4701_v11, %s5464_s20  ;;  %4717 = vrot.lane.b32.xlu1 %v4701_v11, %s5467_s22 }
  0x30   :  { %4722 = vrot.lane.b32.xlu0 %v4721_v13, %s5468_s23  ;;  %4727 = vrot.lane.b32.xlu1 %v4726_v14, %s5468_s23 }
  0x34   :  { %4732 = vrot.lane.b32.xlu0 %v4721_v13, %s5469_s24  ;;  %4737 = vrot.lane.b32.xlu1 %v4721_v13, %s5470_s25 }
  0x38   :  { %4742 = vrot.lane.b32.xlu0 %v4726_v14, %s5469_s24  ;;  %397 = vrot.lane.b32.xlu1 %v5573_v8, %s5470_s25 }
  0x3c   :  { %4747 = vrot.lane.b32.xlu0 %v4746_v16, %s5465_s0  ;;  %4752 = vrot.lane.b32.xlu1 %v4746_v16, %s5466_s21 }
  0x40   :  { %115 = vrot.lane.b32.xlu0 %v5608_v17, %s5465_s0  ;;  %162 = vrot.lane.b32.xlu1 %v5608_v17, %s5466_s21 }
  0x44   :  { %4757 = vrot.lane.b32.xlu0 %v4746_v16, %s5464_s20  ;;  %4762 = vrot.lane.b32.xlu1 %v4746_v16, %s5467_s22 }
  0x48   :  { %446 = vrot.lane.b32.xlu0 %v5577_v10, %s5471_s26  ;;  %448 = vrot.lane.b32.xlu1 %v5571_v7, %s5471_s26 }
  0x4c   :  { %444 = vrot.lane.b32.xlu0 %v5573_v8, %s5471_s26  ;;  %209 = vrot.lane.b32.xlu1 %v5608_v17, %s5464_s20 }
  0x50   :  { %256 = vrot.lane.b32.xlu0 %v5608_v17, %s5467_s22  ;;  %4767 = vrot.lane.b32.xlu1 %v4766_v18, %s5468_s23 }
  0x54   :  { %315 = vrot.lane.b32.xlu0 %v5463_v0, %s5468_s23  ;;  %4772 = vrot.lane.b32.xlu1 %v4766_v18, %s5469_s24 }
  0x58   :  { %4777 = vrot.lane.b32.xlu0 %v4746_v16, %s5470_s25  ;;  %362 = vrot.lane.b32.xlu1 %v5463_v0, %s5469_s24 }
  0x5c   :  { %4782 = vrot.lane.b32.xlu0 %v4781_v19, %s5470_s25  ;;  %450 = vrot.lane.b32.xlu1 %v5587_v12, %s5471_s26 }
  0x60   :  { %452 = vrot.lane.b32.xlu0 %v5599_v15, %s5471_s26  ;;  %454 = vrot.lane.b32.xlu1 %v5608_v17, %s5471_s26 }
  0x64   :  { %456 = vrot.lane.b32.xlu0 %v5463_v0, %s5471_s26 }
  0x92   :  { %v5646_v20 = vpop.permute.xlu0 %4692  ;;  %v5648_v21 = vpop.permute.xlu1 %4682 }
  0x93   :  { %v4684_v26 = vunpack.i.l.bf16 %v5648_v21  ;;  %v4694_v37 = vunpack.i.l.bf16 %v5646_v20  ;;  %v4685_v16 = vunpack.i.h.bf16 %v5648_v21 }
  0x96   :  { %v5650_v22 = vpop.permute.xlu0 %4702  ;;  %v5652_v23 = vpop.permute.xlu1 %4687 }
  0x97   :  { %v4705_v24 = vunpack.i.h.bf16 %v5650_v22  ;;  %v4704_v25 = vunpack.i.l.bf16 %v5650_v22  ;;  %v4689_v27 = vunpack.i.l.bf16 %v5652_v23  ;;  %v4690_v13 = vunpack.i.h.bf16 %v5652_v23 }
  0x99   :  { %v119_v32 = vsel %vm117_vm0, %v4704_v25, %v4705_v24  ;;  %v118_v35 = vsel %vm117_vm0, %v4684_v26, %v4704_v25  ;;  %v120_v21 = vsel %vm117_vm0, %v4705_v24, %v4685_v16 }
  0x9a   :  { %v5658_v28 = vpop.permute.xlu0 %4707  ;;  %v5660_v29 = vpop.permute.xlu1 %4697 }
  0x9b   :  { %v4710_v30 = vunpack.i.h.bf16 %v5658_v28  ;;  %v4709_v31 = vunpack.i.l.bf16 %v5658_v28  ;;  %v4699_v33 = vunpack.i.l.bf16 %v5660_v29  ;;  %v4695_v28 = vunpack.i.h.bf16 %v5646_v20 }
  0x9d   :  { %v166_v34 = vsel %vm164_vm1, %v4709_v31, %v4710_v30  ;;  %v165_v36 = vsel %vm164_vm1, %v4689_v27, %v4709_v31  ;;  %v167_v31 = vsel %vm164_vm1, %v4710_v30, %v4690_v13 }
  0x9e   :  { %v5674_v38 = vpop.permute.xlu0 %4712  ;;  %v5676_v39 = vpop.permute.xlu1 %4717  ;;  %v4367_v40 = vpack.c.bf16 %v166_v34, %v119_v32  ;;  %v4369_v41 = vpack.c.bf16 %v165_v36, %v118_v35  ;;  %v4385_v36 = vpack.c.bf16 %v167_v31, %v120_v21 }
  0x9f   :  { %v4715_v42 = vunpack.i.h.bf16 %v5674_v38  ;;  %v4714_v43 = vunpack.i.l.bf16 %v5674_v38  ;;  %v4720_v44 = vunpack.i.h.bf16 %v5676_v39  ;;  %v4719_v45 = vunpack.i.l.bf16 %v5676_v39 }
  0xa0   :  { %4368 = vmatprep.subr.bf16.mxu0 %v4367_v40 }
  0xa1   :  { %4370 = vmatpush1.bf16.msra.mxu0 %v4369_v41  ;;  %v213_v46 = vsel %vm211_vm2, %v4714_v43, %v4715_v42  ;;  %v260_v47 = vsel %vm258_vm3, %v4719_v45, %v4720_v44  ;;  %v212_v48 = vsel %vm211_vm2, %v4694_v37, %v4714_v43  ;;  %v259_v49 = vsel %vm258_vm3, %v4699_v33, %v4719_v45 }
  0xa2   :  { %v5690_v50 = vpop.permute.xlu0 %4722  ;;  %v5692_v51 = vpop.permute.xlu1 %4727  ;;  %v4371_v52 = vpack.c.bf16 %v260_v47, %v213_v46  ;;  %v4373_v53 = vpack.c.bf16 %v259_v49, %v212_v48  ;;  %v4700_v37 = vunpack.i.h.bf16 %v5660_v29  ;;  %v214_v45 = vsel %vm211_vm2, %v4715_v42, %v4695_v28 }
  0xa3   :  { %v4725_v54 = vunpack.i.h.bf16 %v5690_v50  ;;  %v4724_v55 = vunpack.i.l.bf16 %v5690_v50  ;;  %v4729_v56 = vunpack.i.l.bf16 %v5692_v51 }
  0xa4   :  { %4372 = vmatprep.subr.bf16.mxu0 %v4371_v52  ;;  %v261_v22 = vsel %vm258_vm3, %v4720_v44, %v4700_v37 }
  0xa5   :  { %4374 = vmatpush1.bf16.msra.mxu0 %v4373_v53  ;;  %v319_v57 = vsel %vm317_vm4, %v4724_v55, %v4725_v54  ;;  %v318_v58 = vsel %vm317_vm4, %v4729_v56, %v4724_v55  ;;  %v4389_v38 = vpack.c.bf16 %v261_v22, %v214_v45 }
  0xa6   :  { %v5701_v59 = vpop.permute.xlu0 %4732  ;;  %v5703_v60 = vpop.permute.xlu1 %4737  ;;  %v4375_v61 = vpack.c.bf16 %v319_v57, %v5577_v10  ;;  %v4377_v62 = vpack.c.bf16 %v318_v58, %v5573_v8 }
  0xa7   :  { %v4735_v63 = vunpack.i.h.bf16 %v5701_v59  ;;  %v4734_v1 = vunpack.i.l.bf16 %v5701_v59  ;;  %v4740_v2 = vunpack.i.h.bf16 %v5703_v60  ;;  %v4739_v3 = vunpack.i.l.bf16 %v5703_v60 }
  0xa8   :  { %4376 = vmatprep.subr.bf16.mxu0 %v4375_v61  ;;  %v5753_v61 = vld [vmem:[%s7199_s2] sm:$0xff] }
  0xa9   :  { %4378 = vmatpush1.bf16.msra.mxu0 %v4377_v62  ;;  %v366_v4 = vsel %vm364_vm5, %v4734_v1, %v4735_v63  ;;  %v413_v5 = vsel %vm411_vm6, %v4739_v3, %v4740_v2 }
  0xaa   :  { %v5717_v6 = vpop.permute.xlu0 %4742  ;;  %v398_v8 = vpop.permute.xlu1 %397  ;;  %v4379_v9 = vpack.c.bf16 %v413_v5, %v366_v4 }
  0xab   :  { %v4744_v10 = vunpack.i.l.bf16 %v5717_v6  ;;  %v412_v11 = vsel %vm411_vm6, %v398_v8, %v4739_v3  ;;  %v4730_v3 = vunpack.i.h.bf16 %v5692_v51 }
  0xac   :  { %4380 = vmatprep.subr.bf16.mxu0 %v4379_v9 }
  0xad   :  { %v365_v14 = vsel %vm364_vm5, %v4744_v10, %v4734_v1 }
  0xae   :  { %v4381_v18 = vpack.c.bf16 %v412_v11, %v365_v14  ;;  %v4748_v19 = vpop.permute.xlu0 %4747  ;;  %v4753_v25 = vpop.permute.xlu1 %4752  ;;  %v5765_v11 = vld [vmem:[%s7199_s2 + $0x8] sm:$0xff] }
  0xaf   :  { %v4749_v26 = vunpack.i.l.bf16 %v4748_v19  ;;  %v4754_v27 = vunpack.i.l.bf16 %v4753_v25  ;;  %v4750_v24 = vunpack.i.h.bf16 %v4748_v19  ;;  %v4755_v46 = vunpack.i.h.bf16 %v4753_v25 }
  0xb0   :  { %4382 = vmatpush1.bf16.msra.mxu0 %v4381_v18  ;;  %v320_v19 = vsel %vm317_vm4, %v4725_v54, %v4730_v3 }
  0xb1   :  { %v121_v32 = vsel %vm117_vm0, %v4685_v16, %v4749_v26  ;;  %v168_v33 = vsel %vm164_vm1, %v4690_v13, %v4754_v27  ;;  %v122_v44 = vsel %vm117_vm0, %v4749_v26, %v4750_v24  ;;  %v169_v53 = vsel %vm164_vm1, %v4754_v27, %v4755_v46 }
  0xb2   :  { %v116_v23 = vpop.permute.xlu0 %115  ;;  %v163_v34 = vpop.permute.xlu1 %162  ;;  %v4383_v35 = vpack.c.bf16 %v168_v33, %v121_v32  ;;  %v4401_v4 = vpack.c.bf16 %v169_v53, %v122_v44  ;;  %v4393_v50 = vpack.c.bf16 %v320_v19, %v5571_v7 }
  0xb3   :  { %v123_v42 = vsel %vm117_vm0, %v4750_v24, %v116_v23  ;;  %v170_v39 = vsel %vm164_vm1, %v4755_v46, %v163_v34  ;;  %v4745_v34 = vunpack.i.h.bf16 %v5717_v6 }
  0xb4   :  { %4384 = vmatprep.subr.bf16.mxu1 %v4383_v35  ;;  %v4399_v62 = vpack.c.bf16 %v170_v39, %v123_v42 }
  0xb5   :  { %4386 = vmatpush1.bf16.msra.mxu1 %v4385_v36 }
  0xb6   :  { %v4758_v40 = vpop.permute.xlu0 %4757  ;;  %v4763_v30 = vpop.permute.xlu1 %4762 }
  0xb7   :  { %v4759_v41 = vunpack.i.l.bf16 %v4758_v40  ;;  %v4764_v43 = vunpack.i.l.bf16 %v4763_v30  ;;  %v4760_v55 = vunpack.i.h.bf16 %v4758_v40  ;;  %v4765_v56 = vunpack.i.h.bf16 %v4763_v30 }
  0xb8   :  { %v367_v40 = vsel %vm364_vm5, %v4735_v63, %v4745_v34 }
  0xb9   :  { %v215_v29 = vsel %vm211_vm2, %v4695_v28, %v4759_v41  ;;  %v262_v47 = vsel %vm258_vm3, %v4700_v37, %v4764_v43  ;;  %v216_v5 = vsel %vm211_vm2, %v4759_v41, %v4760_v55  ;;  %v263_v8 = vsel %vm258_vm3, %v4764_v43, %v4765_v56 }
  0xba   :  { %v447_v20 = vpop.permute.xlu0 %446  ;;  %v5742_v48 = vpop.permute.xlu1 %448  ;;  %v4387_v49 = vpack.c.bf16 %v262_v47, %v215_v29  ;;  %v4405_v26 = vpack.c.bf16 %v263_v8, %v216_v5 }
  0xbb   :  { %v460_v52 = vsel %vm458_vm7, %v447_v20, %v5742_v48 }
  0xbc   :  { %556 = vmatprep.subr.mxu0 %v460_v52  ;;  %4388 = vmatprep.subr.bf16.mxu1 %v4387_v49 }
  0xbd   :  { %4390 = vmatpush1.bf16.msra.mxu1 %v4389_v38 }
  0xbe   :  { %v445_v57 = vpop.permute.xlu0 %444  ;;  %v210_v58 = vpop.permute.xlu1 %209 }
  0xbf   :  { %v459_v1 = vsel %vm458_vm7, %v445_v57, %v447_v20  ;;  %v217_v51 = vsel %vm211_vm2, %v4760_v55, %v210_v58  ;;  %v54_v55 = vld [vmem:[#allocation4] sm:$0x3f] }
  0xc0   :  { %557 = vmatpush1.msra.mxu0 %v459_v1 }
  0xc1   :  { %4400 = vmatprep.subr.bf16.mxu0 %v4399_v62  ;;  %4349 = vmatmul.mubr.msk.f32.vlgmr.msra.gmra.mrb[0].mxu0 %vm533_vm8, %v5753_v61 }
  0xc2   :  { %v257_v9 = vpop.permute.xlu0 %256  ;;  %v4768_v10 = vpop.permute.xlu1 %4767  ;;  %4402 = vmatpush1.bf16.msra.mxu0 %v4401_v4  ;;  %610 = vmatprep.mubr.f32.mxu0 %v5463_v0 }
  0xc3   :  { %v264_v13 = vsel %vm258_vm3, %v4765_v56, %v257_v9  ;;  %v4770_v14 = vunpack.i.h.bf16 %v4768_v10  ;;  %v4769_v16 = vunpack.i.l.bf16 %v4768_v10 }
  0xc4   :  { %v4403_v18 = vpack.c.bf16 %v264_v13, %v217_v51 }
  0xc5   :  { %v322_v25 = vsel %vm317_vm4, %v4769_v16, %v4770_v14  ;;  %v321_v27 = vsel %vm317_vm4, %v4730_v3, %v4769_v16  ;;  %4350 = vmatmul.mubr.msk.f32.gmra.mrb[2].mxu0 %vm533_vm8, %v5765_v11 }
  0xc6   :  { %v316_v31 = vpop.permute.xlu0 %315  ;;  %v4773_v32 = vpop.permute.xlu1 %4772  ;;  %4404 = vmatprep.subr.bf16.mxu0 %v4403_v18  ;;  %v4391_v33 = vpack.c.bf16 %v321_v27, %v5587_v12  ;;  %758 = vmatprep.mubr.f32.mxu0 %v5463_v0  ;;  %v4409_v54 = vpack.c.bf16 %v322_v25, %v5599_v15 }
  0xc7   :  { %v323_v23 = vsel %vm317_vm4, %v4770_v14, %v316_v31  ;;  %4406 = vmatpush1.bf16.msra.mxu0 %v4405_v26  ;;  %v4774_v21 = vunpack.i.l.bf16 %v4773_v32  ;;  %v4775_v7 = vunpack.i.h.bf16 %v4773_v32 }
  0xc8   :  { %v4407_v35 = vpack.c.bf16 %v323_v23, %v5608_v17  ;;  %4392 = vmatprep.subr.bf16.mxu1 %v4391_v33 }
  0xc9   :  { %4394 = vmatpush1.bf16.msra.mxu1 %v4393_v50  ;;  %v368_v15 = vsel %vm364_vm5, %v4745_v34, %v4774_v21  ;;  %v369_v59 = vsel %vm364_vm5, %v4774_v21, %v4775_v7 }
  0xca   :  { %v4778_v36 = vpop.permute.xlu0 %4777  ;;  %v363_v37 = vpop.permute.xlu1 %362  ;;  %4408 = vmatprep.subr.bf16.mxu0 %v4407_v35 }
  0xcb   :  { %v4780_v12 = vunpack.i.h.bf16 %v4778_v36  ;;  %v4779_v28 = vunpack.i.l.bf16 %v4778_v36  ;;  %4410 = vmatpush1.bf16.msra.mxu0 %v4409_v54  ;;  %v370_v63 = vsel %vm364_vm5, %v4775_v7, %v363_v37 }
  0xcd   :  { %v415_v6 = vsel %vm411_vm6, %v4779_v28, %v4780_v12  ;;  %v414_v17 = vsel %vm411_vm6, %v4740_v2, %v4779_v28 }
  0xce   :  { %v4783_v30 = vpop.permute.xlu0 %4782  ;;  %v4395_v41 = vpack.c.bf16 %v415_v6, %v368_v15  ;;  %v4397_v43 = vpack.c.bf16 %v414_v17, %v367_v40  ;;  %v451_v24 = vpop.permute.xlu1 %450 }
  0xcf   :  { %v4785_v45 = vunpack.i.h.bf16 %v4783_v30  ;;  %v4784_v22 = vunpack.i.l.bf16 %v4783_v30  ;;  %v461_v49 = vsel %vm458_vm7, %v5742_v48, %v451_v24  ;;  %v774_v48 = vlaneseq }
  0xd0   :  { %4396 = vmatprep.subr.bf16.mxu1 %v4395_v41 }
  0xd1   :  { %v416_v46 = vsel %vm411_vm6, %v4780_v12, %v4784_v22  ;;  %4398 = vmatpush1.bf16.msra.mxu1 %v4397_v43  ;;  %v417_v29 = vsel %vm411_vm6, %v4784_v22, %v4785_v45  ;;  %v775_v44 = vshrl.u32 %v774_v48, 7 }
  0xd2   :  { %v453_v47 = vpop.permute.xlu0 %452  ;;  %v4411_v60 = vpack.c.bf16 %v417_v29, %v370_v63  ;;  %v4413_v20 = vpack.c.bf16 %v416_v46, %v369_v59  ;;  %v455_v52 = vpop.permute.xlu1 %454 }
  0xd3   :  { %v462_v2 = vsel %vm458_vm7, %v451_v24, %v453_v47  ;;  %v463_v39 = vsel %vm458_vm7, %v453_v47, %v455_v52  ;;  %v776_v53 = vsub.s32 0, %v775_v44  ;;  %v780_v56 = vsub.s32 1, %v775_v44 }
  0xd4   :  { %633 = vmatprep.subr.mxu1 %v462_v2  ;;  %4412 = vmatprep.subr.bf16.mxu0 %v4411_v60  ;;  %v784_v25 = vsub.s32 2, %v775_v44  ;;  %v788_v26 = vsub.s32 3, %v775_v44  ;;  %v792_v31 = vsub.s32 4, %v775_v44  ;;  %v796_v33 = vsub.s32 5, %v775_v44 }
  0xd5   :  { %634 = vmatpush1.msra.mxu1 %v461_v49  ;;  %4414 = vmatpush1.bf16.msra.mxu0 %v4413_v20  ;;  %v5810_v57 = vrot.slane %v54_v55, %v776_v53  ;;  %v5812_v58 = vrot.slane %v54_v55, %v780_v56 }
  0xd6   :  { %v457_v38 = vpop.permute.xlu0 %456  ;;  %4351 = vmatmul.mubr.msk.f32.vlgmr.msra.gmra.mrb[0].mxu1 %vm533_vm8, %v5753_v61  ;;  %v5830_v27 = vrot.slane %v54_v55, %v784_v25  ;;  %v5832_v32 = vrot.slane %v54_v55, %v788_v26  ;;  %v5840_v34 = vrot.slane %v54_v55, %v792_v31  ;;  %v5844_v21 = vrot.slane %v54_v55, %v796_v33 }
  0xd7   :  { %v464_v42 = vsel %vm458_vm7, %v455_v52, %v457_v38  ;;  %687 = vmatprep.mubr.f32.mxu1 %v5463_v0 }
  0xd8   :  { %710 = vmatprep.subr.mxu0 %v464_v42  ;;  %7227 = vst [vmem:[#allocation10_spill] sm:$0xff] %v5832_v32  ;;  %7228 = vst [vmem:[#allocation11_spill] sm:$0xff] %v5840_v34 }
  0xd9   :  { %711 = vmatpush1.msra.mxu0 %v463_v39  ;;  %7229 = vst [vmem:[#allocation12_spill] sm:$0xff] %v5844_v21 }
  0xda   :  { %4352 = vmatmul.mubr.msk.f32.gmra.mrb[2].mxu1 %vm533_vm8, %v5765_v11  ;;  %4353 = vmatmul.mubr.msk.f32.vlgmr.msra.gmra.mrb[4].mxu0 %vm533_vm8, %v5753_v61 }
  0xdb   :  { %764 = vmatprep.mubr.f32.mxu0 %v5463_v0 }
  0xde   :  { %4354 = vmatmul.mubr.msk.f32.gmra.mrb[6].mxu0 %vm533_vm8, %v5765_v11 }
 0x194   :  { %v5814_v62 = vpop.f32.mrb[0].mxu0 }
 0x195   :  { %v804_v1 = vmul.f32 %v5810_v57, %v5814_v62  ;;  %v5818_v61 = vpop.f32.mrb[1].mxu0 }
 0x196   :  { %v805_v3 = vmul.f32 %v5812_v58, %v5818_v61 }
 0x197   :  { %v830_v4 = vmul.f32 %v804_v1, %v804_v1 }
 0x198   :  { %v816_v5 = vadd.f32 %v805_v3, %v804_v1  ;;  %v831_v8 = vmul.f32 %v805_v3, %v805_v3  ;;  %v5822_v9 = vpop.f32.mrb[2].mxu0 }
 0x199   :  { %v810_v10 = vmul.f32 %v5810_v57, %v5822_v9  ;;  %v5826_v11 = vpop.f32.mrb[3].mxu0 }
 0x19a   :  { %v842_v51 = vadd.f32 %v831_v8, %v830_v4  ;;  %v811_v13 = vmul.f32 %v5812_v58, %v5826_v11  ;;  %v5472_v8 = vmov 2  }
 0x19b   :  { %v836_v14 = vmul.f32 %v810_v10, %v810_v10  ;;  %4787 = vset.pattern.permute.xlu1 %v5472_v8 }
 0x19c   :  { %v823_v16 = vadd.f32 %v811_v13, %v810_v10  ;;  %v837_v18 = vmul.f32 %v811_v13, %v811_v13  ;;  %v5473_v10 = vmov 1  }
 0x19d   :  { %4786 = vset.pattern.permute.xlu0 %v5473_v10 }
 0x19e   :  { %v849_v19 = vadd.f32 %v837_v18, %v836_v14 }
 0x1a9   :  { %v5834_v23 = vpop.f32.mrb[0].mxu1 }
 0x1aa   :  { %v806_v50 = vmul.f32 %v5830_v27, %v5834_v23  ;;  %v5838_v54 = vpop.f32.mrb[1].mxu1 }
 0x1ab   :  { %v807_v35 = vmul.f32 %v5832_v32, %v5838_v54 }
 0x1ac   :  { %v817_v36 = vadd.f32 %v816_v5, %v806_v50  ;;  %v832_v37 = vmul.f32 %v806_v50, %v806_v50  ;;  %v771_v5 = vld [vmem:[%s7200_s3] sm:$0xff] }
 0x1ad   :  { %v833_v12 = vmul.f32 %v807_v35, %v807_v35  ;;  %v5846_v28 = vpop.f32.mrb[2].mxu1  ;;  %v5848_v40 = vpop.f32.mrb[4].mxu0 }
 0x1ae   :  { %v843_v7 = vadd.f32 %v842_v51, %v832_v37  ;;  %v818_v15 = vadd.f32 %v817_v36, %v807_v35  ;;  %v812_v6 = vmul.f32 %v5830_v27, %v5846_v28  ;;  %v808_v17 = vmul.f32 %v5840_v34, %v5848_v40  ;;  %v5854_v30 = vpop.f32.mrb[3].mxu1  ;;  %v5856_v41 = vpop.f32.mrb[5].mxu0 }
 0x1af   :  { %v813_v43 = vmul.f32 %v5832_v32, %v5854_v30  ;;  %v809_v45 = vmul.f32 %v5844_v21, %v5856_v41 }
 0x1b0   :  { %v824_v22 = vadd.f32 %v823_v16, %v812_v6  ;;  %v838_v24 = vmul.f32 %v812_v6, %v812_v6  ;;  %v834_v59 = vmul.f32 %v808_v17, %v808_v17  ;;  %v819_v63 = vadd.f32 %v818_v15, %v808_v17 }
 0x1b1   :  { %v839_v46 = vmul.f32 %v813_v43, %v813_v43  ;;  %v5862_v29 = vpop.f32.mrb[6].mxu0  ;;  %v835_v47 = vmul.f32 %v809_v45, %v809_v45  ;;  %v844_v60 = vadd.f32 %v843_v7, %v833_v12 }
 0x1b2   :  { %v850_v20 = vadd.f32 %v849_v19, %v838_v24  ;;  %v825_v2 = vadd.f32 %v824_v22, %v813_v43  ;;  %v814_v49 = vmul.f32 %v5840_v34, %v5862_v29  ;;  %v5866_v52 = vpop.f32.mrb[7].mxu0  ;;  %v820_v38 = vadd.f32 %v819_v63, %v809_v45 }
 0x1b3   :  { %v815_v42 = vmul.f32 %v5844_v21, %v5866_v52  ;;  %v845_v39 = vadd.f32 %v844_v60, %v834_v59 }
 0x1b4   :  { %v840_v48 = vmul.f32 %v814_v49, %v814_v49  ;;  %821 = vadd.xlane.f32.xlu1 %v820_v38  ;;  %v826_v44 = vadd.f32 %v825_v2, %v814_v49  ;;  %v851_v53 = vadd.f32 %v850_v20, %v839_v46 }
 0x1b5   :  { %v841_v55 = vmul.f32 %v815_v42, %v815_v42  ;;  %v846_v56 = vadd.f32 %v845_v39, %v835_v47 }
 0x1b6   :  { %v827_v1 = vadd.f32 %v826_v44, %v815_v42  ;;  %v852_v3 = vadd.f32 %v851_v53, %v840_v48 }
 0x1b8   :  { %828 = vadd.xlane.f32.xlu0 %v827_v1  ;;  %v853_v4 = vadd.f32 %v852_v3, %v841_v55 }
 0x1ba   :  { %854 = vadd.xlane.f32.xlu1 %v853_v4 }
 0x1bc   :  { %847 = vadd.xlane.f32.xlu0 %v846_v56 }
 0x1cb   :  { %908 = vperm.xlu1 %4787, %v771_v5  }
 0x1cf   :  { %4788 = vset.pattern.permute.xlu1 %v5473_v10 }
 0x241   :  { %v822_v51 = vpop.xlane.xlu1 %821 }
 0x242   :  { %v856_v13 = vmul.f32 0.001953125, %v822_v51 }
 0x244   :  { %v872_v14 = vsub.f32 %v5814_v62, %v856_v13  ;;  %v873_v16 = vsub.f32 %v5818_v61, %v856_v13  ;;  %v874_v18 = vsub.f32 %v5834_v23, %v856_v13  ;;  %v875_v25 = vsub.f32 %v5838_v54, %v856_v13 }
 0x245   :  { %v829_v19 = vpop.xlane.xlu0 %828  ;;  %v876_v26 = vsub.f32 %v5848_v40, %v856_v13  ;;  %v877_v31 = vsub.f32 %v5856_v41, %v856_v13  ;;  %v860_v6 = vmul.f32 %v856_v13, %v856_v13 }
 0x246   :  { %v857_v33 = vmul.f32 0.001953125, %v829_v19 }
 0x247   :  { %v855_v50 = vpop.xlane.xlu1 %854 }
 0x248   :  { %v861_v35 = vmul.f32 %v857_v33, %v857_v33  ;;  %v859_v36 = vmul.f32 0.001953125, %v855_v50  ;;  %v878_v37 = vsub.f32 %v5822_v9, %v857_v33  ;;  %v879_v12 = vsub.f32 %v5826_v11, %v857_v33  ;;  %v772_v11 = vld [vmem:[%s7200_s3 + $0x8] sm:$0xff] }
 0x249   :  { %v848_v62 = vpop.xlane.xlu0 %847  ;;  %v880_v61 = vsub.f32 %v5846_v28, %v857_v33  ;;  %v881_v23 = vsub.f32 %v5854_v30, %v857_v33  ;;  %v882_v7 = vsub.f32 %v5862_v29, %v857_v33  ;;  %v883_v54 = vsub.f32 %v5866_v52, %v857_v33 }
 0x24a   :  { %v863_v40 = vsub.f32 %v859_v36, %v861_v35  ;;  %v858_v15 = vmul.f32 0.001953125, %v848_v62 }
 0x24b   :  { %v909_v59 = vpop.permute.xlu1 %908 }
 0x24c   :  { %v865_v17 = vmax.f32 %v863_v40, 0.0  ;;  %v862_v41 = vsub.f32 %v858_v15, %v860_v6 }
 0x24e   :  { %v867_v43 = vadd.f32 1e-05, %v865_v17  ;;  %v864_v45 = vmax.f32 %v862_v41, 0.0 }
 0x250   :  { %5389 = vrsqrt.f32 %v867_v43  ;;  %v866_v9 = vadd.f32 1e-05, %v864_v45 }
 0x252   :  { %5391 = vrsqrt.f32 %v866_v9 }
 0x25a   :  { %v5390_v28 = vpop.eup %5389 }
 0x25b   :  { %v871_v30 = vmul.f32 %v5390_v28, %v772_v11 }
 0x25c   :  { %v5392_v22 = vpop.eup %5391 }
 0x25d   :  { %v870_v24 = vmul.f32 %v5392_v22, %v771_v5  ;;  %891 = vperm.xlu1 %4788, %v871_v30  }
 0x25f   :  { %886 = vperm.xlu0 %4786, %v870_v24  }
 0x261   :  { %4789 = vset.pattern.permute.xlu1 %v5472_v8 }
 0x262   :  { %913 = vperm.xlu1 %4789, %v772_v11  }
 0x263   :  { %4796 = vrot.lane.b32.xlu0 %v5463_v0, %s5466_s21 }
 0x266   :  { %4791 = vrot.lane.b32.xlu1 %v5463_v0, %s5465_s0 }
 0x267   :  { %4806 = vrot.lane.b32.xlu0 %v5463_v0, %s5467_s22 }
 0x26a   :  { %4801 = vrot.lane.b32.xlu1 %v5463_v0, %s5464_s20 }
 0x2dc   :  { %v892_v63 = vpop.permute.xlu1 %891 }
 0x2dd   :  { %v900_v46 = vmul.f32 %v892_v63, %v878_v37  ;;  %v901_v29 = vmul.f32 %v892_v63, %v879_v12  ;;  %v902_v47 = vmul.f32 %v892_v63, %v880_v61  ;;  %v903_v60 = vmul.f32 %v892_v63, %v881_v23 }
 0x2de   :  { %v887_v20 = vpop.permute.xlu0 %886  ;;  %v904_v42 = vmul.f32 %v892_v63, %v882_v7  ;;  %v905_v39 = vmul.f32 %v892_v63, %v883_v54 }
 0x2df   :  { %v894_v2 = vmul.f32 %v887_v20, %v872_v14  ;;  %v895_v49 = vmul.f32 %v887_v20, %v873_v16  ;;  %v896_v52 = vmul.f32 %v887_v20, %v874_v18  ;;  %v897_v38 = vmul.f32 %v887_v20, %v875_v25 }
 0x2e0   :  { %v898_v48 = vmul.f32 %v887_v20, %v876_v26  ;;  %v899_v44 = vmul.f32 %v887_v20, %v877_v31 }
 0x2e1   :  { %v916_v53 = vadd.f32 %v909_v59, %v894_v2  ;;  %v917_v55 = vadd.f32 %v909_v59, %v895_v49  ;;  %v918_v56 = vadd.f32 %v909_v59, %v896_v52  ;;  %v919_v1 = vadd.f32 %v909_v59, %v897_v38  ;;  %v914_v0 = vpop.permute.xlu1 %913 }
 0x2e2   :  { %v920_v3 = vadd.f32 %v909_v59, %v898_v48  ;;  %v921_v4 = vadd.f32 %v909_v59, %v899_v44  ;;  %v922_v5 = vadd.f32 %v914_v0, %v900_v46  ;;  %v923_v8 = vadd.f32 %v914_v0, %v901_v29 }
 0x2e3   :  { %vm928_vm9 = vcmp.ge.f32.partialorder %v916_v53, 0.0  ;;  %vm929_vm10 = vcmp.ge.f32.partialorder %v917_v55, 0.0  ;;  %vm930_vm11 = vcmp.ge.f32.partialorder %v918_v56, 0.0  ;;  %vm931_vm12 = vcmp.ge.f32.partialorder %v919_v1, 0.0 }
 0x2e4   :  { %vm932_vm13 = vcmp.ge.f32.partialorder %v920_v3, 0.0  ;;  %vm933_vm14 = vcmp.ge.f32.partialorder %v921_v4, 0.0  ;;  %v940_v10 = vmul.f32 0.2, %v916_v53  ;;  %v941_v51 = vmul.f32 0.2, %v917_v55 }
 0x2e5   :  { %v942_v13 = vmul.f32 0.2, %v918_v56  ;;  %v943_v14 = vmul.f32 0.2, %v919_v1  ;;  %v944_v16 = vmul.f32 0.2, %v920_v3  ;;  %v924_v18 = vadd.f32 %v914_v0, %v902_v47 }
 0x2e6   :  { %v945_v19 = vmul.f32 0.2, %v921_v4  ;;  %v952_v25 = vsel %vm928_vm9, %v916_v53, %v940_v10  ;;  %v953_v26 = vsel %vm929_vm10, %v917_v55, %v941_v51  ;;  %v925_v31 = vadd.f32 %v914_v0, %v903_v60  ;;  %v4792_v10 = vpop.permute.xlu1 %4791 }
 0x2e7   :  { %v954_v33 = vsel %vm930_vm11, %v918_v56, %v942_v13  ;;  %v955_v50 = vsel %vm931_vm12, %v919_v1, %v943_v14  ;;  %v956_v35 = vsel %vm932_vm13, %v920_v3, %v944_v16  ;;  %v5897_v36 = vmul.f32 %v952_v25, %v5810_v57 }
 0x2e8   :  { %v957_v37 = vsel %vm933_vm14, %v921_v4, %v945_v19  ;;  %v5900_v12 = vmul.f32 %v953_v26, %v5812_v58  ;;  %v966_v62 = vmul.f32 %v954_v33, %v5830_v27  ;;  %v967_v61 = vmul.f32 %v955_v50, %v5832_v32  ;;  %v5977_v4 = vld [vmem:[%s7201_s4 + $0x8] sm:$0xff] }
 0x2e9   :  { %v968_v23 = vmul.f32 %v956_v35, %v5840_v34  ;;  %v5906_v7 = vmul.f32 %v957_v37, %v5844_v21  ;;  %v926_v54 = vadd.f32 %v914_v0, %v904_v42  ;;  %v927_v40 = vadd.f32 %v914_v0, %v905_v39  ;;  %v5969_v0 = vld [vmem:[#allocation2] sm:$0xff] }
 0x2ea   :  { %978 = vst [vmem:[#allocation2 + $0x18] sm:$0xff] %v966_v62  ;;  %979 = vst [vmem:[#allocation2 + $0x20] sm:$0xff] %v967_v61  ;;  %vm934_vm15 = vcmp.ge.f32.partialorder %v922_v5, 0.0  ;;  %vm935_vm9 = vcmp.ge.f32.partialorder %v923_v8, 0.0  ;;  %vm936_vm10 = vcmp.ge.f32.partialorder %v924_v18, 0.0  ;;  %vm937_vm11 = vcmp.ge.f32.partialorder %v925_v31, 0.0  ;;  %v6003_v13 = vpop.permute.xlu1 %4801 }
 0x2eb   :  { %980 = vst [vmem:[#allocation2 + $0x28] sm:$0xff] %v968_v23  ;;  %981 = vst [vmem:[#allocation2 + $0x30] sm:$0xff] %v5906_v7  ;;  %vm938_vm12 = vcmp.ge.f32.partialorder %v926_v54, 0.0  ;;  %vm939_vm13 = vcmp.ge.f32.partialorder %v927_v40, 0.0  ;;  %v946_v15 = vmul.f32 0.2, %v922_v5  ;;  %v4825_v45 = vpack.i.bf16 %v5900_v12, %v5897_v36 }
 0x2ec   :  { %v947_v6 = vmul.f32 0.2, %v923_v8  ;;  %v948_v17 = vmul.f32 0.2, %v924_v18  ;;  %v949_v41 = vmul.f32 0.2, %v925_v31  ;;  %v4835_v30 = vpack.i.bf16 %v966_v62, %v5900_v12 }
 0x2ed   :  { %v950_v43 = vmul.f32 0.2, %v926_v54  ;;  %v951_v9 = vmul.f32 0.2, %v927_v40  ;;  %v958_v11 = vsel %vm934_vm15, %v922_v5, %v946_v15  ;;  %4826 = vrot.lane.b32.xlu0 %v4825_v45, %s5467_s22  ;;  %4811 = vrot.lane.b32.xlu1 %v4825_v45, %s5465_s0  ;;  %v4845_v49 = vpack.i.bf16 %v967_v61, %v966_v62 }
 0x2ee   :  { %v959_v28 = vsel %vm935_vm9, %v923_v8, %v947_v6  ;;  %v960_v22 = vsel %vm936_vm10, %v924_v18, %v948_v17  ;;  %v961_v24 = vsel %vm937_vm11, %v925_v31, %v949_v41  ;;  %v5915_v63 = vmul.f32 %v958_v11, %v5810_v57  ;;  %v4797_v8 = vpop.permute.xlu0 %4796 }
 0x2ef   :  { %v962_v59 = vsel %vm938_vm12, %v926_v54, %v950_v43  ;;  %v963_v46 = vsel %vm939_vm13, %v927_v40, %v951_v9  ;;  %v5920_v29 = vmul.f32 %v959_v28, %v5812_v58  ;;  %v972_v47 = vmul.f32 %v960_v22, %v5830_v27 }
 0x2f0   :  { %v973_v60 = vmul.f32 %v961_v24, %v5832_v32  ;;  %v974_v20 = vmul.f32 %v962_v59, %v5840_v34  ;;  %v975_v2 = vmul.f32 %v963_v46, %v5844_v21  ;;  %v4855_v52 = vpack.i.bf16 %v5906_v7, %v968_v23 }
 0x2f1   :  { %984 = vst [vmem:[#allocation2 + $0x58] sm:$0xff] %v972_v47  ;;  %v4895_v38 = vpack.i.bf16 %v5920_v29, %v5915_v63  ;;  %v4905_v42 = vpack.i.bf16 %v972_v47, %v5920_v29  ;;  %v4920_v39 = vpack.i.bf16 %v5915_v63, %v5897_v36  ;;  %4836 = vrot.lane.b32.xlu0 %v4835_v30, %s5469_s24  ;;  %vm1858_vm14 = vcmask 130048  }
 0x2f2   :  { %985 = vst [vmem:[#allocation2 + $0x60] sm:$0xff] %v973_v60  ;;  %v5000_v48 = vpack.i.bf16 %v973_v60, %v972_v47  ;;  %986 = vst [vmem:[#allocation2 + $0x68] sm:$0xff] %v974_v20  ;;  %v4995_v44 = vpack.i.bf16 %v975_v2, %v974_v20  ;;  %v5030_v53 = vpack.i.bf16 %v974_v20, %v973_v60  ;;  %4816 = vrot.lane.b32.xlu1 %v4825_v45, %s5466_s21  ;;  %v6000_v51 = vpop.permute.xlu0 %4806 }
 0x2f3   :  { %987 = vst [vmem:[#allocation2 + $0x70] sm:$0xff] %v975_v2  ;;  %v4950_v55 = vpack.i.bf16 %v968_v23, %v967_v61  ;;  %v4431_v56 = vpack.c.bf16 %v5920_v29, %v5900_v12  ;;  %v5035_v3 = vpack.i.bf16 %v5969_v0, %v975_v2  ;;  %4355 = vmatprep.mubr.msk.f32.mxu1 %vm1858_vm14, %v5977_v4  ;;  %v4793_v9 = vunpack.i.l.bf16 %v4792_v10 }
 0x2f4   :  { %4356 = vmatprep.mubr.msk.f32.mxu0 %vm1858_vm14, %v5977_v4  ;;  %v4955_v5 = vpack.i.bf16 %v5969_v0, %v5906_v7  ;;  %v4798_v28 = vunpack.i.l.bf16 %v4797_v8 }
 0x2f5   :  { %4846 = vrot.lane.b32.xlu0 %v4845_v49, %s5465_s0 }
 0x2f6   :  { %4821 = vrot.lane.b32.xlu1 %v4825_v45, %s5464_s20 }
 0x2f9   :  { %4851 = vrot.lane.b32.xlu0 %v4835_v30, %s5471_s26 }
 0x2fa   :  { %4831 = vrot.lane.b32.xlu1 %v4835_v30, %s5468_s23 }
 0x2fd   :  { %4896 = vrot.lane.b32.xlu0 %v4895_v38, %s5464_s20 }
 0x2fe   :  { %4841 = vrot.lane.b32.xlu1 %v4835_v30, %s5470_s25  ;;  %v4794_v30 = vunpack.i.h.bf16 %v4792_v10 }
 0x301   :  { %4906 = vrot.lane.b32.xlu0 %v4905_v42, %s5468_s23 }
 0x302   :  { %4856 = vrot.lane.b32.xlu1 %v4855_v52, %s5465_s0 }
 0x305   :  { %4921 = vrot.lane.b32.xlu0 %v4920_v39, %s5469_s24 }
 0x306   :  { %4861 = vrot.lane.b32.xlu1 %v4845_v49, %s5466_s21 }
 0x309   :  { %4926 = vrot.lane.b32.xlu0 %v4905_v42, %s5470_s25 }
 0x30a   :  { %4866 = vrot.lane.b32.xlu1 %v4855_v52, %s5466_s21 }
 0x30d   :  { %4991 = vrot.lane.b32.xlu0 %v4920_v39, %s5471_s26 }
 0x30e   :  { %4871 = vrot.lane.b32.xlu1 %v4845_v49, %s5464_s20 }
 0x311   :  { %4996 = vrot.lane.b32.xlu0 %v4995_v44, %s5465_s0 }
 0x312   :  { %4876 = vrot.lane.b32.xlu1 %v4855_v52, %s5464_s20 }
 0x315   :  { %5001 = vrot.lane.b32.xlu0 %v5000_v48, %s5466_s21 }
 0x316   :  { %4881 = vrot.lane.b32.xlu1 %v4895_v38, %s5465_s0 }
 0x319   :  { %5006 = vrot.lane.b32.xlu0 %v4995_v44, %s5466_s21 }
 0x31a   :  { %4886 = vrot.lane.b32.xlu1 %v4895_v38, %s5466_s21 }
 0x31d   :  { %5011 = vrot.lane.b32.xlu0 %v5000_v48, %s5464_s20 }
 0x31e   :  { %4891 = vrot.lane.b32.xlu1 %v4845_v49, %s5467_s22 }
 0x321   :  { %5016 = vrot.lane.b32.xlu0 %v4995_v44, %s5464_s20 }
 0x322   :  { %4901 = vrot.lane.b32.xlu1 %v4895_v38, %s5467_s22 }
 0x325   :  { %5021 = vrot.lane.b32.xlu0 %v5000_v48, %s5467_s22 }
 0x326   :  { %4911 = vrot.lane.b32.xlu1 %v4920_v39, %s5468_s23 }
 0x329   :  { %5026 = vrot.lane.b32.xlu0 %v4995_v44, %s5467_s22 }
 0x32a   :  { %4916 = vrot.lane.b32.xlu1 %v4905_v42, %s5469_s24 }
 0x32d   :  { %5031 = vrot.lane.b32.xlu0 %v5030_v53, %s5468_s23 }
 0x32e   :  { %4931 = vrot.lane.b32.xlu1 %v4920_v39, %s5470_s25 }
 0x331   :  { %5036 = vrot.lane.b32.xlu0 %v5035_v3, %s5468_s23 }
 0x332   :  { %4936 = vrot.lane.b32.xlu1 %v5000_v48, %s5465_s0 }
 0x335   :  { %5041 = vrot.lane.b32.xlu0 %v5030_v53, %s5469_s24 }
 0x336   :  { %4941 = vrot.lane.b32.xlu1 %v4905_v42, %s5471_s26  ;;  %v4799_v42 = vunpack.i.h.bf16 %v4797_v8 }
 0x339   :  { %5046 = vrot.lane.b32.xlu0 %v5035_v3, %s5469_s24 }
 0x33a   :  { %4946 = vrot.lane.b32.xlu1 %v4855_v52, %s5467_s22 }
 0x33d   :  { %5051 = vrot.lane.b32.xlu0 %v5030_v53, %s5470_s25 }
 0x33e   :  { %4951 = vrot.lane.b32.xlu1 %v4950_v55, %s5468_s23 }
 0x341   :  { %5056 = vrot.lane.b32.xlu0 %v5035_v3, %s5470_s25 }
 0x342   :  { %4956 = vrot.lane.b32.xlu1 %v4955_v5, %s5468_s23 }
 0x345   :  { %5061 = vrot.lane.b32.xlu0 %v5030_v53, %s5471_s26 }
 0x346   :  { %4961 = vrot.lane.b32.xlu1 %v4950_v55, %s5469_s24 }
 0x349   :  { %5066 = vrot.lane.b32.xlu0 %v5035_v3, %s5471_s26 }
 0x34a   :  { %4966 = vrot.lane.b32.xlu1 %v4955_v5, %s5469_s24 }
 0x34e   :  { %4971 = vrot.lane.b32.xlu1 %v4950_v55, %s5470_s25 }
 0x352   :  { %4976 = vrot.lane.b32.xlu1 %v4955_v5, %s5470_s25 }
 0x356   :  { %4981 = vrot.lane.b32.xlu1 %v4950_v55, %s5471_s26 }
 0x35a   :  { %4986 = vrot.lane.b32.xlu1 %v4955_v5, %s5471_s26 }
 0x35f   :  { %v6005_v14 = vpop.permute.xlu0 %4826  ;;  %v6007_v16 = vpop.permute.xlu1 %4811 }
 0x360   :  { %v4814_v41 = vunpack.i.h.bf16 %v6007_v16  ;;  %v4813_v43 = vunpack.i.l.bf16 %v6007_v16 }
 0x362   :  { %v1044_v59 = vsel %vm117_vm0, %v4793_v9, %v4813_v43  ;;  %v1045_v60 = vsel %vm117_vm0, %v4813_v43, %v4814_v41 }
 0x363   :  { %v6009_v18 = vpop.permute.xlu0 %4836 }
 0x364   :  { %v6011_v19 = vpop.permute.xlu1 %4816 }
 0x365   :  { %v7217_v46 = vunpack.i.h.bf16 %v6011_v19  ;;  %v4818_v47 = vunpack.i.l.bf16 %v6011_v19 }
 0x367   :  { %v6013_v25 = vpop.permute.xlu0 %4846  ;;  %v1136_v10 = vsel %vm164_vm1, %v4798_v28, %v4818_v47  ;;  %v1137_v8 = vsel %vm164_vm1, %v4818_v47, %v7217_v46  ;;  %v4804_v28 = vunpack.i.h.bf16 %v6003_v13 }
 0x368   :  { %v6015_v26 = vpop.permute.xlu1 %4821 }
 0x369   :  { %v7212_v53 = vunpack.i.h.bf16 %v6015_v26  ;;  %v4823_v55 = vunpack.i.l.bf16 %v6015_v26 }
 0x36b   :  { %v6017_v31 = vpop.permute.xlu0 %4851  ;;  %v1229_v47 = vsel %vm211_vm2, %v4823_v55, %v7212_v53 }
 0x36c   :  { %v6019_v33 = vpop.permute.xlu1 %4831  ;;  %v7230_v34 = vunpack.i.h.bf16 %v6017_v31  ;;  %v7231_v12 = vunpack.i.l.bf16 %v6017_v31 }
 0x36e   :  { %v6167_v29 = vsel %vm458_vm7, %v7231_v12, %v7230_v34 }
 0x36f   :  { %v6021_v50 = vpop.permute.xlu0 %4896 }
 0x370   :  { %v6023_v35 = vpop.permute.xlu1 %4841  ;;  %v7210_v20 = vunpack.i.h.bf16 %v6021_v50  ;;  %v4898_v2 = vunpack.i.l.bf16 %v6021_v50 }
 0x373   :  { %v6025_v37 = vpop.permute.xlu0 %4906 }
 0x374   :  { %v6027_v62 = vpop.permute.xlu1 %4856 }
 0x377   :  { %v6029_v61 = vpop.permute.xlu0 %4921 }
 0x378   :  { %v6031_v23 = vpop.permute.xlu1 %4861  ;;  %v4923_v46 = vunpack.i.l.bf16 %v6029_v61 }
 0x37b   :  { %v6033_v7 = vpop.permute.xlu0 %4926 }
 0x37c   :  { %v6035_v54 = vpop.permute.xlu1 %4866 }
 0x37f   :  { %v6037_v40 = vpop.permute.xlu0 %4991 }
 0x380   :  { %v6039_v15 = vpop.permute.xlu1 %4871 }
 0x383   :  { %v6041_v6 = vpop.permute.xlu0 %4996 }
 0x384   :  { %v6043_v17 = vpop.permute.xlu1 %4876 }
 0x387   :  { %v6047_v45 = vpop.permute.xlu0 %5001 }
 0x388   :  { %v6049_v11 = vpop.permute.xlu1 %4881 }
 0x389   :  { %v7214_v22 = vunpack.i.h.bf16 %v6049_v11  ;;  %v4883_v24 = vunpack.i.l.bf16 %v6049_v11  ;;  %v7238_v32 = vunpack.i.h.bf16 %v6049_v11 }
 0x38b   :  { %v1050_v49 = vsel %vm117_vm0, %v4794_v30, %v4883_v24  ;;  %v6062_v52 = vpop.permute.xlu0 %5006  ;;  %v1051_v38 = vsel %vm117_vm0, %v4883_v24, %v7214_v22  ;;  %v1235_v24 = vsel %vm211_vm2, %v4898_v2, %v7210_v20  ;;  %v4833_v22 = vunpack.i.l.bf16 %v6019_v33 }
 0x38c   :  { %v6067_v39 = vpop.permute.xlu1 %4886  ;;  %v4415_v48 = vpack.c.bf16 %v1051_v38, %v1045_v60  ;;  %v4417_v44 = vpack.c.bf16 %v1050_v49, %v1044_v59  ;;  %v4808_v38 = vunpack.i.l.bf16 %v6000_v51  ;;  %v4423_v20 = vpack.c.bf16 %v1235_v24, %v1229_v47 }
 0x38d   :  { %v7211_v3 = vunpack.i.h.bf16 %v6067_v39  ;;  %v4888_v5 = vunpack.i.l.bf16 %v6067_v39  ;;  %v7218_v47 = vunpack.i.h.bf16 %v6025_v37 }
 0x38e   :  { %4416 = vmatprep.subr.bf16.mxu1 %v4415_v48  ;;  %v7213_v48 = vunpack.i.h.bf16 %v6005_v14 }
 0x38f   :  { %v1142_v43 = vsel %vm164_vm1, %v4799_v42, %v4888_v5  ;;  %4418 = vmatpush1.bf16.msra.mxu1 %v4417_v44  ;;  %v6075_v9 = vpop.permute.xlu0 %5011  ;;  %v1143_v30 = vsel %vm164_vm1, %v4888_v5, %v7211_v3  ;;  %v4803_v42 = vunpack.i.l.bf16 %v6003_v13  ;;  %v4828_v44 = vunpack.i.l.bf16 %v6005_v14 }
 0x390   :  { %v6087_v59 = vpop.permute.xlu1 %4891  ;;  %v4419_v60 = vpack.c.bf16 %v1143_v30, %v1137_v8  ;;  %v4421_v49 = vpack.c.bf16 %v1142_v43, %v1136_v10  ;;  %v1234_v5 = vsel %vm211_vm2, %v4804_v28, %v4898_v2  ;;  %v4809_v3 = vunpack.i.h.bf16 %v6000_v51 }
 0x391   :  { %v7216_v43 = vunpack.i.h.bf16 %v6009_v18  ;;  %v4838_v13 = vunpack.i.l.bf16 %v6009_v18  ;;  %v4848_v8 = vunpack.i.l.bf16 %v6013_v25  ;;  %v1228_v30 = vsel %vm211_vm2, %v4803_v42, %v4823_v55 }
 0x392   :  { %4420 = vmatprep.subr.bf16.mxu1 %v4419_v60  ;;  %v4849_v2 = vunpack.i.h.bf16 %v6013_v25  ;;  %v4425_v28 = vpack.c.bf16 %v1234_v5, %v1228_v30  ;;  %v1320_v60 = vsel %vm258_vm3, %v4808_v38, %v4828_v44  ;;  %v4908_v55 = vunpack.i.l.bf16 %v6025_v37 }
 0x393   :  { %4422 = vmatpush1.bf16.msra.mxu1 %v4421_v49  ;;  %v6098_v10 = vpop.permute.xlu0 %5016  ;;  %v1321_v49 = vsel %vm258_vm3, %v4828_v44, %v7213_v48  ;;  %v6124_v38 = vsel %vm117_vm0, %v4814_v41, %v4848_v8  ;;  %v1529_v48 = vsel %vm364_vm5, %v4838_v13, %v7216_v43  ;;  %v4863_v41 = vunpack.i.l.bf16 %v6031_v23 }
 0x394   :  { %v6104_v53 = vpop.permute.xlu1 %4901  ;;  %4424 = vmatprep.subr.bf16.mxu1 %v4423_v20 }
 0x395   :  { %v7215_v24 = vunpack.i.h.bf16 %v6104_v53  ;;  %v4903_v51 = vunpack.i.l.bf16 %v6104_v53 }
 0x397   :  { %v1326_v42 = vsel %vm258_vm3, %v4809_v3, %v4903_v51  ;;  %4426 = vmatpush1.bf16.msra.mxu1 %v4425_v28  ;;  %v6116_v20 = vpop.permute.xlu0 %5021  ;;  %v1327_v25 = vsel %vm258_vm3, %v4903_v51, %v7215_v24  ;;  %v7223_v28 = vunpack.i.h.bf16 %v6019_v33  ;;  %v6133_v51 = vsel %vm117_vm0, %v4848_v8, %v4849_v2 }
 0x398   :  { %v4912_v5 = vpop.permute.xlu1 %4911  ;;  %v4427_v44 = vpack.c.bf16 %v1327_v25, %v1321_v49  ;;  %v4429_v30 = vpack.c.bf16 %v1326_v42, %v1320_v60  ;;  %v4843_v60 = vunpack.i.l.bf16 %v6023_v35  ;;  %v4859_v42 = vunpack.i.h.bf16 %v6027_v62 }
 0x399   :  { %v4914_v24 = vunpack.i.h.bf16 %v4912_v5  ;;  %v4913_v49 = vunpack.i.l.bf16 %v4912_v5  ;;  %v4858_v25 = vunpack.i.l.bf16 %v6027_v62  ;;  %v1443_v8 = vsel %vm317_vm4, %v4908_v55, %v7218_v47 }
 0x39a   :  { %4428 = vmatprep.subr.bf16.mxu1 %v4427_v44  ;;  %v4928_v44 = vunpack.i.l.bf16 %v6033_v7  ;;  %v1437_v16 = vsel %vm317_vm4, %v4833_v22, %v7223_v28  ;;  %v7232_v62 = vpack.c.bf16 %v5915_v63, %v5897_v36  ;;  %v7234_v36 = vunpack.i.h.bf16 %v6011_v19 }
 0x39b   :  { %4430 = vmatpush1.bf16.msra.mxu1 %v4429_v30  ;;  %v6140_v43 = vpop.permute.xlu0 %5026  ;;  %v1442_v5 = vsel %vm317_vm4, %v4914_v24, %v4908_v55  ;;  %v1436_v3 = vsel %vm317_vm4, %v4913_v49, %v4833_v22  ;;  %v4435_v21 = vpack.c.bf16 %v1443_v8, %v1437_v16  ;;  %v7233_v24 = vunpack.i.h.bf16 %v6023_v35 }
 0x39c   :  { %v6149_v1 = vpop.permute.xlu1 %4916  ;;  %4432 = vmatprep.subr.bf16.mxu1 %v4431_v56  ;;  %v6170_v56 = vsel %vm117_vm0, %v4849_v2, %v4858_v25  ;;  %v6184_v34 = vsel %vm117_vm0, %v4858_v25, %v4859_v42  ;;  %v4924_v2 = vunpack.i.h.bf16 %v6029_v61  ;;  %v1528_v16 = vsel %vm364_vm5, %v4923_v46, %v4838_v13 }
 0x39d   :  { %v7224_v30 = vunpack.i.h.bf16 %v6149_v1  ;;  %v4918_v47 = vunpack.i.l.bf16 %v6149_v1  ;;  %v1621_v55 = vsel %vm411_vm6, %v4843_v60, %v7233_v24  ;;  %v6191_v63 = vsel %vm164_vm1, %v7234_v36, %v4863_v41 }
 0x39e   :  { %v7235_v8 = vunpack.i.h.bf16 %v6033_v7  ;;  %v4437_v25 = vpack.c.bf16 %v1442_v5, %v1436_v3  ;;  %v7236_v61 = vunpack.i.h.bf16 %v6031_v23  ;;  %v4994_v3 = vunpack.i.h.bf16 %v6037_v40 }
 0x39f   :  { %4434 = vmatpush1.bf16.msra.mxu1 %v7232_v62  ;;  %v6175_v28 = vpop.permute.xlu0 %5031  ;;  %v1535_v22 = vsel %vm364_vm5, %v4918_v47, %v7224_v30  ;;  %v1534_v19 = vsel %vm364_vm5, %v4924_v2, %v4918_v47  ;;  %v4999_v47 = vunpack.i.h.bf16 %v6041_v6  ;;  %v5013_v30 = vunpack.i.l.bf16 %v6075_v9 }
 0x3a0   :  { %v4932_v49 = vpop.permute.xlu1 %4931  ;;  %4436 = vmatprep.subr.bf16.mxu1 %v4435_v21  ;;  %v1627_v62 = vsel %vm411_vm6, %v4928_v44, %v7235_v8  ;;  %v1139_v46 = vsel %vm164_vm1, %v4863_v41, %v7236_v61  ;;  %v4439_v36 = vpack.c.bf16 %v1535_v22, %v1529_v48  ;;  %v4993_v21 = vunpack.i.l.bf16 %v6037_v40 }
 0x3a1   :  { %v4934_v13 = vunpack.i.h.bf16 %v4932_v49  ;;  %v4933_v24 = vunpack.i.l.bf16 %v4932_v49  ;;  %v5003_v8 = vunpack.i.l.bf16 %v6047_v45  ;;  %v4443_v42 = vpack.c.bf16 %v1627_v62, %v1621_v55 }
 0x3a2   :  { %v4873_v41 = vunpack.i.l.bf16 %v6039_v15  ;;  %v4998_v48 = vunpack.i.l.bf16 %v6041_v6  ;;  %v4441_v61 = vpack.c.bf16 %v1534_v19, %v1528_v16  ;;  %v7237_v62 = vunpack.i.l.bf16 %v6017_v31 }
 0x3a3   :  { %4438 = vmatpush1.bf16.msra.mxu1 %v4437_v25  ;;  %v6205_v12 = vpop.permute.xlu0 %5036  ;;  %v5014_v25 = vunpack.i.h.bf16 %v6075_v9  ;;  %v1626_v55 = vsel %vm411_vm6, %v4934_v13, %v4928_v44  ;;  %v1620_v40 = vsel %vm411_vm6, %v4933_v24, %v4843_v60  ;;  %v7239_v16 = vunpack.i.h.bf16 %v6047_v45 }
 0x3a4   :  { %v4937_v2 = vpop.permute.xlu1 %4936  ;;  %4440 = vmatprep.subr.bf16.mxu1 %v4439_v36  ;;  %v1712_v5 = vsel %vm458_vm7, %v4993_v21, %v7237_v62  ;;  %v5008_v44 = vunpack.i.l.bf16 %v6062_v52  ;;  %v7240_v62 = vunpack.i.h.bf16 %v6067_v39 }
 0x3a5   :  { %v4939_v22 = vunpack.i.h.bf16 %v4937_v2  ;;  %v4938_v49 = vunpack.i.l.bf16 %v4937_v2  ;;  %v1145_v19 = vsel %vm164_vm1, %v5003_v8, %v7239_v16  ;;  %v5009_v2 = vunpack.i.h.bf16 %v6062_v52 }
 0x3a6   :  { %v1144_v52 = vsel %vm164_vm1, %v7240_v62, %v5003_v8  ;;  %v4455_v16 = vpack.c.bf16 %v1145_v19, %v1139_v46  ;;  %v5019_v62 = vunpack.i.h.bf16 %v6098_v10 }
 0x3a7   :  { %v1052_v36 = vsel %vm117_vm0, %v7238_v32, %v4938_v49  ;;  %4442 = vmatpush1.bf16.msra.mxu1 %v4441_v61  ;;  %v1053_v6 = vsel %vm117_vm0, %v4938_v49, %v4939_v22  ;;  %v6232_v24 = vpop.permute.xlu0 %5041  ;;  %v4445_v49 = vpack.c.bf16 %v1626_v55, %v1620_v40  ;;  %v1055_v61 = vsel %vm117_vm0, %v4998_v48, %v4999_v47 }
 0x3a8   :  { %v6228_v60 = vpop.permute.xlu1 %4941  ;;  %4444 = vmatprep.subr.bf16.mxu1 %v4443_v42  ;;  %v4451_v13 = vpack.c.bf16 %v1053_v6, %v6133_v51  ;;  %v4453_v11 = vpack.c.bf16 %v1052_v36, %v6124_v38  ;;  %v7241_v42 = vunpack.i.h.bf16 %v6039_v15  ;;  %v1237_v38 = vsel %vm211_vm2, %v5013_v30, %v5014_v25 }
 0x3a9   :  { %v4944_v32 = vunpack.i.h.bf16 %v6228_v60  ;;  %v4943_v21 = vunpack.i.l.bf16 %v6228_v60  ;;  %v5024_v36 = vunpack.i.h.bf16 %v6116_v20  ;;  %v5023_v55 = vunpack.i.l.bf16 %v6116_v20 }
 0x3aa   :  { %4452 = vmatprep.subr.bf16.mxu0 %v4451_v13  ;;  %v1231_v51 = vsel %vm211_vm2, %v4873_v41, %v7241_v42  ;;  %v4487_v6 = vpack.c.bf16 %v1055_v61, %v6184_v34  ;;  %v1147_v19 = vsel %vm164_vm1, %v5008_v44, %v5009_v2  ;;  %v7242_v13 = vunpack.i.h.bf16 %v6021_v50 }
 0x3ab   :  { %v1718_v47 = vsel %vm458_vm7, %v4994_v3, %v4943_v21  ;;  %4446 = vmatpush1.bf16.msra.mxu1 %v4445_v49  ;;  %4454 = vmatpush1.bf16.msra.mxu0 %v4453_v11  ;;  %v1719_v39 = vsel %vm458_vm7, %v4943_v21, %v4944_v32  ;;  %v4894_v11 = vunpack.i.h.bf16 %v6087_v59  ;;  %v4893_v49 = vunpack.i.l.bf16 %v6087_v59  ;;  %v6271_v2 = vpop.permute.xlu0 %5046 }
 0x3ac   :  { %v6252_v46 = vpop.permute.xlu1 %4946  ;;  %4456 = vmatprep.subr.bf16.mxu0 %v4455_v16  ;;  %v4447_v8 = vpack.c.bf16 %v1719_v39, %v6167_v29  ;;  %v4449_v40 = vpack.c.bf16 %v1718_v47, %v1712_v5  ;;  %v1236_v3 = vsel %vm211_vm2, %v7242_v13, %v5013_v30  ;;  %v4457_v21 = vpack.c.bf16 %v1144_v52, %v6191_v63  ;;  %v6276_v63 = vld [vmem:[%s7201_s4] sm:$0xff] }
 0x3ad   :  { %v5018_v16 = vunpack.i.l.bf16 %v6098_v10  ;;  %v1054_v29 = vsel %vm117_vm0, %v4939_v22, %v4998_v48  ;;  %v4459_v34 = vpack.c.bf16 %v1237_v38, %v1231_v51  ;;  %v7243_v5 = vunpack.i.l.bf16 %v6035_v54 }
 0x3ae   :  { %4448 = vmatprep.subr.bf16.mxu1 %v4447_v8  ;;  %v7244_v50 = vunpack.i.h.bf16 %v6031_v23  ;;  %v1329_v10 = vsel %vm258_vm3, %v5023_v55, %v5024_v36  ;;  %v7245_v48 = vunpack.i.h.bf16 %v6035_v54  ;;  %v7247_v61 = vunpack.i.h.bf16 %v6015_v26 }
 0x3af   :  { %4450 = vmatpush1.bf16.msra.mxu1 %v4449_v40  ;;  %4458 = vmatpush1.bf16.msra.mxu0 %v4457_v21  ;;  %v7246_v22 = vmov %v7243_v5  ;;  %v4879_v42 = vunpack.i.h.bf16 %v6043_v17  ;;  %v4878_v51 = vunpack.i.l.bf16 %v6043_v17  ;;  %v7248_v38 = vunpack.i.h.bf16 %v6047_v45 }
 0x3b0   :  { %v1140_v30 = vsel %vm164_vm1, %v7244_v50, %v7243_v5  ;;  %v1141_v23 = vsel %vm164_vm1, %v7246_v22, %v7245_v48  ;;  %v1230_v52 = vsel %vm211_vm2, %v7247_v61, %v4873_v41  ;;  %v6294_v39 = vpop.permute.xlu1 %4951  ;;  %4460 = vmatprep.subr.bf16.mxu0 %v4459_v34  ;;  %4488 = vmatprep.subr.bf16.mxu1 %v4487_v6  ;;  %v7249_v40 = vunpack.i.h.bf16 %v6005_v14  ;;  %v1359_v6 = vld [vmem:[#allocation2 + $0x20] sm:$0xff] }
 0x3b1   :  { %v1146_v47 = vsel %vm164_vm1, %v7248_v38, %v5008_v44  ;;  %v4461_v8 = vpack.c.bf16 %v1236_v3, %v1230_v52  ;;  %v4489_v54 = vpack.c.bf16 %v1054_v29, %v6170_v56  ;;  %v1323_v26 = vsel %vm258_vm3, %v4893_v49, %v4894_v11  ;;  %v1364_v29 = vld [vmem:[#allocation2 + $0x58] sm:$0xff] }
 0x3b2   :  { %v4491_v41 = vpack.c.bf16 %v1147_v19, %v1141_v23  ;;  %v1322_v17 = vsel %vm258_vm3, %v7249_v40, %v4893_v49  ;;  %v7250_v45 = vunpack.i.h.bf16 %v6104_v53  ;;  %1927 = vmatmul.mubr.f32.vlgmr.msra.gmra.mrb[4].mxu1 %v6276_v63  ;;  %v4463_v13 = vpack.c.bf16 %v1329_v10, %v1323_v26  ;;  %v1365_v49 = vld [vmem:[#allocation2 + $0x60] sm:$0xff]  ;;  %v1358_v53 = vld [vmem:[#allocation2 + $0x18] sm:$0xff]  ;;  %v6321_v10 = vpop.permute.xlu0 %5051  ;;  %v1361_v26 = vld [vmem:[#allocation2 + $0x30] sm:$0xff] }
 0x3b3   :  { %v1239_v3 = vsel %vm211_vm2, %v5018_v16, %v5019_v62  ;;  %v4949_v56 = vunpack.i.h.bf16 %v6252_v46  ;;  %v4948_v21 = vunpack.i.l.bf16 %v6252_v46  ;;  %v4954_v19 = vunpack.i.h.bf16 %v6294_v39  ;;  %4462 = vmatpush1.bf16.msra.mxu0 %v4461_v8  ;;  %4490 = vmatpush1.bf16.msra.mxu1 %v4489_v54 }
 0x3b4   :  { %v1328_v44 = vsel %vm258_vm3, %v7250_v45, %v5023_v55  ;;  %v4953_v14 = vunpack.i.l.bf16 %v6294_v39  ;;  %v5029_v55 = vunpack.i.h.bf16 %v6140_v43  ;;  %v5028_v34 = vunpack.i.l.bf16 %v6140_v43  ;;  %v6316_v50 = vpop.permute.xlu1 %4956  ;;  %4464 = vmatprep.subr.bf16.mxu0 %v4463_v13  ;;  %4492 = vmatprep.subr.bf16.mxu1 %v4491_v41  ;;  %v1367_v41 = vld [vmem:[#allocation2 + $0x70] sm:$0xff] }
 0x3b5   :  { %v5034_v5 = vunpack.i.h.bf16 %v6175_v28  ;;  %v5033_v62 = vunpack.i.l.bf16 %v6175_v28  ;;  %v1238_v46 = vsel %vm211_vm2, %v5014_v25, %v5018_v16  ;;  %v4465_v48 = vpack.c.bf16 %v1328_v44, %v1322_v17  ;;  %4357 = vmatprep.mubr.msk.f32.mxu1 %vm1858_vm14, %v5977_v4 }
 0x3b6   :  { %v4493_v22 = vpack.c.bf16 %v1146_v47, %v1140_v30  ;;  %v1233_v23 = vsel %vm211_vm2, %v4878_v51, %v4879_v42  ;;  %v4467_v43 = vpack.c.bf16 %v1365_v49, %v1359_v6  ;;  %v4469_v52 = vpack.c.bf16 %v1364_v29, %v1358_v53  ;;  %v6349_v6 = vpop.permute.xlu0 %5056  ;;  %v1360_v29 = vld [vmem:[#allocation2 + $0x28] sm:$0xff] }
 0x3b7   :  { %v4495_v61 = vpack.c.bf16 %v1239_v3, %v1233_v23  ;;  %v7251_v38 = vunpack.i.h.bf16 %v6039_v15  ;;  %4466 = vmatpush1.bf16.msra.mxu0 %v4465_v48  ;;  %v1439_v9 = vsel %vm317_vm4, %v4953_v14, %v4954_v19  ;;  %v1325_v25 = vsel %vm258_vm3, %v4948_v21, %v4949_v56 }
 0x3b8   :  { %4494 = vmatpush1.bf16.msra.mxu1 %v4493_v22  ;;  %v6333_v16 = vpop.permute.xlu1 %4961  ;;  %4468 = vmatprep.subr.bf16.mxu0 %v4467_v43  ;;  %v1445_v30 = vsel %vm317_vm4, %v5033_v62, %v5034_v5  ;;  %v1331_v15 = vsel %vm258_vm3, %v5028_v34, %v5029_v55  ;;  %v5044_v42 = vunpack.i.h.bf16 %v6232_v24  ;;  %v1324_v40 = vsel %vm258_vm3, %v4894_v11, %v4948_v21  ;;  %v1366_v55 = vld [vmem:[#allocation2 + $0x68] sm:$0xff] }
 0x3b9   :  { %v1232_v8 = vsel %vm211_vm2, %v7251_v38, %v4878_v51  ;;  %4496 = vmatprep.subr.bf16.mxu1 %v4495_v61  ;;  %v5043_v51 = vunpack.i.l.bf16 %v6232_v24  ;;  %v4964_v47 = vunpack.i.h.bf16 %v6333_v16  ;;  %v4963_v54 = vunpack.i.l.bf16 %v6333_v16 }
 0x3ba   :  { %v4497_v4 = vpack.c.bf16 %v1238_v46, %v1232_v8  ;;  %v7252_v17 = vunpack.i.h.bf16 %v6019_v33  ;;  %v4471_v44 = vpack.c.bf16 %v1445_v30, %v1439_v9  ;;  %v4499_v13 = vpack.c.bf16 %v1331_v15, %v1325_v25 }
 0x3bb   :  { %v4959_v3 = vunpack.i.h.bf16 %v6316_v50  ;;  %v4958_v56 = vunpack.i.l.bf16 %v6316_v50  ;;  %4470 = vmatpush1.bf16.msra.mxu0 %v4469_v52  ;;  %v1531_v59 = vsel %vm364_vm5, %v4963_v54, %v4964_v47  ;;  %v1330_v33 = vsel %vm258_vm3, %v5024_v36, %v5028_v34 }
 0x3bc   :  { %v1438_v45 = vsel %vm317_vm4, %v7252_v17, %v4953_v14  ;;  %4498 = vmatpush1.bf16.msra.mxu1 %v4497_v4  ;;  %v7253_v11 = vunpack.i.h.bf16 %v6025_v37  ;;  %v5038_v14 = vunpack.i.l.bf16 %v6205_v12  ;;  %v4967_v49 = vpop.permute.xlu1 %4966  ;;  %4472 = vmatprep.subr.bf16.mxu0 %v4471_v44  ;;  %v4503_v53 = vpack.c.bf16 %v1367_v41, %v1361_v26  ;;  %v5062_v4 = vpop.permute.xlu0 %5061 }
 0x3bd   :  { %4500 = vmatprep.subr.bf16.mxu1 %v4499_v13  ;;  %v5039_v50 = vunpack.i.h.bf16 %v6205_v12  ;;  %v4501_v48 = vpack.c.bf16 %v1330_v33, %v1324_v40  ;;  %v1537_v20 = vsel %vm364_vm5, %v5043_v51, %v5044_v42  ;;  %v5054_v37 = vunpack.i.h.bf16 %v6321_v10 }
 0x3be   :  { %v1444_v21 = vsel %vm317_vm4, %v7253_v11, %v5033_v62  ;;  %v5053_v36 = vunpack.i.l.bf16 %v6321_v10  ;;  %v7254_v34 = vunpack.i.h.bf16 %v6009_v18  ;;  %v4475_v22 = vpack.c.bf16 %v1537_v20, %v1531_v59 }
 0x3bf   :  { %v4473_v46 = vpack.c.bf16 %v1444_v21, %v1438_v45  ;;  %v4969_v23 = vunpack.i.h.bf16 %v4967_v49  ;;  %v4968_v43 = vunpack.i.l.bf16 %v4967_v49  ;;  %v4505_v12 = vpack.c.bf16 %v1366_v55, %v1360_v29 }
 0x3c0   :  { %v1530_v62 = vsel %vm364_vm5, %v7254_v34, %v4963_v54  ;;  %4502 = vmatpush1.bf16.msra.mxu1 %v4501_v48  ;;  %v1441_v61 = vsel %vm317_vm4, %v4958_v56, %v4959_v3  ;;  %v1446_v52 = vsel %vm317_vm4, %v5034_v5, %v5038_v14  ;;  %v7255_v38 = vunpack.i.h.bf16 %v6149_v1  ;;  %v4972_v25 = vpop.permute.xlu1 %4971  ;;  %v5067_v49 = vpop.permute.xlu0 %5066 }
 0x3c1   :  { %4474 = vmatpush1.bf16.msra.mxu0 %v4473_v46  ;;  %v5049_v18 = vunpack.i.h.bf16 %v6271_v2  ;;  %v5048_v9 = vunpack.i.l.bf16 %v6271_v2  ;;  %4504 = vmatprep.subr.bf16.mxu1 %v4503_v53  ;;  %v4974_v30 = vunpack.i.h.bf16 %v4972_v25  ;;  %v4973_v15 = vunpack.i.l.bf16 %v4972_v25 }
 0x3c2   :  { %v1536_v8 = vsel %vm364_vm5, %v7255_v38, %v5043_v51  ;;  %4476 = vmatprep.subr.bf16.mxu0 %v4475_v22  ;;  %v1447_v26 = vsel %vm317_vm4, %v5038_v14, %v5039_v50  ;;  %v7256_v28 = vunpack.i.h.bf16 %v6033_v7  ;;  %v1440_v1 = vsel %vm317_vm4, %v4954_v19, %v4958_v56 }
 0x3c3   :  { %v4477_v54 = vpack.c.bf16 %v1536_v8, %v1530_v62  ;;  %v4507_v51 = vpack.c.bf16 %v1447_v26, %v1441_v61  ;;  %v1629_v2 = vsel %vm411_vm6, %v5053_v36, %v5054_v37  ;;  %v7257_v41 = vunpack.i.h.bf16 %v6023_v35 }
 0x3c4   :  { %v1628_v5 = vsel %vm411_vm6, %v7256_v28, %v5053_v36  ;;  %4506 = vmatpush1.bf16.msra.mxu1 %v4505_v12  ;;  %v1623_v17 = vsel %vm411_vm6, %v4973_v15, %v4974_v30  ;;  %v1533_v7 = vsel %vm364_vm5, %v4968_v43, %v4969_v23  ;;  %v5059_v45 = vunpack.i.h.bf16 %v6349_v6  ;;  %v4977_v39 = vpop.permute.xlu1 %4976 }
 0x3c5   :  { %v1622_v40 = vsel %vm411_vm6, %v7257_v41, %v4973_v15  ;;  %4478 = vmatpush1.bf16.msra.mxu0 %v4477_v54  ;;  %4508 = vmatprep.subr.bf16.mxu1 %v4507_v51  ;;  %v4479_v19 = vpack.c.bf16 %v1629_v2, %v1623_v17  ;;  %v1539_v13 = vsel %vm364_vm5, %v5048_v9, %v5049_v18  ;;  %v5058_v3 = vunpack.i.l.bf16 %v6349_v6  ;;  %v7259_v2 = vld [vmem:[#allocation10_spill] sm:$0xff] }
 0x3c6   :  { %v4481_v44 = vpack.c.bf16 %v1628_v5, %v1622_v40  ;;  %v4979_v56 = vunpack.i.h.bf16 %v4977_v39  ;;  %v4978_v35 = vunpack.i.l.bf16 %v4977_v39  ;;  %v4509_v59 = vpack.c.bf16 %v1446_v52, %v1440_v1 }
 0x3c7   :  { %v5063_v33 = vunpack.i.l.bf16 %v5062_v4  ;;  %v1532_v11 = vsel %vm364_vm5, %v4964_v47, %v4968_v43  ;;  %4480 = vmatprep.subr.bf16.mxu0 %v4479_v19  ;;  %v4511_v21 = vpack.c.bf16 %v1539_v13, %v1533_v7  ;;  %v5064_v14 = vunpack.i.h.bf16 %v5062_v4  ;;  %v7260_v19 = vld [vmem:[#allocation11_spill] sm:$0xff] }
 0x3c8   :  { %4510 = vmatpush1.bf16.msra.mxu1 %v4509_v59  ;;  %v1625_v53 = vsel %vm411_vm6, %v4978_v35, %v4979_v56  ;;  %v1538_v6 = vsel %vm364_vm5, %v5044_v42, %v5048_v9  ;;  %v4982_v29 = vpop.permute.xlu1 %4981  ;;  %v1631_v16 = vsel %vm411_vm6, %v5058_v3, %v5059_v45  ;;  %v5068_v48 = vunpack.i.l.bf16 %v5067_v49 }
 0x3c9   :  { %4482 = vmatpush1.bf16.msra.mxu0 %v4481_v44  ;;  %4512 = vmatprep.subr.bf16.mxu1 %v4511_v21  ;;  %v4984_v55 = vunpack.i.h.bf16 %v4982_v29  ;;  %v4983_v50 = vunpack.i.l.bf16 %v4982_v29  ;;  %v4513_v46 = vpack.c.bf16 %v1538_v6, %v1532_v11  ;;  %v1720_v47 = vsel %vm458_vm7, %v4944_v32, %v5063_v33 }
 0x3ca   :  { %v1624_v20 = vsel %vm411_vm6, %v4974_v30, %v4978_v35  ;;  %v4515_v36 = vpack.c.bf16 %v1631_v16, %v1625_v53  ;;  %v5069_v34 = vunpack.i.h.bf16 %v5067_v49  ;;  %v7258_v24 = vunpack.i.h.bf16 %v6017_v31  ;;  %v2075_v53 = vld [vmem:[%s7202_s5] sm:$0xff] }
 0x3cb   :  { %v1715_v62 = vsel %vm458_vm7, %v4983_v50, %v4984_v55  ;;  %v1721_v22 = vsel %vm458_vm7, %v5063_v33, %v5064_v14  ;;  %v1630_v60 = vsel %vm411_vm6, %v5054_v37, %v5058_v3  ;;  %v1722_v31 = vsel %vm458_vm7, %v5064_v14, %v5068_v48  ;;  %v7261_v3 = vld [vmem:[#allocation12_spill] sm:$0xff] }
 0x3cc   :  { %v1714_v42 = vsel %vm458_vm7, %v7258_v24, %v4983_v50  ;;  %4514 = vmatpush1.bf16.msra.mxu1 %v4513_v46  ;;  %v4987_v23 = vpop.permute.xlu1 %4986  ;;  %v4483_v32 = vpack.c.bf16 %v1721_v22, %v1715_v62  ;;  %v4517_v52 = vpack.c.bf16 %v1630_v60, %v1624_v20  ;;  %v1723_v10 = vsel %vm458_vm7, %v5068_v48, %v5069_v34 }
 0x3cd   :  { %4516 = vmatprep.subr.bf16.mxu1 %v4515_v36  ;;  %v4485_v43 = vpack.c.bf16 %v1720_v47, %v1714_v42  ;;  %v4989_v12 = vunpack.i.h.bf16 %v4987_v23  ;;  %v4988_v61 = vunpack.i.l.bf16 %v4987_v23 }
 0x3ce   :  { %4484 = vmatprep.subr.bf16.mxu0 %v4483_v32 }
 0x3cf   :  { %v1716_v38 = vsel %vm458_vm7, %v4984_v55, %v4988_v61  ;;  %4486 = vmatpush1.bf16.msra.mxu0 %v4485_v43  ;;  %v1717_v8 = vsel %vm458_vm7, %v4988_v61, %v4989_v12 }
 0x3d0   :  { %4518 = vmatpush1.bf16.msra.mxu1 %v4517_v52  ;;  %v4519_v18 = vpack.c.bf16 %v1723_v10, %v1717_v8  ;;  %v4521_v37 = vpack.c.bf16 %v1722_v31, %v1716_v38 }
 0x3d2   :  { %1998 = vmatmul.mubr.f32.vlgmr.msra.gmra.mrb[8].mxu0 %v6276_v63  ;;  %4520 = vmatprep.subr.bf16.mxu1 %v4519_v18 }
 0x3d3   :  { %2670 = vmatprep.mubr.f32.mxu0 %v5969_v0 }
 0x3d4   :  { %4522 = vmatpush1.bf16.msra.mxu1 %v4521_v37 }
 0x3d7   :  { %2069 = vmatmul.mubr.f32.vlgmr.msra.gmra.mrb[6].mxu1 %v6276_v63 }
 0x3d8   :  { %2812 = vmatprep.mubr.f32.mxu1 %v5969_v0 }
 0x485   :  { %v1928_v9 = vpop.f32.mrb[4].mxu1 }
 0x486   :  { %v2076_v25 = vmul.f32 %v1928_v9, %v5810_v57  ;;  %v1930_v4 = vpop.f32.mrb[5].mxu1 }
 0x487   :  { %v2077_v30 = vmul.f32 %v1930_v4, %v5812_v58 }
 0x488   :  { %v2089_v15 = vmul.f32 %v2076_v25, %v2076_v25 }
 0x489   :  { %v2082_v54 = vadd.f32 %v2077_v30, %v2076_v25  ;;  %v2090_v26 = vmul.f32 %v2077_v30, %v2077_v30 }
 0x48b   :  { %v2095_v28 = vadd.f32 %v2090_v26, %v2089_v15 }
 0x4a5   :  { %v1999_v5 = vpop.f32.mrb[8].mxu0 }
 0x4a6   :  { %v2078_v1 = vmul.f32 %v1999_v5, %v5830_v27  ;;  %v2001_v51 = vpop.f32.mrb[9].mxu0 }
 0x4a7   :  { %v2079_v41 = vmul.f32 %v2001_v51, %v7259_v2 }
 0x4a8   :  { %v2083_v40 = vadd.f32 %v2082_v54, %v2078_v1  ;;  %v2091_v63 = vmul.f32 %v2078_v1, %v2078_v1 }
 0x4a9   :  { %v2092_v17 = vmul.f32 %v2079_v41, %v2079_v41 }
 0x4aa   :  { %v6431_v7 = vpop.f32.mrb[6].mxu1  ;;  %v2096_v45 = vadd.f32 %v2095_v28, %v2091_v63  ;;  %v2084_v39 = vadd.f32 %v2083_v40, %v2079_v41 }
 0x4ab   :  { %v2080_v44 = vmul.f32 %v6431_v7, %v7260_v19  ;;  %v6435_v13 = vpop.f32.mrb[7].mxu1 }
 0x4ac   :  { %v2081_v56 = vmul.f32 %v6435_v13, %v7261_v3  ;;  %v2097_v33 = vadd.f32 %v2096_v45, %v2092_v17 }
 0x4ad   :  { %v2085_v35 = vadd.f32 %v2084_v39, %v2080_v44  ;;  %v2093_v59 = vmul.f32 %v2080_v44, %v2080_v44 }
 0x4ae   :  { %v2094_v11 = vmul.f32 %v2081_v56, %v2081_v56 }
 0x4af   :  { %v2086_v21 = vadd.f32 %v2085_v35, %v2081_v56  ;;  %v2098_v14 = vadd.f32 %v2097_v33, %v2093_v59 }
 0x4b1   :  { %2087 = vadd.xlane.f32.xlu1 %v2086_v21  ;;  %v2099_v49 = vadd.f32 %v2098_v14, %v2094_v11  ;;  %v6513_v21 = vld [vmem:[#allocation2] sm:$0xff] }
 0x4b3   :  { %2100 = vadd.xlane.f32.xlu0 %v2099_v49 }
 0x4c2   :  { %2129 = vperm.xlu1 %4789, %v2075_v53  }
 0x4c6   :  { %2390 = vrot.lane.b32.xlu1 %v5969_v0, %s5468_s23 }
 0x53e   :  { %v2088_v6 = vpop.xlane.xlu1 %2087 }
 0x53f   :  { %v2102_v29 = vmul.f32 0.001953125, %v2088_v6 }
 0x540   :  { %v2101_v55 = vpop.xlane.xlu0 %2100 }
 0x541   :  { %v2103_v50 = vmul.f32 0.001953125, %v2101_v55  ;;  %v2104_v46 = vmul.f32 %v2102_v29, %v2102_v29  ;;  %v2110_v16 = vsub.f32 %v1928_v9, %v2102_v29  ;;  %v2111_v47 = vsub.f32 %v1930_v4, %v2102_v29 }
 0x542   :  { %v2112_v48 = vsub.f32 %v1999_v5, %v2102_v29  ;;  %v2113_v20 = vsub.f32 %v2001_v51, %v2102_v29  ;;  %v2114_v36 = vsub.f32 %v6431_v7, %v2102_v29  ;;  %v2115_v34 = vsub.f32 %v6435_v13, %v2102_v29  ;;  %v2130_v61 = vpop.permute.xlu1 %2129 }
 0x543   :  { %v2105_v24 = vsub.f32 %v2103_v50, %v2104_v46 }
 0x545   :  { %v2106_v42 = vmax.f32 %v2105_v24, 0.0 }
 0x546   :  { %v6527_v49 = vpop.permute.xlu1 %2390 }
 0x547   :  { %v2107_v62 = vadd.f32 1e-05, %v2106_v42 }
 0x549   :  { %5393 = vrsqrt.f32 %v2107_v62 }
 0x553   :  { %v5394_v22 = vpop.eup %5393 }
 0x554   :  { %v2109_v60 = vmul.f32 %v5394_v22, %v2075_v53 }
 0x556   :  { %2118 = vperm.xlu0 %4786, %v2109_v60  }
 0x5d5   :  { %v2119_v23 = vpop.permute.xlu0 %2118 }
 0x5d6   :  { %v2121_v32 = vmul.f32 %v2119_v23, %v2110_v16  ;;  %v2122_v43 = vmul.f32 %v2119_v23, %v2111_v47  ;;  %v2123_v12 = vmul.f32 %v2119_v23, %v2112_v48  ;;  %v2124_v25 = vmul.f32 %v2119_v23, %v2113_v20 }
 0x5d7   :  { %v2125_v51 = vmul.f32 %v2119_v23, %v2114_v36  ;;  %v2126_v45 = vmul.f32 %v2119_v23, %v2115_v34 }
 0x5d8   :  { %v2132_v52 = vadd.f32 %v2130_v61, %v2121_v32  ;;  %v2133_v31 = vadd.f32 %v2130_v61, %v2122_v43  ;;  %v2134_v38 = vadd.f32 %v2130_v61, %v2123_v12  ;;  %v2135_v28 = vadd.f32 %v2130_v61, %v2124_v25 }
 0x5d9   :  { %v2136_v63 = vadd.f32 %v2130_v61, %v2125_v51  ;;  %v2137_v13 = vadd.f32 %v2130_v61, %v2126_v45 }
 0x5da   :  { %vm2138_vm15 = vcmp.ge.f32.partialorder %v2132_v52, 0.0  ;;  %vm2139_vm9 = vcmp.ge.f32.partialorder %v2133_v31, 0.0  ;;  %vm2140_vm10 = vcmp.ge.f32.partialorder %v2134_v38, 0.0  ;;  %v2144_v8 = vmul.f32 0.2, %v2132_v52 }
 0x5db   :  { %v2145_v10 = vmul.f32 0.2, %v2133_v31  ;;  %v2146_v18 = vmul.f32 0.2, %v2134_v38  ;;  %v2147_v1 = vmul.f32 0.2, %v2135_v28 }
 0x5dc   :  { %v2150_v37 = vsel %vm2138_vm15, %v2132_v52, %v2144_v8  ;;  %vm2141_vm11 = vcmp.ge.f32.partialorder %v2135_v28, 0.0  ;;  %v2148_v7 = vmul.f32 0.2, %v2136_v63  ;;  %vm2142_vm12 = vcmp.ge.f32.partialorder %v2136_v63, 0.0 }
 0x5dd   :  { %v2151_v9 = vsel %vm2139_vm9, %v2133_v31, %v2145_v10  ;;  %v2152_v4 = vsel %vm2140_vm10, %v2134_v38, %v2146_v18  ;;  %v6447_v30 = vmul.f32 %v2150_v37, %v5810_v57  ;;  %v2153_v41 = vsel %vm2141_vm11, %v2135_v28, %v2147_v1 }
 0x5de   :  { %v6450_v15 = vmul.f32 %v2151_v9, %v5812_v58  ;;  %v6453_v54 = vmul.f32 %v2152_v4, %v5830_v27  ;;  %v6466_v40 = vmul.f32 %v2153_v41, %v7259_v2  ;;  %v2154_v39 = vsel %vm2142_vm12, %v2136_v63, %v2148_v7 }
 0x5df   :  { %v6479_v44 = vmul.f32 %v2154_v39, %v7260_v19  ;;  %v2149_v35 = vmul.f32 0.2, %v2137_v13  ;;  %vm2143_vm13 = vcmp.ge.f32.partialorder %v2137_v13, 0.0 }
 0x5e0   :  { %v5075_v26 = vpack.i.bf16 %v6450_v15, %v6447_v30  ;;  %v5085_v5 = vpack.i.bf16 %v6453_v54, %v5969_v0  ;;  %v5115_v0 = vpack.i.bf16 %v6466_v40, %v6447_v30  ;;  %v5110_v17 = vpack.i.bf16 %v6453_v54, %v6450_v15 }
 0x5e1   :  { %v5135_v56 = vpack.i.bf16 %v6479_v44, %v6466_v40  ;;  %v2155_v59 = vsel %vm2143_vm13, %v2137_v13, %v2149_v35 }
 0x5e2   :  { %5076 = vrot.lane.b32.xlu0 %v5075_v26, %s5466_s21  ;;  %5071 = vrot.lane.b32.xlu1 %v5075_v26, %s5465_s0  ;;  %v6494_v33 = vmul.f32 %v2155_v59, %v7261_v3 }
 0x5e4   :  { %v5150_v11 = vpack.i.bf16 %v6494_v33, %v6479_v44  ;;  %v5165_v14 = vpack.i.bf16 %v6513_v21, %v6494_v33 }
 0x5e6   :  { %5086 = vrot.lane.b32.xlu0 %v5085_v5, %s5466_s21  ;;  %5081 = vrot.lane.b32.xlu1 %v5085_v5, %s5465_s0 }
 0x5ea   :  { %5096 = vrot.lane.b32.xlu0 %v5075_v26, %s5467_s22  ;;  %5091 = vrot.lane.b32.xlu1 %v5075_v26, %s5464_s20 }
 0x5ee   :  { %5106 = vrot.lane.b32.xlu0 %v5085_v5, %s5467_s22  ;;  %5101 = vrot.lane.b32.xlu1 %v5085_v5, %s5464_s20 }
 0x5f2   :  { %5116 = vrot.lane.b32.xlu0 %v5115_v0, %s5468_s23  ;;  %5111 = vrot.lane.b32.xlu1 %v5110_v17, %s5468_s23 }
 0x5f6   :  { %5126 = vrot.lane.b32.xlu0 %v5110_v17, %s5470_s25  ;;  %5121 = vrot.lane.b32.xlu1 %v5110_v17, %s5469_s24 }
 0x5fa   :  { %2470 = vrot.lane.b32.xlu0 %v6447_v30, %s5470_s25  ;;  %2424 = vrot.lane.b32.xlu1 %v6447_v30, %s5469_s24 }
 0x5fe   :  { %5136 = vrot.lane.b32.xlu0 %v5135_v56, %s5466_s21  ;;  %5131 = vrot.lane.b32.xlu1 %v5135_v56, %s5465_s0 }
 0x602   :  { %2520 = vrot.lane.b32.xlu0 %v6453_v54, %s5471_s26  ;;  %2518 = vrot.lane.b32.xlu1 %v6450_v15, %s5471_s26 }
 0x606   :  { %2194 = vrot.lane.b32.xlu0 %v6494_v33, %s5465_s0  ;;  %2516 = vrot.lane.b32.xlu1 %v6447_v30, %s5471_s26 }
 0x60a   :  { %5141 = vrot.lane.b32.xlu0 %v5135_v56, %s5464_s20  ;;  %2240 = vrot.lane.b32.xlu1 %v6494_v33, %s5466_s21 }
 0x60e   :  { %2286 = vrot.lane.b32.xlu0 %v6494_v33, %s5464_s20  ;;  %5146 = vrot.lane.b32.xlu1 %v5135_v56, %s5467_s22 }
 0x612   :  { %5151 = vrot.lane.b32.xlu0 %v5150_v11, %s5468_s23  ;;  %2332 = vrot.lane.b32.xlu1 %v6494_v33, %s5467_s22 }
 0x616   :  { %5156 = vrot.lane.b32.xlu0 %v5135_v56, %s5469_s24  ;;  %5161 = vrot.lane.b32.xlu1 %v5135_v56, %s5470_s25 }
 0x61a   :  { %5166 = vrot.lane.b32.xlu0 %v5165_v14, %s5469_s24  ;;  %5171 = vrot.lane.b32.xlu1 %v5165_v14, %s5470_s25 }
 0x61e   :  { %2522 = vrot.lane.b32.xlu0 %v6466_v40, %s5471_s26  ;;  %2524 = vrot.lane.b32.xlu1 %v6479_v44, %s5471_s26 }
 0x622   :  { %2526 = vrot.lane.b32.xlu0 %v6494_v33, %s5471_s26  ;;  %2528 = vrot.lane.b32.xlu1 %v6513_v21, %s5471_s26 }
 0x654   :  { %v6529_v53 = vpop.permute.xlu0 %5076  ;;  %v6531_v6 = vpop.permute.xlu1 %5071 }
 0x655   :  { %v5079_v29 = vunpack.i.h.bf16 %v6529_v53  ;;  %v5078_v55 = vunpack.i.l.bf16 %v6529_v53  ;;  %v5074_v50 = vunpack.i.h.bf16 %v6531_v6  ;;  %v5073_v46 = vunpack.i.l.bf16 %v6531_v6 }
 0x657   :  { %v2197_v16 = vsel %vm117_vm0, %v5073_v46, %v5074_v50  ;;  %v2243_v47 = vsel %vm164_vm1, %v5078_v55, %v5079_v29 }
 0x658   :  { %v6543_v48 = vpop.permute.xlu0 %5086  ;;  %v6545_v20 = vpop.permute.xlu1 %5081  ;;  %v4523_v36 = vpack.c.bf16 %v2243_v47, %v2197_v16 }
 0x659   :  { %v5088_v34 = vunpack.i.l.bf16 %v6543_v48  ;;  %v5083_v24 = vunpack.i.l.bf16 %v6545_v20 }
 0x65a   :  { %4524 = vmatprep.subr.bf16.mxu0 %v4523_v36 }
 0x65b   :  { %v2242_v42 = vsel %vm164_vm1, %v5088_v34, %v5078_v55  ;;  %v2196_v62 = vsel %vm117_vm0, %v5083_v24, %v5073_v46 }
 0x65c   :  { %v6551_v22 = vpop.permute.xlu0 %5096  ;;  %v6553_v60 = vpop.permute.xlu1 %5091  ;;  %v4525_v23 = vpack.c.bf16 %v2242_v42, %v2196_v62  ;;  %v5089_v42 = vunpack.i.h.bf16 %v6543_v48  ;;  %v5084_v62 = vunpack.i.h.bf16 %v6545_v20 }
 0x65d   :  { %v5099_v32 = vunpack.i.h.bf16 %v6551_v22  ;;  %v5098_v43 = vunpack.i.l.bf16 %v6551_v22  ;;  %v5094_v12 = vunpack.i.h.bf16 %v6553_v60  ;;  %v5093_v61 = vunpack.i.l.bf16 %v6553_v60 }
 0x65e   :  { %4526 = vmatpush1.bf16.msra.mxu0 %v4525_v23  ;;  %v2198_v48 = vsel %vm117_vm0, %v5074_v50, %v5084_v62 }
 0x65f   :  { %v2289_v52 = vsel %vm211_vm2, %v5093_v61, %v5094_v12  ;;  %v2335_v31 = vsel %vm258_vm3, %v5098_v43, %v5099_v32 }
 0x660   :  { %v6565_v38 = vpop.permute.xlu0 %5106  ;;  %v6567_v8 = vpop.permute.xlu1 %5101  ;;  %v4527_v10 = vpack.c.bf16 %v2335_v31, %v2289_v52 }
 0x661   :  { %v5108_v18 = vunpack.i.l.bf16 %v6565_v38  ;;  %v5103_v37 = vunpack.i.l.bf16 %v6567_v8 }
 0x662   :  { %4528 = vmatprep.subr.bf16.mxu0 %v4527_v10  ;;  %v2244_v10 = vsel %vm164_vm1, %v5079_v29, %v5089_v42 }
 0x663   :  { %v2334_v9 = vsel %vm258_vm3, %v5108_v18, %v5098_v43  ;;  %v2288_v25 = vsel %vm211_vm2, %v5103_v37, %v5093_v61  ;;  %v4541_v53 = vpack.c.bf16 %v2244_v10, %v2198_v48 }
 0x664   :  { %v6573_v4 = vpop.permute.xlu0 %5116  ;;  %v6575_v26 = vpop.permute.xlu1 %5111  ;;  %v4529_v28 = vpack.c.bf16 %v2334_v9, %v2288_v25  ;;  %v6619_v25 = vld [vmem:[%s7203_s6] sm:$0xff] }
 0x665   :  { %v5118_v5 = vunpack.i.l.bf16 %v6573_v4  ;;  %v5114_v1 = vunpack.i.h.bf16 %v6575_v26  ;;  %v5113_v51 = vunpack.i.l.bf16 %v6575_v26 }
 0x666   :  { %4530 = vmatpush1.bf16.msra.mxu0 %v4529_v28 }
 0x667   :  { %v2392_v41 = vsel %vm317_vm4, %v5118_v5, %v5113_v51  ;;  %v2393_v63 = vsel %vm317_vm4, %v5113_v51, %v5114_v1 }
 0x668   :  { %v6584_v0 = vpop.permute.xlu0 %5126  ;;  %v6586_v17 = vpop.permute.xlu1 %5121  ;;  %v4531_v7 = vpack.c.bf16 %v2393_v63, %v6450_v15  ;;  %v4533_v45 = vpack.c.bf16 %v2392_v41, %v6447_v30  ;;  %v5109_v41 = vunpack.i.h.bf16 %v6565_v38  ;;  %v5104_v63 = vunpack.i.h.bf16 %v6567_v8 }
 0x669   :  { %v5129_v39 = vunpack.i.h.bf16 %v6584_v0  ;;  %v5128_v13 = vunpack.i.l.bf16 %v6584_v0  ;;  %v5124_v56 = vunpack.i.h.bf16 %v6586_v17  ;;  %v5123_v35 = vunpack.i.l.bf16 %v6586_v17 }
 0x66a   :  { %4532 = vmatprep.subr.bf16.mxu0 %v4531_v7  ;;  %v2290_v38 = vsel %vm211_vm2, %v5094_v12, %v5104_v63 }
 0x66b   :  { %4534 = vmatpush1.bf16.msra.mxu0 %v4533_v45  ;;  %v2439_v59 = vsel %vm364_vm5, %v5123_v35, %v5124_v56  ;;  %v2485_v15 = vsel %vm411_vm6, %v5128_v13, %v5129_v39 }
 0x66c   :  { %v2471_v11 = vpop.permute.xlu0 %2470  ;;  %v2425_v30 = vpop.permute.xlu1 %2424  ;;  %v4535_v14 = vpack.c.bf16 %v2485_v15, %v2439_v59  ;;  %v5119_v15 = vunpack.i.h.bf16 %v6573_v4 }
 0x66d   :  { %v2484_v55 = vsel %vm411_vm6, %v2471_v11, %v5128_v13  ;;  %v2438_v46 = vsel %vm364_vm5, %v2425_v30, %v5123_v35 }
 0x66e   :  { %v4537_v16 = vpack.c.bf16 %v2484_v55, %v2438_v46  ;;  %4536 = vmatprep.subr.bf16.mxu0 %v4535_v14  ;;  %v2336_v14 = vsel %vm258_vm3, %v5099_v32, %v5109_v41  ;;  %v2394_v4 = vsel %vm317_vm4, %v5114_v1, %v5119_v15 }
 0x66f   :  { %v4545_v60 = vpack.c.bf16 %v2336_v14, %v2290_v38 }
 0x670   :  { %v5137_v47 = vpop.permute.xlu0 %5136  ;;  %v5132_v36 = vpop.permute.xlu1 %5131  ;;  %4538 = vmatpush1.bf16.msra.mxu0 %v4537_v16 }
 0x671   :  { %v5138_v34 = vunpack.i.l.bf16 %v5137_v47  ;;  %v5133_v24 = vunpack.i.l.bf16 %v5132_v36  ;;  %v5139_v20 = vunpack.i.h.bf16 %v5137_v47  ;;  %v5134_v18 = vunpack.i.h.bf16 %v5132_v36 }
 0x673   :  { %v2199_v52 = vsel %vm117_vm0, %v5084_v62, %v5133_v24  ;;  %v2245_v31 = vsel %vm164_vm1, %v5089_v42, %v5138_v34  ;;  %v2246_v6 = vsel %vm164_vm1, %v5138_v34, %v5139_v20  ;;  %v2200_v29 = vsel %vm117_vm0, %v5133_v24, %v5134_v18 }
 0x674   :  { %v6604_v23 = vpop.permute.xlu0 %2520  ;;  %v2519_v43 = vpop.permute.xlu1 %2518  ;;  %v4539_v5 = vpack.c.bf16 %v2245_v31, %v2199_v52  ;;  %v4557_v35 = vpack.c.bf16 %v2246_v6, %v2200_v29 }
 0x675   :  { %v2531_v61 = vsel %vm458_vm7, %v2519_v43, %v6604_v23 }
 0x676   :  { %2622 = vmatprep.subr.mxu0 %v2531_v61 }
 0x678   :  { %v2195_v37 = vpop.permute.xlu0 %2194  ;;  %v2517_v9 = vpop.permute.xlu1 %2516 }
 0x679   :  { %v2530_v28 = vsel %vm458_vm7, %v2517_v9, %v2519_v43  ;;  %v2201_v7 = vsel %vm117_vm0, %v5134_v18, %v2195_v37  ;;  %v4549_v37 = vpack.c.bf16 %v2394_v4, %v6453_v54 }
 0x67a   :  { %2623 = vmatpush1.msra.mxu0 %v2530_v28 }
 0x67b   :  { %4540 = vmatprep.subr.bf16.mxu0 %v4539_v5  ;;  %4358 = vmatmul.mubr.msk.f32.vlgmr.msra.gmra.mrb[10].mxu0 %vm533_vm8, %v6619_v25 }
 0x67c   :  { %v5142_v50 = vpop.permute.xlu0 %5141  ;;  %v2241_v51 = vpop.permute.xlu1 %2240  ;;  %4542 = vmatpush1.bf16.msra.mxu0 %v4541_v53  ;;  %2741 = vmatprep.mubr.f32.mxu0 %v6513_v21 }
 0x67d   :  { %v2247_v45 = vsel %vm164_vm1, %v5139_v20, %v2241_v51  ;;  %v5143_v59 = vunpack.i.l.bf16 %v5142_v50  ;;  %v5144_v46 = vunpack.i.h.bf16 %v5142_v50 }
 0x67e   :  { %v4555_v13 = vpack.c.bf16 %v2247_v45, %v2201_v7 }
 0x67f   :  { %v2291_v16 = vsel %vm211_vm2, %v5104_v63, %v5143_v59  ;;  %v2292_v43 = vsel %vm211_vm2, %v5143_v59, %v5144_v46 }
 0x680   :  { %v2287_v11 = vpop.permute.xlu0 %2286  ;;  %v5147_v30 = vpop.permute.xlu1 %5146  ;;  %4556 = vmatprep.subr.bf16.mxu1 %v4555_v13 }
 0x681   :  { %v5149_v8 = vunpack.i.h.bf16 %v5147_v30  ;;  %v5148_v55 = vunpack.i.l.bf16 %v5147_v30  ;;  %4558 = vmatpush1.bf16.msra.mxu1 %v4557_v35  ;;  %v2293_v12 = vsel %vm211_vm2, %v5144_v46, %v2287_v11 }
 0x683   :  { %v2337_v47 = vsel %vm258_vm3, %v5109_v41, %v5148_v55  ;;  %v2338_v22 = vsel %vm258_vm3, %v5148_v55, %v5149_v8 }
 0x684   :  { %v5152_v36 = vpop.permute.xlu0 %5151  ;;  %v2333_v32 = vpop.permute.xlu1 %2332  ;;  %v4543_v34 = vpack.c.bf16 %v2337_v47, %v2291_v16  ;;  %v4561_v52 = vpack.c.bf16 %v2338_v22, %v2292_v43 }
 0x685   :  { %v5154_v24 = vunpack.i.h.bf16 %v5152_v36  ;;  %v5153_v42 = vunpack.i.l.bf16 %v5152_v36  ;;  %v2339_v62 = vsel %vm258_vm3, %v5149_v8, %v2333_v32 }
 0x686   :  { %v4559_v61 = vpack.c.bf16 %v2339_v62, %v2293_v12  ;;  %4544 = vmatprep.subr.bf16.mxu0 %v4543_v34 }
 0x687   :  { %v2396_v26 = vsel %vm317_vm4, %v5153_v42, %v5154_v24  ;;  %4546 = vmatpush1.bf16.msra.mxu0 %v4545_v60  ;;  %v2395_v1 = vsel %vm317_vm4, %v5119_v15, %v5153_v42  ;;  %v2397_v31 = vsel %vm317_vm4, %v5154_v24, %v6527_v49 }
 0x688   :  { %v5157_v10 = vpop.permute.xlu0 %5156  ;;  %v5162_v48 = vpop.permute.xlu1 %5161  ;;  %4560 = vmatprep.subr.bf16.mxu1 %v4559_v61  ;;  %v4547_v20 = vpack.c.bf16 %v2395_v1, %v6466_v40  ;;  %v4563_v18 = vpack.c.bf16 %v2397_v31, %v6494_v33  ;;  %v4565_v6 = vpack.c.bf16 %v2396_v26, %v6479_v44 }
 0x689   :  { %v5159_v9 = vunpack.i.h.bf16 %v5157_v10  ;;  %v5158_v28 = vunpack.i.l.bf16 %v5157_v10  ;;  %v5164_v5 = vunpack.i.h.bf16 %v5162_v48  ;;  %v5163_v53 = vunpack.i.l.bf16 %v5162_v48  ;;  %4562 = vmatpush1.bf16.msra.mxu1 %v4561_v52 }
 0x68a   :  { %4548 = vmatprep.subr.bf16.mxu0 %v4547_v20  ;;  %4564 = vmatprep.subr.bf16.mxu1 %v4563_v18 }
 0x68b   :  { %v2440_v49 = vsel %vm364_vm5, %v5124_v56, %v5158_v28  ;;  %v2486_v40 = vsel %vm411_vm6, %v5129_v39, %v5163_v53  ;;  %4550 = vmatpush1.bf16.msra.mxu0 %v4549_v37  ;;  %v2441_v54 = vsel %vm364_vm5, %v5158_v28, %v5159_v9  ;;  %v2487_v33 = vsel %vm411_vm6, %v5163_v53, %v5164_v5 }
 0x68c   :  { %v4553_v29 = vpack.c.bf16 %v2486_v40, %v2440_v49  ;;  %v5167_v50 = vpop.permute.xlu0 %5166  ;;  %v5172_v51 = vpop.permute.xlu1 %5171  ;;  %v4551_v41 = vpack.c.bf16 %v2487_v33, %v2441_v54 }
 0x68d   :  { %v5169_v44 = vunpack.i.h.bf16 %v5167_v50  ;;  %v5168_v63 = vunpack.i.l.bf16 %v5167_v50  ;;  %v5174_v7 = vunpack.i.h.bf16 %v5172_v51  ;;  %v5173_v45 = vunpack.i.l.bf16 %v5172_v51  ;;  %4566 = vmatpush1.bf16.msra.mxu1 %v4565_v6 }
 0x68e   :  { %4552 = vmatprep.subr.bf16.mxu0 %v4551_v41 }
 0x68f   :  { %v2442_v17 = vsel %vm364_vm5, %v5159_v9, %v5168_v63  ;;  %v2488_v0 = vsel %vm411_vm6, %v5164_v5, %v5173_v45  ;;  %4554 = vmatpush1.bf16.msra.mxu0 %v4553_v29  ;;  %v2443_v39 = vsel %vm364_vm5, %v5168_v63, %v5169_v44  ;;  %v2489_v56 = vsel %vm411_vm6, %v5173_v45, %v5174_v7  ;;  %v2819_v5 = vld [vmem:[%s7204_s7] sm:$0xff] }
 0x690   :  { %v4569_v13 = vpack.c.bf16 %v2488_v0, %v2442_v17  ;;  %v2523_v35 = vpop.permute.xlu0 %2522  ;;  %v2525_v59 = vpop.permute.xlu1 %2524  ;;  %v4567_v15 = vpack.c.bf16 %v2489_v56, %v2443_v39 }
 0x691   :  { %v2532_v11 = vsel %vm458_vm7, %v6604_v23, %v2523_v35  ;;  %v2533_v30 = vsel %vm458_vm7, %v2523_v35, %v2525_v59 }
 0x692   :  { %2693 = vmatprep.subr.mxu0 %v2533_v30  ;;  %4568 = vmatprep.subr.bf16.mxu1 %v4567_v15 }
 0x693   :  { %2694 = vmatpush1.msra.mxu0 %v2532_v11  ;;  %4570 = vmatpush1.bf16.msra.mxu1 %v4569_v13 }
 0x694   :  { %v2527_v14 = vpop.permute.xlu0 %2526  ;;  %v2529_v38 = vpop.permute.xlu1 %2528  ;;  %4359 = vmatmul.mubr.msk.f32.vlgmr.msra.gmra.mrb[12].mxu0 %vm533_vm8, %v6619_v25 }
 0x695   :  { %v2534_v8 = vsel %vm458_vm7, %v2525_v59, %v2527_v14  ;;  %v2535_v55 = vsel %vm458_vm7, %v2527_v14, %v2529_v38  ;;  %3414 = vmatprep.mubr.f32.mxu0 %v6513_v21 }
 0x696   :  { %2764 = vmatprep.subr.mxu1 %v2535_v55 }
 0x697   :  { %2765 = vmatpush1.msra.mxu1 %v2534_v8 }
 0x698   :  { %4360 = vmatmul.mubr.msk.f32.vlgmr.msra.gmra.mrb[8].mxu1 %vm533_vm8, %v6619_v25 }
 0x699   :  { %3485 = vmatprep.mubr.f32.mxu1 %v6513_v21 }
 0x74e   :  { %v2672_v23 = vpop.f32.mrb[10].mxu0 }
 0x74f   :  { %v2820_v46 = vmul.f32 %v2672_v23, %v5810_v57  ;;  %v2674_v16 = vpop.f32.mrb[11].mxu0 }
 0x750   :  { %v2821_v47 = vmul.f32 %v2674_v16, %v5812_v58 }
 0x751   :  { %v2833_v4 = vmul.f32 %v2820_v46, %v2820_v46 }
 0x752   :  { %v2826_v22 = vadd.f32 %v2821_v47, %v2820_v46  ;;  %v2834_v36 = vmul.f32 %v2821_v47, %v2821_v47 }
 0x754   :  { %v2839_v32 = vadd.f32 %v2834_v36, %v2833_v4 }
 0x767   :  { %v2743_v34 = vpop.f32.mrb[12].mxu0 }
 0x768   :  { %v2822_v60 = vmul.f32 %v2743_v34, %v5830_v27  ;;  %v2745_v12 = vpop.f32.mrb[13].mxu0 }
 0x769   :  { %v2823_v24 = vmul.f32 %v2745_v12, %v7259_v2 }
 0x76a   :  { %v2827_v42 = vadd.f32 %v2826_v22, %v2822_v60  ;;  %v2835_v25 = vmul.f32 %v2822_v60, %v2822_v60 }
 0x76b   :  { %v2836_v62 = vmul.f32 %v2823_v24, %v2823_v24  ;;  %v6682_v43 = vpop.f32.mrb[8].mxu1 }
 0x76c   :  { %v2840_v61 = vadd.f32 %v2839_v32, %v2835_v25  ;;  %v2828_v52 = vadd.f32 %v2827_v42, %v2823_v24  ;;  %v2824_v26 = vmul.f32 %v6682_v43, %v7260_v19  ;;  %v6686_v1 = vpop.f32.mrb[9].mxu1 }
 0x76d   :  { %v2825_v31 = vmul.f32 %v6686_v1, %v7261_v3 }
 0x76e   :  { %v2841_v10 = vadd.f32 %v2840_v61, %v2836_v62  ;;  %v2829_v48 = vadd.f32 %v2828_v52, %v2824_v26  ;;  %v2837_v20 = vmul.f32 %v2824_v26, %v2824_v26 }
 0x76f   :  { %v2838_v18 = vmul.f32 %v2825_v31, %v2825_v31 }
 0x770   :  { %v2842_v37 = vadd.f32 %v2841_v10, %v2837_v20  ;;  %v2830_v9 = vadd.f32 %v2829_v48, %v2825_v31 }
 0x772   :  { %2831 = vadd.xlane.f32.xlu0 %v2830_v9  ;;  %v2843_v28 = vadd.f32 %v2842_v37, %v2838_v18 }
 0x774   :  { %2844 = vadd.xlane.f32.xlu1 %v2843_v28 }
 0x785   :  { %2873 = vperm.xlu1 %4789, %v2819_v5  }
 0x7ff   :  { %v2832_v53 = vpop.xlane.xlu0 %2831 }
 0x800   :  { %v2846_v6 = vmul.f32 0.001953125, %v2832_v53 }
 0x801   :  { %v2845_v49 = vpop.xlane.xlu1 %2844 }
 0x802   :  { %v2847_v40 = vmul.f32 0.001953125, %v2845_v49  ;;  %v2848_v54 = vmul.f32 %v2846_v6, %v2846_v6  ;;  %v2854_v33 = vsub.f32 %v2672_v23, %v2846_v6  ;;  %v2855_v29 = vsub.f32 %v2674_v16, %v2846_v6 }
 0x803   :  { %v2856_v50 = vsub.f32 %v2743_v34, %v2846_v6  ;;  %v2857_v51 = vsub.f32 %v2745_v12, %v2846_v6  ;;  %v2858_v41 = vsub.f32 %v6682_v43, %v2846_v6  ;;  %v2859_v44 = vsub.f32 %v6686_v1, %v2846_v6 }
 0x804   :  { %v2849_v63 = vsub.f32 %v2847_v40, %v2848_v54 }
 0x805   :  { %v2874_v59 = vpop.permute.xlu1 %2873 }
 0x806   :  { %v2850_v7 = vmax.f32 %v2849_v63, 0.0 }
 0x808   :  { %v2851_v45 = vadd.f32 1e-05, %v2850_v7 }
 0x80a   :  { %5395 = vrsqrt.f32 %v2851_v45 }
 0x814   :  { %v5396_v17 = vpop.eup %5395 }
 0x815   :  { %v2853_v0 = vmul.f32 %v5396_v17, %v2819_v5 }
 0x817   :  { %2862 = vperm.xlu0 %4786, %v2853_v0  }
 0x81b   :  { %3134 = vrot.lane.b32.xlu0 %v6513_v21, %s5468_s23 }
 0x896   :  { %v2863_v39 = vpop.permute.xlu0 %2862 }
 0x897   :  { %v2865_v56 = vmul.f32 %v2863_v39, %v2854_v33  ;;  %v2866_v13 = vmul.f32 %v2863_v39, %v2855_v29  ;;  %v2867_v35 = vmul.f32 %v2863_v39, %v2856_v50  ;;  %v2868_v46 = vmul.f32 %v2863_v39, %v2857_v51 }
 0x898   :  { %v2869_v12 = vmul.f32 %v2863_v39, %v2858_v41  ;;  %v2870_v61 = vmul.f32 %v2863_v39, %v2859_v44 }
 0x899   :  { %v2876_v15 = vadd.f32 %v2874_v59, %v2865_v56  ;;  %v2877_v11 = vadd.f32 %v2874_v59, %v2866_v13  ;;  %v2878_v30 = vadd.f32 %v2874_v59, %v2867_v35  ;;  %v2879_v32 = vadd.f32 %v2874_v59, %v2868_v46 }
 0x89a   :  { %v2880_v25 = vadd.f32 %v2874_v59, %v2869_v12  ;;  %v2881_v26 = vadd.f32 %v2874_v59, %v2870_v61  ;;  %v6776_v28 = vpop.permute.xlu0 %3134 }
 0x89b   :  { %vm2882_vm14 = vcmp.ge.f32.partialorder %v2876_v15, 0.0  ;;  %vm2883_vm15 = vcmp.ge.f32.partialorder %v2877_v11, 0.0  ;;  %vm2884_vm9 = vcmp.ge.f32.partialorder %v2878_v30, 0.0  ;;  %v2888_v14 = vmul.f32 0.2, %v2876_v15 }
 0x89c   :  { %v2889_v38 = vmul.f32 0.2, %v2877_v11  ;;  %v2890_v8 = vmul.f32 0.2, %v2878_v30  ;;  %v2891_v60 = vmul.f32 0.2, %v2879_v32 }
 0x89d   :  { %v2894_v55 = vsel %vm2882_vm14, %v2876_v15, %v2888_v14  ;;  %vm2885_vm10 = vcmp.ge.f32.partialorder %v2879_v32, 0.0  ;;  %v2892_v52 = vmul.f32 0.2, %v2880_v25  ;;  %vm2886_vm11 = vcmp.ge.f32.partialorder %v2880_v25, 0.0 }
 0x89e   :  { %v2895_v23 = vsel %vm2883_vm15, %v2877_v11, %v2889_v38  ;;  %v2896_v16 = vsel %vm2884_vm9, %v2878_v30, %v2890_v8  ;;  %v6698_v47 = vmul.f32 %v2894_v55, %v5810_v57  ;;  %v2897_v24 = vsel %vm2885_vm10, %v2879_v32, %v2891_v60 }
 0x89f   :  { %v6701_v4 = vmul.f32 %v2895_v23, %v5812_v58  ;;  %v6704_v22 = vmul.f32 %v2896_v16, %v5830_v27  ;;  %v6717_v42 = vmul.f32 %v2897_v24, %v7259_v2  ;;  %v2898_v1 = vsel %vm2886_vm11, %v2880_v25, %v2892_v52 }
 0x8a0   :  { %v6730_v31 = vmul.f32 %v2898_v1, %v7260_v19  ;;  %v2893_v10 = vmul.f32 0.2, %v2881_v26  ;;  %vm2887_vm12 = vcmp.ge.f32.partialorder %v2881_v26, 0.0 }
 0x8a1   :  { %v5180_v36 = vpack.i.bf16 %v6701_v4, %v6698_v47  ;;  %v5190_v34 = vpack.i.bf16 %v6704_v22, %v6513_v21  ;;  %v5220_v62 = vpack.i.bf16 %v6717_v42, %v6698_v47  ;;  %v5215_v43 = vpack.i.bf16 %v6704_v22, %v6701_v4 }
 0x8a2   :  { %v5245_v48 = vpack.i.bf16 %v6730_v31, %v6717_v42  ;;  %v2899_v20 = vsel %vm2887_vm12, %v2881_v26, %v2893_v10 }
 0x8a3   :  { %5181 = vrot.lane.b32.xlu1 %v5180_v36, %s5466_s21  ;;  %5176 = vrot.lane.b32.xlu0 %v5180_v36, %s5465_s0  ;;  %v6740_v18 = vmul.f32 %v2899_v20, %v7261_v3 }
 0x8a5   :  { %v5260_v37 = vpack.i.bf16 %v6740_v18, %v6730_v31  ;;  %v5275_v9 = vpack.i.bf16 %v6513_v21, %v6740_v18 }
 0x8a7   :  { %5191 = vrot.lane.b32.xlu1 %v5190_v34, %s5466_s21  ;;  %5186 = vrot.lane.b32.xlu0 %v5190_v34, %s5465_s0 }
 0x8ab   :  { %5201 = vrot.lane.b32.xlu1 %v5180_v36, %s5467_s22  ;;  %5196 = vrot.lane.b32.xlu0 %v5180_v36, %s5464_s20 }
 0x8af   :  { %5211 = vrot.lane.b32.xlu1 %v5190_v34, %s5467_s22  ;;  %5206 = vrot.lane.b32.xlu0 %v5190_v34, %s5464_s20 }
 0x8b3   :  { %5221 = vrot.lane.b32.xlu1 %v5220_v62, %s5468_s23  ;;  %5216 = vrot.lane.b32.xlu0 %v5215_v43, %s5468_s23 }
 0x8b7   :  { %5231 = vrot.lane.b32.xlu1 %v5215_v43, %s5470_s25  ;;  %5226 = vrot.lane.b32.xlu0 %v5215_v43, %s5469_s24 }
 0x8bb   :  { %3214 = vrot.lane.b32.xlu1 %v6698_v47, %s5470_s25  ;;  %5236 = vrot.lane.b32.xlu0 %v5220_v62, %s5469_s24 }
 0x8bf   :  { %5246 = vrot.lane.b32.xlu1 %v5245_v48, %s5466_s21  ;;  %5241 = vrot.lane.b32.xlu0 %v5245_v48, %s5465_s0 }
 0x8c3   :  { %2984 = vrot.lane.b32.xlu1 %v6740_v18, %s5466_s21  ;;  %2938 = vrot.lane.b32.xlu0 %v6740_v18, %s5465_s0 }
 0x8c7   :  { %5256 = vrot.lane.b32.xlu1 %v5245_v48, %s5467_s22  ;;  %5251 = vrot.lane.b32.xlu0 %v5245_v48, %s5464_s20 }
 0x8cb   :  { %3264 = vrot.lane.b32.xlu1 %v6704_v22, %s5471_s26  ;;  %3262 = vrot.lane.b32.xlu0 %v6701_v4, %s5471_s26 }
 0x8cf   :  { %3030 = vrot.lane.b32.xlu1 %v6740_v18, %s5464_s20  ;;  %3260 = vrot.lane.b32.xlu0 %v6698_v47, %s5471_s26 }
 0x8d3   :  { %5261 = vrot.lane.b32.xlu1 %v5260_v37, %s5468_s23  ;;  %3076 = vrot.lane.b32.xlu0 %v6740_v18, %s5467_s22 }
 0x8d7   :  { %5266 = vrot.lane.b32.xlu1 %v5260_v37, %s5469_s24  ;;  %5271 = vrot.lane.b32.xlu0 %v5245_v48, %s5470_s25 }
 0x8db   :  { %3180 = vrot.lane.b32.xlu1 %v6513_v21, %s5469_s24  ;;  %5276 = vrot.lane.b32.xlu0 %v5275_v9, %s5470_s25 }
 0x8df   :  { %3266 = vrot.lane.b32.xlu1 %v6717_v42, %s5471_s26  ;;  %3268 = vrot.lane.b32.xlu0 %v6730_v31, %s5471_s26 }
 0x8e3   :  { %3270 = vrot.lane.b32.xlu1 %v6740_v18, %s5471_s26  ;;  %3272 = vrot.lane.b32.xlu0 %v6513_v21, %s5471_s26 }
 0x915   :  { %v6778_v5 = vpop.permute.xlu1 %5181  ;;  %v6780_v53 = vpop.permute.xlu0 %5176 }
 0x916   :  { %v5184_v6 = vunpack.i.h.bf16 %v6778_v5  ;;  %v5183_v49 = vunpack.i.l.bf16 %v6778_v5  ;;  %v5179_v40 = vunpack.i.h.bf16 %v6780_v53  ;;  %v5178_v54 = vunpack.i.l.bf16 %v6780_v53 }
 0x918   :  { %v2941_v33 = vsel %vm117_vm0, %v5178_v54, %v5179_v40  ;;  %v2987_v29 = vsel %vm164_vm1, %v5183_v49, %v5184_v6 }
 0x919   :  { %v6792_v50 = vpop.permute.xlu1 %5191  ;;  %v6794_v51 = vpop.permute.xlu0 %5186  ;;  %v4571_v41 = vpack.c.bf16 %v2987_v29, %v2941_v33 }
 0x91a   :  { %v5193_v44 = vunpack.i.l.bf16 %v6792_v50  ;;  %v5188_v63 = vunpack.i.l.bf16 %v6794_v51  ;;  %v5189_v33 = vunpack.i.h.bf16 %v6794_v51 }
 0x91b   :  { %4572 = vmatprep.subr.bf16.mxu0 %v4571_v41 }
 0x91c   :  { %v2986_v7 = vsel %vm164_vm1, %v5193_v44, %v5183_v49  ;;  %v2940_v45 = vsel %vm117_vm0, %v5188_v63, %v5178_v54  ;;  %v5194_v54 = vunpack.i.h.bf16 %v6792_v50  ;;  %v2942_v50 = vsel %vm117_vm0, %v5179_v40, %v5189_v33 }
 0x91d   :  { %v4573_v17 = vpack.c.bf16 %v2986_v7, %v2940_v45  ;;  %v6800_v0 = vpop.permute.xlu1 %5201  ;;  %v6802_v39 = vpop.permute.xlu0 %5196 }
 0x91e   :  { %v5204_v56 = vunpack.i.h.bf16 %v6800_v0  ;;  %v5203_v13 = vunpack.i.l.bf16 %v6800_v0  ;;  %v5199_v35 = vunpack.i.h.bf16 %v6802_v39  ;;  %v5198_v59 = vunpack.i.l.bf16 %v6802_v39 }
 0x91f   :  { %4574 = vmatpush1.bf16.msra.mxu0 %v4573_v17 }
 0x920   :  { %v3033_v15 = vsel %vm211_vm2, %v5198_v59, %v5199_v35  ;;  %v3079_v11 = vsel %vm258_vm3, %v5203_v13, %v5204_v56 }
 0x921   :  { %v6814_v30 = vpop.permute.xlu1 %5211  ;;  %v6816_v14 = vpop.permute.xlu0 %5206  ;;  %v4575_v38 = vpack.c.bf16 %v3079_v11, %v3033_v15 }
 0x922   :  { %v5213_v8 = vunpack.i.l.bf16 %v6814_v30  ;;  %v5208_v55 = vunpack.i.l.bf16 %v6816_v14 }
 0x923   :  { %4576 = vmatprep.subr.bf16.mxu0 %v4575_v38 }
 0x924   :  { %v3078_v23 = vsel %vm258_vm3, %v5213_v8, %v5203_v13  ;;  %v3032_v46 = vsel %vm211_vm2, %v5208_v55, %v5198_v59  ;;  %v2988_v13 = vsel %vm164_vm1, %v5184_v6, %v5194_v54  ;;  %v5214_v55 = vunpack.i.h.bf16 %v6814_v30 }
 0x925   :  { %v4577_v16 = vpack.c.bf16 %v3078_v23, %v3032_v46  ;;  %v6822_v36 = vpop.permute.xlu1 %5221  ;;  %v6824_v32 = vpop.permute.xlu0 %5216  ;;  %v4589_v8 = vpack.c.bf16 %v2988_v13, %v2942_v50  ;;  %v5209_v23 = vunpack.i.h.bf16 %v6816_v14 }
 0x926   :  { %v5223_v34 = vunpack.i.l.bf16 %v6822_v36  ;;  %v5219_v60 = vunpack.i.h.bf16 %v6824_v32  ;;  %v5218_v12 = vunpack.i.l.bf16 %v6824_v32  ;;  %v3080_v40 = vsel %vm258_vm3, %v5204_v56, %v5214_v55 }
 0x927   :  { %4578 = vmatpush1.bf16.msra.mxu0 %v4577_v16  ;;  %v3034_v16 = vsel %vm211_vm2, %v5199_v35, %v5209_v23 }
 0x928   :  { %v3136_v24 = vsel %vm317_vm4, %v5223_v34, %v5218_v12  ;;  %v3137_v25 = vsel %vm317_vm4, %v5218_v12, %v5219_v60 }
 0x929   :  { %v4581_v62 = vpack.c.bf16 %v3136_v24, %v6698_v47  ;;  %v6834_v43 = vpop.permute.xlu1 %5231  ;;  %v6836_v61 = vpop.permute.xlu0 %5226  ;;  %v4579_v52 = vpack.c.bf16 %v3137_v25, %v6701_v4 }
 0x92a   :  { %v5234_v26 = vunpack.i.h.bf16 %v6834_v43  ;;  %v5233_v1 = vunpack.i.l.bf16 %v6834_v43  ;;  %v5229_v10 = vunpack.i.h.bf16 %v6836_v61  ;;  %v5228_v48 = vunpack.i.l.bf16 %v6836_v61 }
 0x92b   :  { %4580 = vmatprep.subr.bf16.mxu0 %v4579_v52  ;;  %v4593_v52 = vpack.c.bf16 %v3080_v40, %v3034_v16 }
 0x92c   :  { %4582 = vmatpush1.bf16.msra.mxu0 %v4581_v62  ;;  %v3183_v47 = vsel %vm364_vm5, %v5228_v48, %v5229_v10  ;;  %v3229_v20 = vsel %vm411_vm6, %v5233_v1, %v5234_v26 }
 0x92d   :  { %v3215_v37 = vpop.permute.xlu1 %3214  ;;  %v6849_v4 = vpop.permute.xlu0 %5236  ;;  %v4583_v9 = vpack.c.bf16 %v3229_v20, %v3183_v47 }
 0x92e   :  { %v5238_v49 = vunpack.i.l.bf16 %v6849_v4  ;;  %v3228_v29 = vsel %vm411_vm6, %v3215_v37, %v5233_v1 }
 0x92f   :  { %4584 = vmatprep.subr.bf16.mxu0 %v4583_v9  ;;  %v6885_v9 = vld [vmem:[%s7205_s8] sm:$0xff] }
 0x930   :  { %v3182_v41 = vsel %vm364_vm5, %v5238_v49, %v5228_v48 }
 0x931   :  { %v4585_v44 = vpack.c.bf16 %v3228_v29, %v3182_v41  ;;  %v5247_v63 = vpop.permute.xlu1 %5246  ;;  %v5242_v7 = vpop.permute.xlu0 %5241 }
 0x932   :  { %v5248_v45 = vunpack.i.l.bf16 %v5247_v63  ;;  %v5243_v17 = vunpack.i.l.bf16 %v5242_v7  ;;  %v5249_v34 = vunpack.i.h.bf16 %v5247_v63  ;;  %v5244_v12 = vunpack.i.h.bf16 %v5242_v7 }
 0x933   :  { %4586 = vmatpush1.bf16.msra.mxu0 %v4585_v44 }
 0x934   :  { %v2943_v51 = vsel %vm117_vm0, %v5189_v33, %v5243_v17  ;;  %v2989_v59 = vsel %vm164_vm1, %v5194_v54, %v5248_v45  ;;  %v2990_v35 = vsel %vm164_vm1, %v5248_v45, %v5249_v34  ;;  %v2944_v1 = vsel %vm117_vm0, %v5243_v17, %v5244_v12 }
 0x935   :  { %v2985_v15 = vpop.permute.xlu1 %2984  ;;  %v2939_v11 = vpop.permute.xlu0 %2938  ;;  %v4587_v38 = vpack.c.bf16 %v2989_v59, %v2943_v51  ;;  %v5224_v33 = vunpack.i.h.bf16 %v6822_v36  ;;  %v4605_v29 = vpack.c.bf16 %v2990_v35, %v2944_v1  ;;  %v5239_v51 = vunpack.i.h.bf16 %v6849_v4 }
 0x936   :  { %v2991_v56 = vsel %vm164_vm1, %v5249_v34, %v2985_v15  ;;  %v2945_v39 = vsel %vm117_vm0, %v5244_v12, %v2939_v11 }
 0x937   :  { %4588 = vmatprep.subr.bf16.mxu1 %v4587_v38  ;;  %v4603_v49 = vpack.c.bf16 %v2991_v56, %v2945_v39  ;;  %v3138_v50 = vsel %vm317_vm4, %v5219_v60, %v5224_v33 }
 0x938   :  { %4590 = vmatpush1.bf16.msra.mxu1 %v4589_v8  ;;  %v4597_v60 = vpack.c.bf16 %v3138_v50, %v6704_v22 }
 0x939   :  { %v5257_v5 = vpop.permute.xlu1 %5256  ;;  %v5252_v6 = vpop.permute.xlu0 %5251 }
 0x93a   :  { %v5258_v53 = vunpack.i.l.bf16 %v5257_v5  ;;  %v5253_v46 = vunpack.i.l.bf16 %v5252_v6  ;;  %v5259_v48 = vunpack.i.h.bf16 %v5257_v5  ;;  %v5254_v47 = vunpack.i.h.bf16 %v5252_v6 }
 0x93c   :  { %v3035_v30 = vsel %vm211_vm2, %v5209_v23, %v5253_v46  ;;  %v3081_v14 = vsel %vm258_vm3, %v5214_v55, %v5258_v53  ;;  %v3082_v41 = vsel %vm258_vm3, %v5258_v53, %v5259_v48  ;;  %v3036_v44 = vsel %vm211_vm2, %v5253_v46, %v5254_v47 }
 0x93d   :  { %v6874_v24 = vpop.permute.xlu1 %3264  ;;  %v3263_v25 = vpop.permute.xlu0 %3262  ;;  %v4591_v62 = vpack.c.bf16 %v3081_v14, %v3035_v30  ;;  %v4609_v15 = vpack.c.bf16 %v3082_v41, %v3036_v44  ;;  %v3184_v46 = vsel %vm364_vm5, %v5229_v10, %v5239_v51 }
 0x93e   :  { %v3275_v0 = vsel %vm458_vm7, %v3263_v25, %v6874_v24 }
 0x93f   :  { %3366 = vmatprep.subr.mxu0 %v3275_v0  ;;  %4592 = vmatprep.subr.bf16.mxu1 %v4591_v62 }
 0x940   :  { %4594 = vmatpush1.bf16.msra.mxu1 %v4593_v52 }
 0x941   :  { %v3031_v20 = vpop.permute.xlu1 %3030  ;;  %v3261_v37 = vpop.permute.xlu0 %3260 }
 0x942   :  { %v3274_v54 = vsel %vm458_vm7, %v3261_v37, %v3263_v25  ;;  %v3037_v45 = vsel %vm211_vm2, %v5254_v47, %v3031_v20 }
 0x943   :  { %3367 = vmatpush1.msra.mxu0 %v3274_v54 }
 0x944   :  { %4604 = vmatprep.subr.bf16.mxu0 %v4603_v49  ;;  %4361 = vmatmul.mubr.msk.f32.vlgmr.msra.gmra.mrb[14].mxu0 %vm533_vm8, %v6885_v9 }
 0x945   :  { %v5262_v63 = vpop.permute.xlu1 %5261  ;;  %v3077_v7 = vpop.permute.xlu0 %3076  ;;  %4606 = vmatpush1.bf16.msra.mxu0 %v4605_v29  ;;  %3556 = vmatprep.mubr.f32.mxu0 %v6513_v21 }
 0x946   :  { %v5264_v17 = vunpack.i.h.bf16 %v5262_v63  ;;  %v5263_v13 = vunpack.i.l.bf16 %v5262_v63  ;;  %v3083_v36 = vsel %vm258_vm3, %v5259_v48, %v3077_v7 }
 0x947   :  { %v4607_v59 = vpack.c.bf16 %v3083_v36, %v3037_v45 }
 0x948   :  { %v3140_v11 = vsel %vm317_vm4, %v5263_v13, %v5264_v17  ;;  %v3139_v38 = vsel %vm317_vm4, %v5224_v33, %v5263_v13  ;;  %v3141_v8 = vsel %vm317_vm4, %v5264_v17, %v6776_v28 }
 0x949   :  { %v5267_v55 = vpop.permute.xlu1 %5266  ;;  %v5272_v23 = vpop.permute.xlu0 %5271  ;;  %4608 = vmatprep.subr.bf16.mxu0 %v4607_v59  ;;  %v4595_v5 = vpack.c.bf16 %v3139_v38, %v6717_v42  ;;  %v4611_v32 = vpack.c.bf16 %v3141_v8, %v6740_v18  ;;  %v4613_v40 = vpack.c.bf16 %v3140_v11, %v6730_v31 }
 0x94a   :  { %v5268_v6 = vunpack.i.l.bf16 %v5267_v55  ;;  %v5274_v4 = vunpack.i.h.bf16 %v5272_v23  ;;  %v5273_v53 = vunpack.i.l.bf16 %v5272_v23  ;;  %4610 = vmatpush1.bf16.msra.mxu0 %v4609_v15  ;;  %v5269_v28 = vunpack.i.h.bf16 %v5267_v55 }
 0x94b   :  { %4596 = vmatprep.subr.bf16.mxu1 %v4595_v5  ;;  %4612 = vmatprep.subr.bf16.mxu0 %v4611_v32 }
 0x94c   :  { %v3230_v42 = vsel %vm411_vm6, %v5234_v26, %v5273_v53  ;;  %4598 = vmatpush1.bf16.msra.mxu1 %v4597_v60  ;;  %v3185_v22 = vsel %vm364_vm5, %v5239_v51, %v5268_v6  ;;  %v3231_v18 = vsel %vm411_vm6, %v5273_v53, %v5274_v4  ;;  %v3186_v31 = vsel %vm364_vm5, %v5268_v6, %v5269_v28  ;;  %v3563_v60 = vld [vmem:[%s7206_s9] sm:$0xff] }
 0x94d   :  { %v4601_v16 = vpack.c.bf16 %v3230_v42, %v3184_v46  ;;  %v3181_v34 = vpop.permute.xlu1 %3180  ;;  %v5277_v12 = vpop.permute.xlu0 %5276  ;;  %v4599_v61 = vpack.c.bf16 %v3231_v18, %v3185_v22  ;;  %v6940_v6 = vld [vmem:[#allocation2] sm:$0xff] }
 0x94e   :  { %v5279_v30 = vunpack.i.h.bf16 %v5277_v12  ;;  %v5278_v10 = vunpack.i.l.bf16 %v5277_v12  ;;  %4614 = vmatpush1.bf16.msra.mxu0 %v4613_v40  ;;  %v3187_v14 = vsel %vm364_vm5, %v5269_v28, %v3181_v34 }
 0x94f   :  { %4600 = vmatprep.subr.bf16.mxu1 %v4599_v61 }
 0x950   :  { %v3232_v43 = vsel %vm411_vm6, %v5274_v4, %v5278_v10  ;;  %4602 = vmatpush1.bf16.msra.mxu1 %v4601_v16  ;;  %v3233_v26 = vsel %vm411_vm6, %v5278_v10, %v5279_v30 }
 0x951   :  { %v4617_v25 = vpack.c.bf16 %v3232_v43, %v3186_v31  ;;  %v3267_v62 = vpop.permute.xlu1 %3266  ;;  %v3269_v52 = vpop.permute.xlu0 %3268  ;;  %v4615_v0 = vpack.c.bf16 %v3233_v26, %v3187_v14 }
 0x952   :  { %v3276_v56 = vsel %vm458_vm7, %v6874_v24, %v3267_v62  ;;  %v3277_v39 = vsel %vm458_vm7, %v3267_v62, %v3269_v52 }
 0x953   :  { %3437 = vmatprep.subr.mxu1 %v3277_v39  ;;  %4616 = vmatprep.subr.bf16.mxu0 %v4615_v0 }
 0x954   :  { %3438 = vmatpush1.msra.mxu1 %v3276_v56  ;;  %4618 = vmatpush1.bf16.msra.mxu0 %v4617_v25 }
 0x955   :  { %v3271_v35 = vpop.permute.xlu1 %3270  ;;  %v3273_v1 = vpop.permute.xlu0 %3272  ;;  %4362 = vmatmul.mubr.msk.f32.vlgmr.msra.gmra.mrb[10].mxu1 %vm533_vm8, %v6885_v9 }
 0x956   :  { %v3278_v48 = vsel %vm458_vm7, %v3269_v52, %v3271_v35  ;;  %v3279_v47 = vsel %vm458_vm7, %v3271_v35, %v3273_v1  ;;  %4164 = vmatprep.mubr.f32.mxu1 %v6513_v21 }
 0x957   :  { %3508 = vmatprep.subr.mxu0 %v3279_v47 }
 0x958   :  { %3509 = vmatpush1.msra.mxu0 %v3278_v48 }
 0x959   :  { %4363 = vmatmul.mubr.msk.f32.vlgmr.msra.gmra.mrb[16].mxu0 %vm533_vm8, %v6885_v9 }
 0x95a   :  { %4235 = vmatprep.mubr.f32.mxu0 %v6513_v21 }
 0xa17   :  { %v3416_v24 = vpop.f32.mrb[14].mxu0 }
 0xa18   :  { %v3564_v20 = vmul.f32 %v3416_v24, %v5810_v57  ;;  %v3418_v37 = vpop.f32.mrb[15].mxu0 }
 0xa19   :  { %v3565_v49 = vmul.f32 %v3418_v37, %v5812_v58 }
 0xa1a   :  { %v3577_v54 = vmul.f32 %v3564_v20, %v3564_v20 }
 0xa1b   :  { %v3570_v33 = vadd.f32 %v3565_v49, %v3564_v20  ;;  %v3578_v29 = vmul.f32 %v3565_v49, %v3565_v49 }
 0xa1d   :  { %v3583_v41 = vadd.f32 %v3578_v29, %v3577_v54 }
 0xa28   :  { %v3487_v44 = vpop.f32.mrb[10].mxu1 }
 0xa29   :  { %v3566_v63 = vmul.f32 %v3487_v44, %v5830_v27  ;;  %v3489_v7 = vpop.f32.mrb[11].mxu1 }
 0xa2a   :  { %v3567_v45 = vmul.f32 %v3489_v7, %v7259_v2 }
 0xa2b   :  { %v3571_v17 = vadd.f32 %v3570_v33, %v3566_v63  ;;  %v3579_v9 = vmul.f32 %v3566_v63, %v3566_v63 }
 0xa2c   :  { %v3580_v13 = vmul.f32 %v3567_v45, %v3567_v45  ;;  %v3558_v21 = vpop.f32.mrb[16].mxu0 }
 0xa2d   :  { %v3584_v36 = vadd.f32 %v3583_v41, %v3579_v9  ;;  %v3572_v50 = vadd.f32 %v3571_v17, %v3567_v45  ;;  %v3568_v51 = vmul.f32 %v3558_v21, %v7260_v19  ;;  %v3560_v59 = vpop.f32.mrb[17].mxu0 }
 0xa2e   :  { %v3569_v15 = vmul.f32 %v3560_v59, %v7261_v3 }
 0xa2f   :  { %v3585_v11 = vadd.f32 %v3584_v36, %v3580_v13  ;;  %v3573_v38 = vadd.f32 %v3572_v50, %v3568_v51  ;;  %v3581_v8 = vmul.f32 %v3568_v51, %v3568_v51 }
 0xa30   :  { %v3582_v55 = vmul.f32 %v3569_v15, %v3569_v15 }
 0xa31   :  { %v3586_v23 = vadd.f32 %v3585_v11, %v3581_v8  ;;  %v3574_v5 = vadd.f32 %v3573_v38, %v3569_v15  ;;  %v5474_v11 = vmov 0   ;;  %v4091_v38 = vld [vmem:[%s7208_s11] sm:$0xff] }
 0xa33   :  { %3575 = vadd.xlane.f32.xlu1 %v3574_v5  ;;  %v3587_v32 = vadd.f32 %v3586_v23, %v3582_v55 }
 0xa35   :  { %3588 = vadd.xlane.f32.xlu0 %v3587_v32 }
 0xa44   :  { %3617 = vperm.xlu1 %4789, %v3563_v60  }
 0xa48   :  { %3878 = vrot.lane.b32.xlu1 %v6940_v6, %s5468_s23 }
 0xac0   :  { %v3576_v4 = vpop.xlane.xlu1 %3575 }
 0xac1   :  { %v3590_v53 = vmul.f32 0.001953125, %v3576_v4 }
 0xac2   :  { %v3589_v46 = vpop.xlane.xlu0 %3588 }
 0xac3   :  { %v3591_v40 = vmul.f32 0.001953125, %v3589_v46  ;;  %v3592_v28 = vmul.f32 %v3590_v53, %v3590_v53  ;;  %v3598_v42 = vsub.f32 %v3416_v24, %v3590_v53  ;;  %v3599_v22 = vsub.f32 %v3418_v37, %v3590_v53 }
 0xac4   :  { %v3600_v18 = vsub.f32 %v3487_v44, %v3590_v53  ;;  %v3601_v16 = vsub.f32 %v3489_v7, %v3590_v53  ;;  %v3602_v34 = vsub.f32 %v3558_v21, %v3590_v53  ;;  %v3603_v12 = vsub.f32 %v3560_v59, %v3590_v53  ;;  %v3618_v0 = vpop.permute.xlu1 %3617 }
 0xac5   :  { %v3593_v61 = vsub.f32 %v3591_v40, %v3592_v28 }
 0xac7   :  { %v3594_v30 = vmax.f32 %v3593_v61, 0.0 }
 0xac8   :  { %v7032_v8 = vpop.permute.xlu1 %3878 }
 0xac9   :  { %v3595_v10 = vadd.f32 1e-05, %v3594_v30 }
 0xacb   :  { %5397 = vrsqrt.f32 %v3595_v10 }
 0xad5   :  { %v5398_v31 = vpop.eup %5397 }
 0xad6   :  { %v3597_v14 = vmul.f32 %v5398_v31, %v3563_v60 }
 0xad8   :  { %3606 = vperm.xlu0 %4786, %v3597_v14  }
 0xadc   :  { %5385 = vset.pattern.permute.xlu0 %v5474_v11 }
 0xb57   :  { %v3607_v43 = vpop.permute.xlu0 %3606 }
 0xb58   :  { %v3609_v26 = vmul.f32 %v3607_v43, %v3598_v42  ;;  %v3610_v25 = vmul.f32 %v3607_v43, %v3599_v22  ;;  %v3611_v62 = vmul.f32 %v3607_v43, %v3600_v18  ;;  %v3612_v52 = vmul.f32 %v3607_v43, %v3601_v16 }
 0xb59   :  { %v3613_v56 = vmul.f32 %v3607_v43, %v3602_v34  ;;  %v3614_v39 = vmul.f32 %v3607_v43, %v3603_v12 }
 0xb5a   :  { %v3620_v35 = vadd.f32 %v3618_v0, %v3609_v26  ;;  %v3621_v1 = vadd.f32 %v3618_v0, %v3610_v25  ;;  %v3622_v48 = vadd.f32 %v3618_v0, %v3611_v62  ;;  %v3623_v47 = vadd.f32 %v3618_v0, %v3612_v52 }
 0xb5b   :  { %v3624_v24 = vadd.f32 %v3618_v0, %v3613_v56  ;;  %v3625_v20 = vadd.f32 %v3618_v0, %v3614_v39 }
 0xb5c   :  { %vm3626_vm13 = vcmp.ge.f32.partialorder %v3620_v35, 0.0  ;;  %vm3627_vm14 = vcmp.ge.f32.partialorder %v3621_v1, 0.0  ;;  %vm3628_vm15 = vcmp.ge.f32.partialorder %v3622_v48, 0.0  ;;  %vm3629_vm9 = vcmp.ge.f32.partialorder %v3623_v47, 0.0 }
 0xb5d   :  { %vm3630_vm10 = vcmp.ge.f32.partialorder %v3624_v24, 0.0  ;;  %vm3631_vm11 = vcmp.ge.f32.partialorder %v3625_v20, 0.0  ;;  %v3632_v37 = vmul.f32 0.2, %v3620_v35  ;;  %v3633_v49 = vmul.f32 0.2, %v3621_v1 }
 0xb5e   :  { %v3634_v54 = vmul.f32 0.2, %v3622_v48  ;;  %v3635_v33 = vmul.f32 0.2, %v3623_v47  ;;  %v3636_v29 = vmul.f32 0.2, %v3624_v24 }
 0xb5f   :  { %v3637_v41 = vmul.f32 0.2, %v3625_v20  ;;  %v3638_v44 = vsel %vm3626_vm13, %v3620_v35, %v3632_v37  ;;  %v3639_v63 = vsel %vm3627_vm14, %v3621_v1, %v3633_v49 }
 0xb60   :  { %v3640_v7 = vsel %vm3628_vm15, %v3622_v48, %v3634_v54  ;;  %v3641_v45 = vsel %vm3629_vm9, %v3623_v47, %v3635_v33  ;;  %v3642_v17 = vsel %vm3630_vm10, %v3624_v24, %v3636_v29  ;;  %v6945_v9 = vmul.f32 %v3638_v44, %v5810_v57 }
 0xb61   :  { %v3643_v13 = vsel %vm3631_vm11, %v3625_v20, %v3637_v41  ;;  %v6948_v21 = vmul.f32 %v3639_v63, %v5812_v58  ;;  %v6951_v36 = vmul.f32 %v3640_v7, %v5830_v27  ;;  %v6954_v50 = vmul.f32 %v3641_v45, %v7259_v2 }
 0xb62   :  { %v6957_v51 = vmul.f32 %v3642_v17, %v7260_v19  ;;  %v6960_v59 = vmul.f32 %v3643_v13, %v7261_v3  ;;  %3650 = vst [vmem:[#allocation2 + $0x8] sm:$0xff] %v6945_v9 }
 0xb63   :  { %3651 = vst [vmem:[#allocation2 + $0x10] sm:$0xff] %v6948_v21  ;;  %3652 = vst [vmem:[#allocation2 + $0x18] sm:$0xff] %v6951_v36  ;;  %v5285_v57 = vpack.i.bf16 %v6948_v21, %v6945_v9  ;;  %v5295_v58 = vpack.i.bf16 %v6951_v36, %v6940_v6  ;;  %v5325_v27 = vpack.i.bf16 %v6954_v50, %v6945_v9 }
 0xb64   :  { %3653 = vst [vmem:[#allocation2 + $0x20] sm:$0xff] %v6954_v50  ;;  %3654 = vst [vmem:[#allocation2 + $0x28] sm:$0xff] %v6957_v51  ;;  %v5320_v2 = vpack.i.bf16 %v6951_v36, %v6948_v21  ;;  %v5345_v19 = vpack.i.bf16 %v6957_v51, %v6954_v50  ;;  %v5365_v3 = vpack.i.bf16 %v6960_v59, %v6957_v51 }
 0xb65   :  { %3655 = vst [vmem:[#allocation2 + $0x30] sm:$0xff] %v6960_v59  ;;  %5286 = vrot.lane.b32.xlu0 %v5285_v57, %s5466_s21  ;;  %5281 = vrot.lane.b32.xlu1 %v5285_v57, %s5465_s0  ;;  %v5380_v15 = vpack.i.bf16 %v6940_v6, %v6960_v59 }
 0xb69   :  { %5296 = vrot.lane.b32.xlu0 %v5295_v58, %s5466_s21  ;;  %5291 = vrot.lane.b32.xlu1 %v5295_v58, %s5465_s0 }
 0xb6d   :  { %5306 = vrot.lane.b32.xlu0 %v5285_v57, %s5467_s22  ;;  %5301 = vrot.lane.b32.xlu1 %v5285_v57, %s5464_s20 }
 0xb71   :  { %5316 = vrot.lane.b32.xlu0 %v5295_v58, %s5467_s22  ;;  %5311 = vrot.lane.b32.xlu1 %v5295_v58, %s5464_s20 }
 0xb75   :  { %5326 = vrot.lane.b32.xlu0 %v5325_v27, %s5468_s23  ;;  %5321 = vrot.lane.b32.xlu1 %v5320_v2, %s5468_s23 }
 0xb79   :  { %5336 = vrot.lane.b32.xlu0 %v5320_v2, %s5470_s25  ;;  %5331 = vrot.lane.b32.xlu1 %v5320_v2, %s5469_s24 }
 0xb7d   :  { %3958 = vrot.lane.b32.xlu0 %v6945_v9, %s5470_s25  ;;  %5341 = vrot.lane.b32.xlu1 %v5325_v27, %s5469_s24 }
 0xb81   :  { %3682 = vrot.lane.b32.xlu0 %v6960_v59, %s5465_s0  ;;  %5346 = vrot.lane.b32.xlu1 %v5345_v19, %s5465_s0 }
 0xb85   :  { %3728 = vrot.lane.b32.xlu0 %v6960_v59, %s5466_s21  ;;  %5351 = vrot.lane.b32.xlu1 %v5345_v19, %s5466_s21 }
 0xb89   :  { %4008 = vrot.lane.b32.xlu0 %v6951_v36, %s5471_s26  ;;  %4006 = vrot.lane.b32.xlu1 %v6948_v21, %s5471_s26 }
 0xb8d   :  { %5356 = vrot.lane.b32.xlu0 %v5345_v19, %s5464_s20  ;;  %4004 = vrot.lane.b32.xlu1 %v6945_v9, %s5471_s26 }
 0xb91   :  { %5361 = vrot.lane.b32.xlu0 %v5345_v19, %s5467_s22  ;;  %3774 = vrot.lane.b32.xlu1 %v6960_v59, %s5464_s20 }
 0xb95   :  { %5366 = vrot.lane.b32.xlu0 %v5365_v3, %s5468_s23  ;;  %3820 = vrot.lane.b32.xlu1 %v6960_v59, %s5467_s22 }
 0xb99   :  { %5371 = vrot.lane.b32.xlu0 %v5365_v3, %s5469_s24  ;;  %3924 = vrot.lane.b32.xlu1 %v6940_v6, %s5469_s24 }
 0xb9d   :  { %5376 = vrot.lane.b32.xlu0 %v5345_v19, %s5470_s25  ;;  %5381 = vrot.lane.b32.xlu1 %v5380_v15, %s5470_s25 }
 0xba1   :  { %4010 = vrot.lane.b32.xlu0 %v6954_v50, %s5471_s26  ;;  %4012 = vrot.lane.b32.xlu1 %v6957_v51, %s5471_s26 }
 0xba5   :  { %4014 = vrot.lane.b32.xlu0 %v6960_v59, %s5471_s26  ;;  %4016 = vrot.lane.b32.xlu1 %v6940_v6, %s5471_s26 }
 0xba9   :  { %4094 = vperm.xlu0 %5385, %v4091_v38  }
 0xbd7   :  { %v7034_v55 = vpop.permute.xlu0 %5286  ;;  %v7036_v23 = vpop.permute.xlu1 %5281 }
 0xbd8   :  { %v5289_v5 = vunpack.i.h.bf16 %v7034_v55  ;;  %v5288_v32 = vunpack.i.l.bf16 %v7034_v55  ;;  %v5284_v60 = vunpack.i.h.bf16 %v7036_v23  ;;  %v5283_v4 = vunpack.i.l.bf16 %v7036_v23 }
 0xbda   :  { %v3685_v53 = vsel %vm117_vm0, %v5283_v4, %v5284_v60  ;;  %v3731_v46 = vsel %vm164_vm1, %v5288_v32, %v5289_v5 }
 0xbdb   :  { %v7048_v40 = vpop.permute.xlu0 %5296  ;;  %v7050_v28 = vpop.permute.xlu1 %5291  ;;  %v4619_v42 = vpack.c.bf16 %v3731_v46, %v3685_v53 }
 0xbdc   :  { %v5298_v22 = vunpack.i.l.bf16 %v7048_v40  ;;  %v5293_v18 = vunpack.i.l.bf16 %v7050_v28 }
 0xbdd   :  { %4620 = vmatprep.subr.bf16.mxu1 %v4619_v42 }
 0xbde   :  { %v3730_v16 = vsel %vm164_vm1, %v5298_v22, %v5288_v32  ;;  %v3684_v34 = vsel %vm117_vm0, %v5293_v18, %v5283_v4  ;;  %v5299_v32 = vunpack.i.h.bf16 %v7048_v40  ;;  %v5294_v4 = vunpack.i.h.bf16 %v7050_v28 }
 0xbdf   :  { %v4621_v12 = vpack.c.bf16 %v3730_v16, %v3684_v34  ;;  %v7056_v61 = vpop.permute.xlu0 %5306  ;;  %v7058_v30 = vpop.permute.xlu1 %5301 }
 0xbe0   :  { %v5309_v10 = vunpack.i.h.bf16 %v7056_v61  ;;  %v5308_v31 = vunpack.i.l.bf16 %v7056_v61  ;;  %v5304_v14 = vunpack.i.h.bf16 %v7058_v30  ;;  %v5303_v43 = vunpack.i.l.bf16 %v7058_v30 }
 0xbe1   :  { %4622 = vmatpush1.bf16.msra.mxu1 %v4621_v12  ;;  %v3732_v18 = vsel %vm164_vm1, %v5289_v5, %v5299_v32  ;;  %v3686_v16 = vsel %vm117_vm0, %v5284_v60, %v5294_v4 }
 0xbe2   :  { %v3777_v26 = vsel %vm211_vm2, %v5303_v43, %v5304_v14  ;;  %v3823_v25 = vsel %vm258_vm3, %v5308_v31, %v5309_v10 }
 0xbe3   :  { %v7070_v62 = vpop.permute.xlu0 %5316  ;;  %v7072_v52 = vpop.permute.xlu1 %5311  ;;  %v4623_v0 = vpack.c.bf16 %v3823_v25, %v3777_v26  ;;  %v4637_v25 = vpack.c.bf16 %v3732_v18, %v3686_v16 }
 0xbe4   :  { %v5318_v56 = vunpack.i.l.bf16 %v7070_v62  ;;  %v5313_v39 = vunpack.i.l.bf16 %v7072_v52  ;;  %v5319_v60 = vunpack.i.h.bf16 %v7070_v62 }
 0xbe5   :  { %4624 = vmatprep.subr.bf16.mxu1 %v4623_v0 }
 0xbe6   :  { %v3822_v35 = vsel %vm258_vm3, %v5318_v56, %v5308_v31  ;;  %v3776_v1 = vsel %vm211_vm2, %v5313_v39, %v5303_v43 }
 0xbe7   :  { %v4625_v48 = vpack.c.bf16 %v3822_v35, %v3776_v1  ;;  %v7078_v47 = vpop.permute.xlu0 %5326  ;;  %v7080_v24 = vpop.permute.xlu1 %5321  ;;  %v7131_v35 = vld [vmem:[%s7207_s10] sm:$0xff]  ;;  %v5314_v1 = vunpack.i.h.bf16 %v7072_v52  ;;  %v3824_v52 = vsel %vm258_vm3, %v5309_v10, %v5319_v60  ;;  %s5475_s10 = smov [#allocation7]  }
 0xbe8   :  { %v5328_v20 = vunpack.i.l.bf16 %v7078_v47  ;;  %v5324_v37 = vunpack.i.h.bf16 %v7080_v24  ;;  %v5323_v49 = vunpack.i.l.bf16 %v7080_v24  ;;  %s4340_s21 = sshll.u32 %s5475_s10, 4  ;;  %s4341_s21 = int_to_ptr.vmem [resolvable:$true] %s4340_s21 }
 0xbe9   :  { %4626 = vmatpush1.bf16.msra.mxu1 %v4625_v48  ;;  %s5436_s22 = scalar_lea.vmem %s4341_s21, 384  ;;  %p5441_p9 = scmp.lt.s32.totalorder %s4341_s21, %s4341_s21 }
 0xbea   :  { %v3880_v54 = vsel %vm317_vm4, %v5328_v20, %v5323_v49  ;;  %v3881_v33 = vsel %vm317_vm4, %v5323_v49, %v5324_v37  ;;  %p5437_p8 = scmp.ne.s32.totalorder %s4341_s21, %s5436_s22  ;;  %p5442_p10 = scmp.lt.s32.totalorder %s5436_s22, %s5436_s22 }
 0xbeb   :  { %v4629_v29 = vpack.c.bf16 %v3880_v54, %v6945_v9  ;;  %v7090_v41 = vpop.permute.xlu0 %5336  ;;  %v7092_v44 = vpop.permute.xlu1 %5331  ;;  %v4627_v63 = vpack.c.bf16 %v3881_v33, %v6948_v21 }
 0xbec   :  { %v5339_v7 = vunpack.i.h.bf16 %v7090_v41  ;;  %v5338_v45 = vunpack.i.l.bf16 %v7090_v41  ;;  %v5334_v17 = vunpack.i.h.bf16 %v7092_v44  ;;  %v5333_v13 = vunpack.i.l.bf16 %v7092_v44  ;;  %p5443_p11 = por %p5442_p10, %p5441_p9 }
 0xbed   :  { %4628 = vmatprep.subr.bf16.mxu1 %v4627_v63  ;;  %v3778_v63 = vsel %vm211_vm2, %v5304_v14, %v5314_v1 }
 0xbee   :  { %4630 = vmatpush1.bf16.msra.mxu1 %v4629_v29  ;;  %v3927_v9 = vsel %vm364_vm5, %v5333_v13, %v5334_v17  ;;  %v3973_v57 = vsel %vm411_vm6, %v5338_v45, %v5339_v7  ;;  %p5444_p12 = pnand %p5443_p11, %p5437_p8 }
 0xbef   :  { %v3959_v58 = vpop.permute.xlu0 %3958  ;;  %v7105_v21 = vpop.permute.xlu1 %5341  ;;  %v4631_v27 = vpack.c.bf16 %v3973_v57, %v3927_v9  ;;  %v5329_v9 = vunpack.i.h.bf16 %v7078_v47 }
 0xbf0   :  { %v5343_v2 = vunpack.i.l.bf16 %v7105_v21  ;;  %v3972_v19 = vsel %vm411_vm6, %v3959_v58, %v5338_v45  ;;  %v5344_v16 = vunpack.i.h.bf16 %v7105_v21 }
 0xbf1   :  { %4632 = vmatprep.subr.bf16.mxu1 %v4631_v27  ;;  %v3882_v47 = vsel %vm317_vm4, %v5324_v37, %v5329_v9 }
 0xbf2   :  { %v3926_v3 = vsel %vm364_vm5, %v5343_v2, %v5333_v13  ;;  %v4641_v2 = vpack.c.bf16 %v3824_v52, %v3778_v63  ;;  %v4645_v18 = vpack.c.bf16 %v3882_v47, %v6951_v36  ;;  %v3928_v36 = vsel %vm364_vm5, %v5334_v17, %v5344_v16 }
 0xbf3   :  { %v4633_v15 = vpack.c.bf16 %v3972_v19, %v3926_v3  ;;  %v3683_v11 = vpop.permute.xlu0 %3682  ;;  %v5347_v38 = vpop.permute.xlu1 %5346 }
 0xbf4   :  { %v5348_v53 = vunpack.i.l.bf16 %v5347_v38  ;;  %v5349_v31 = vunpack.i.h.bf16 %v5347_v38 }
 0xbf5   :  { %4634 = vmatpush1.bf16.msra.mxu1 %v4633_v15 }
 0xbf6   :  { %v3687_v12 = vsel %vm117_vm0, %v5294_v4, %v5348_v53  ;;  %v3689_v39 = vsel %vm117_vm0, %v5349_v31, %v3683_v11  ;;  %v3688_v48 = vsel %vm117_vm0, %v5348_v53, %v5349_v31 }
 0xbf7   :  { %v3729_v46 = vpop.permute.xlu0 %3728  ;;  %v5352_v42 = vpop.permute.xlu1 %5351 }
 0xbf8   :  { %v5353_v22 = vunpack.i.l.bf16 %v5352_v42  ;;  %v5354_v34 = vunpack.i.h.bf16 %v5352_v42 }
 0xbfa   :  { %v3733_v40 = vsel %vm164_vm1, %v5299_v32, %v5353_v22  ;;  %v3735_v23 = vsel %vm164_vm1, %v5354_v34, %v3729_v46  ;;  %v3734_v5 = vsel %vm164_vm1, %v5353_v22, %v5354_v34 }
 0xbfb   :  { %v7120_v28 = vpop.permute.xlu0 %4008  ;;  %v4007_v43 = vpop.permute.xlu1 %4006  ;;  %v4635_v26 = vpack.c.bf16 %v3733_v40, %v3687_v12  ;;  %v4651_v49 = vpack.c.bf16 %v3735_v23, %v3689_v39  ;;  %v4653_v54 = vpack.c.bf16 %v3734_v5, %v3688_v48 }
 0xbfc   :  { %v4019_v55 = vsel %vm458_vm7, %v4007_v43, %v7120_v28 }
 0xbfd   :  { %4116 = vmatprep.subr.mxu1 %v4019_v55  ;;  %4636 = vmatprep.subr.bf16.mxu0 %v4635_v26 }
 0xbfe   :  { %4638 = vmatpush1.bf16.msra.mxu0 %v4637_v25 }
 0xbff   :  { %v5357_v0 = vpop.permute.xlu0 %5356  ;;  %v4005_v56 = vpop.permute.xlu1 %4004 }
 0xc00   :  { %v4018_v20 = vsel %vm458_vm7, %v4005_v56, %v4007_v43  ;;  %v5358_v33 = vunpack.i.l.bf16 %v5357_v0  ;;  %v5359_v57 = vunpack.i.h.bf16 %v5357_v0 }
 0xc01   :  { %4117 = vmatpush1.msra.mxu1 %v4018_v20 }
 0xc02   :  { %4652 = vmatprep.subr.bf16.mxu1 %v4651_v49  ;;  %4364 = vmatmul.mubr.msk.f32.vlgmr.msra.gmra.mrb[12].mxu1 %vm533_vm8, %v7131_v35  ;;  %v3779_v58 = vsel %vm211_vm2, %v5314_v1, %v5358_v33  ;;  %v3780_v11 = vsel %vm211_vm2, %v5358_v33, %v5359_v57 }
 0xc03   :  { %v5362_v62 = vpop.permute.xlu0 %5361  ;;  %v3775_v29 = vpop.permute.xlu1 %3774  ;;  %4654 = vmatpush1.bf16.msra.mxu1 %v4653_v54  ;;  %4306 = vmatprep.mubr.f32.mxu1 %v6940_v6 }
 0xc04   :  { %v5364_v45 = vunpack.i.h.bf16 %v5362_v62  ;;  %v5363_v13 = vunpack.i.l.bf16 %v5362_v62  ;;  %v3781_v10 = vsel %vm211_vm2, %v5359_v57, %v3775_v29 }
 0xc06   :  { %v3825_v27 = vsel %vm258_vm3, %v5319_v60, %v5363_v13  ;;  %v3826_v6 = vsel %vm258_vm3, %v5363_v13, %v5364_v45 }
 0xc07   :  { %v5367_v19 = vpop.permute.xlu0 %5366  ;;  %v3821_v61 = vpop.permute.xlu1 %3820  ;;  %v4639_v3 = vpack.c.bf16 %v3825_v27, %v3779_v58  ;;  %v4657_v32 = vpack.c.bf16 %v3826_v6, %v3780_v11 }
 0xc08   :  { %v5369_v30 = vunpack.i.h.bf16 %v5367_v19  ;;  %v5368_v15 = vunpack.i.l.bf16 %v5367_v19  ;;  %v3827_v14 = vsel %vm258_vm3, %v5364_v45, %v3821_v61 }
 0xc09   :  { %v4655_v38 = vpack.c.bf16 %v3827_v14, %v3781_v10  ;;  %4640 = vmatprep.subr.bf16.mxu0 %v4639_v3 }
 0xc0a   :  { %4642 = vmatpush1.bf16.msra.mxu0 %v4641_v2  ;;  %v3883_v4 = vsel %vm317_vm4, %v5329_v9, %v5368_v15  ;;  %v3885_v53 = vsel %vm317_vm4, %v5369_v30, %v7032_v8  ;;  %v3884_v46 = vsel %vm317_vm4, %v5368_v15, %v5369_v30 }
 0xc0b   :  { %v5372_v42 = vpop.permute.xlu0 %5371  ;;  %v3925_v22 = vpop.permute.xlu1 %3924  ;;  %4656 = vmatprep.subr.bf16.mxu1 %v4655_v38  ;;  %v4643_v24 = vpack.c.bf16 %v3883_v4, %v6954_v50  ;;  %v4659_v37 = vpack.c.bf16 %v3885_v53, %v6960_v59  ;;  %v4661_v8 = vpack.c.bf16 %v3884_v46, %v6957_v51 }
 0xc0c   :  { %4658 = vmatpush1.bf16.msra.mxu1 %v4657_v32  ;;  %v5374_v34 = vunpack.i.h.bf16 %v5372_v42  ;;  %v5373_v12 = vunpack.i.l.bf16 %v5372_v42 }
 0xc0d   :  { %4644 = vmatprep.subr.bf16.mxu0 %v4643_v24  ;;  %4660 = vmatprep.subr.bf16.mxu1 %v4659_v37 }
 0xc0e   :  { %4646 = vmatpush1.bf16.msra.mxu0 %v4645_v18  ;;  %v3930_v59 = vsel %vm364_vm5, %v5373_v12, %v5374_v34  ;;  %v3931_v21 = vsel %vm364_vm5, %v5374_v34, %v3925_v22  ;;  %v3929_v55 = vsel %vm364_vm5, %v5344_v16, %v5373_v12 }
 0xc0f   :  { %v5377_v40 = vpop.permute.xlu0 %5376  ;;  %v5382_v31 = vpop.permute.xlu1 %5381 }
 0xc10   :  { %v5379_v43 = vunpack.i.h.bf16 %v5377_v40  ;;  %v5378_v26 = vunpack.i.l.bf16 %v5377_v40  ;;  %v5384_v25 = vunpack.i.h.bf16 %v5382_v31  ;;  %v5383_v50 = vunpack.i.l.bf16 %v5382_v31  ;;  %4662 = vmatpush1.bf16.msra.mxu1 %v4661_v8 }
 0xc12   :  { %v3974_v51 = vsel %vm411_vm6, %v5339_v7, %v5378_v26  ;;  %v3976_v23 = vsel %vm411_vm6, %v5379_v43, %v5383_v50  ;;  %v3975_v5 = vsel %vm411_vm6, %v5378_v26, %v5379_v43  ;;  %v3977_v60 = vsel %vm411_vm6, %v5383_v50, %v5384_v25 }
 0xc13   :  { %v4649_v0 = vpack.c.bf16 %v3974_v51, %v3928_v36  ;;  %v4665_v44 = vpack.c.bf16 %v3976_v23, %v3930_v59  ;;  %v4011_v56 = vpop.permute.xlu0 %4010  ;;  %v4013_v17 = vpop.permute.xlu1 %4012  ;;  %v4647_v39 = vpack.c.bf16 %v3975_v5, %v3929_v55  ;;  %v4663_v1 = vpack.c.bf16 %v3977_v60, %v3931_v21 }
 0xc14   :  { %v4021_v41 = vsel %vm458_vm7, %v4011_v56, %v4013_v17  ;;  %v4020_v54 = vsel %vm458_vm7, %v7120_v28, %v4011_v56 }
 0xc15   :  { %4648 = vmatprep.subr.bf16.mxu0 %v4647_v39  ;;  %4664 = vmatprep.subr.bf16.mxu1 %v4663_v1 }
 0xc16   :  { %4650 = vmatpush1.bf16.msra.mxu0 %v4649_v0  ;;  %4666 = vmatpush1.bf16.msra.mxu1 %v4665_v44 }
 0xc17   :  { %v4015_v48 = vpop.permute.xlu0 %4014  ;;  %v4017_v7 = vpop.permute.xlu1 %4016  ;;  %4187 = vmatprep.subr.mxu0 %v4021_v41 }
 0xc18   :  { %v4022_v20 = vsel %vm458_vm7, %v4013_v17, %v4015_v48  ;;  %v4023_v49 = vsel %vm458_vm7, %v4015_v48, %v4017_v7 }
 0xc19   :  { %4258 = vmatprep.subr.mxu1 %v4023_v49 }
 0xc1a   :  { %4188 = vmatpush1.msra.mxu0 %v4020_v54  ;;  %4259 = vmatpush1.msra.mxu1 %v4022_v20 }
 0xc1b   :  { %4365 = vmatmul.mubr.msk.f32.vlgmr.msra.gmra.mrb[18].mxu0 %vm533_vm8, %v7131_v35  ;;  %4366 = vmatmul.mubr.msk.f32.vlgmr.msra.gmra.mrb[14].mxu1 %vm533_vm8, %v7131_v35 }
 0xc28   :  { %v4095_v33 = vpop.permute.xlu0 %4094 }
 0xcd5   :  { %v4166_v62 = vpop.f32.mrb[12].mxu1 }
 0xcd6   :  { %v4167_v29 = vadd.f32 %v4166_v62, %v4095_v33  ;;  %v4168_v52 = vpop.f32.mrb[13].mxu1 }
 0xcd7   :  { %v4169_v63 = vadd.f32 %v4168_v52, %v4095_v33 }
 0xcd8   :  { %5399 = vtanh.f32 %v4167_v29 }
 0xcd9   :  { %5401 = vtanh.f32 %v4169_v63 }
 0xce2   :  { %v5400_v45 = vpop.eup %5399 }
 0xce3   :  { %v5402_v13 = vpop.eup %5401 }
 0xce4   :  { %v4325_v9 = vcombine.low %v5400_v45, %v5402_v13 }
 0xce6   :  { %4331 = vst [vmem:[#allocation7] sm:$0x77] %v4325_v9 }
 0xcee   :  { %v4237_v28 = vpop.f32.mrb[18].mxu0  ;;  %v4308_v57 = vpop.f32.mrb[14].mxu1 }
 0xcef   :  { %v4238_v58 = vadd.f32 %v4237_v28, %v4095_v33  ;;  %v4309_v27 = vadd.f32 %v4308_v57, %v4095_v33  ;;  %v4239_v2 = vpop.f32.mrb[19].mxu0  ;;  %v4310_v6 = vpop.f32.mrb[15].mxu1 }
 0xcf0   :  { %v4240_v19 = vadd.f32 %v4239_v2, %v4095_v33  ;;  %v4311_v61 = vadd.f32 %v4310_v6, %v4095_v33 }
 0xcf1   :  { %5403 = vtanh.f32 %v4238_v58 }
 0xcf2   :  { %5405 = vtanh.f32 %v4309_v27 }
 0xcf3   :  { %5407 = vtanh.f32 %v4240_v19 }
 0xcf4   :  { %5409 = vtanh.f32 %v4311_v61 }
 0xcfb   :  { %v5404_v35 = vpop.eup %5403 }
 0xcfc   :  { %v5406_v3 = vpop.eup %5405 }
 0xcfd   :  { %v5408_v10 = vpop.eup %5407 }
 0xcfe   :  { %v5410_v30 = vpop.eup %5409  ;;  %v4326_v15 = vcombine.low %v5404_v35, %v5408_v10 }
 0xcff   :  { %v4327_v14 = vcombine.low %v5406_v3, %v5410_v30 }
 0xd00   :  { %4332 = vst [vmem:[#allocation7 + $0x8] sm:$0x77] %v4326_v15 }
 0xd01   :  { %4333 = vst [vmem:[#allocation7 + $0x10] sm:$0x77] %v4327_v14 }
 0xd02   :  { %5447 = shalt.err (!%p5444_p12)
}
 0xd03   :  { %s5448_s25 = scalar_lea.hbm %s7209_s12, 384 }
 0xd04   :  { %p5449_p13 = scmp.ne.s32.totalorder %s7209_s12, %s5448_s25  ;;  %p5452_p0 = scmp.lt.u32.totalorder %s5448_s25, %s7209_s12 }
 0xd06   :  { %p5454_p1 = pnand %p5452_p0, %p5449_p13 }
 0xd08   :  { %5457 = shalt.err (!%p5454_p1)
}
 0xd09   :  { %4343 = dma.vmem_to_hbm [thread:$0]  %s4341_s21, 384, %s7209_s12, [#allocation6]  }
 0xd0a   :  { %5460 = dma.done.wait [#allocation6], 384  }
 0xd0b   :  { %5461 = vsyncadd [#allocation6], 4294966912 }
 0xd0c   :  { %4347 = vsyncpa [#allocation5], 1 }
 0xd0d   :  { %4348 = vsyncpa [#allocation6], 1 }

</bundles_post_ra>
